<compile_context>
chip_gen: v7x
topology: tpu7x:2x2x1
jax: 0.10.0
libtpu: 0.0.40
codegen_flags: <defaults>
</compile_context>

<pallas_src>
import functools

import jax
import jax.numpy as jnp
import numpy as np
from jax import lax
from jax.experimental import pallas as pl
from jax.experimental.pallas import tpu as pltpu


# ------------------------------ Pallas kernel --------------------------------

def _fused_conv_block_kernel(seq_ref, x_ref, w_ref, b_ref, out_ref, *scratch,
                             n_batch, cin, cout, kh_sz, kw_sz, sh, sw,
                             ph_pad, pw_pad, h_in, w_in, oh, ow,
                             decompose_in_kernel, has_hardtanh, ht_min, ht_max):
    """Fused Conv2d (+ folded BN) (+ Hardtanh) (+ time mask), whole batch.

    seq_ref : (N,) int32 SMEM              post-conv sequence lengths
    x_ref   : VMEM input, either
                decompose_in_kernel=False: (N, cin*sh*sw, Hq, Wq)  pre-decomposed
                decompose_in_kernel=True : (N, cin, h_in, w_in)    plain NCHW
    w_ref   : (cout*cin*kh*kw,) f32 SMEM   BN-folded conv weights
    b_ref   : (cout,)           f32 SMEM   BN-folded bias
    out_ref : (N, cout, oh, ow) VMEM       masked block output (time on lanes)
    scratch : () or (pad_ref,) where pad_ref: (N, sh*cin, Hq, w_in+2*pw_pad) f32
    """
    f32 = jnp.float32

    if decompose_in_kernel:
        # In-kernel zero-pad + H-phase decomposition of the previous block's
        # activation: eliminates the XLA pad/stack/slice pass (an extra full
        # HBM read+write of the activation) between blocks.  Time-stride must
        # be 1 on this path so every tap stays a unit-stride lane window.
        pad_ref, = scratch
        pad_ref[...] = jnp.zeros_like(pad_ref)
        for h in range(h_in):                       # contiguous row copies only
            r = h + ph_pad
            ph, row = r % sh, r // sh
            pad_ref[:, pl.ds(ph * cin, cin), pl.ds(row, 1), pl.ds(pw_pad, w_in)] = (
                x_ref[:, :, pl.ds(h, 1), :].astype(f32))

        def get_slab(ci, kh, kw):                   # (N, oh, ow) f32
            return pad_ref[:, (kh % sh) * cin + ci, pl.ds(kh // sh, oh),
                           pl.ds(kw, ow)]
    else:
        nphase = sh * sw

        def get_slab(ci, kh, kw):                   # (N, oh, ow) f32
            p = ci * nphase + (kh % sh) * sw + (kw % sw)
            return x_ref[:, p, pl.ds(kh // sh, oh),
                         pl.ds(kw // sw, ow)].astype(f32)

    # Convolution as shifted, unit-stride VPU FMAs with scalar weights in SMEM.
    # TODO(synk): at real channel / tap counts, contract (cin*kh*kw) x (cout)
    # on the MXU with weights in VMEM and use lax.fori_loop + a VMEM
    # accumulator instead of this fully unrolled loop.
    accs = [jnp.zeros((n_batch, oh, ow), f32) for _ in range(cout)]
    for ci in range(cin):
        for kh in range(kh_sz):
            for kw in range(kw_sz):
                slab = get_slab(ci, kh, kw)
                for co in range(cout):
                    widx = ((co * cin + ci) * kh_sz + kh) * kw_sz + kw
                    accs[co] = accs[co] + w_ref[widx] * slab

    # Bias + Hardtanh, then stack channels so the epilogue issues ONE store.
    ys = []
    for co in range(cout):
        y = accs[co] + b_ref[co]
        if has_hardtanh:
            y = jnp.clip(y, ht_min, ht_max)
        ys.append(y)
    y = jnp.stack(ys, axis=1)                       # (N, cout, oh, ow)

    # Time mask generated in-kernel (iota over the lane/time axis), lengths read
    # as SMEM scalars; batch is a small static unroll.
    time_idx = lax.broadcasted_iota(jnp.int32, (cout, oh, ow), 2)
    rows = []
    for n in range(n_batch):
        rows.append(jnp.where(time_idx >= seq_ref[n], 0.0, y[n]))
    out = jnp.stack(rows, axis=0)                   # (N, cout, oh, ow)

    # Single coalesced store per call.  For real utterances (ow >= 128) this is
    # lane-dense; at toy ow flattening to a 128-multiple lane dim would need an
    # in-kernel relayout.  TODO(synk): flatten the out block for tiny ow.
    out_ref[...] = out.astype(out_ref.dtype)


# --------------------------- pallas_call wrapper ------------------------------

def _fused_conv_block_call(seq_out, x, w_flat, b_vec, *, cin, cout, ksize,
                           stride, padding, oh, ow, hardtanh,
                           decompose_in_kernel, out_dtype):
    n_batch = x.shape[0]
    kh_sz, kw_sz = ksize
    sh, sw = stride
    ph_pad, pw_pad = padding
    has_ht = hardtanh is not None
    ht_min, ht_max = hardtanh if has_ht else (0.0, 0.0)

    scratch_shapes = []
    h_in = w_in = 0
    if decompose_in_kernel:
        assert sw == 1, "in-kernel decomposition requires time-stride 1"
        _, c_arr, h_in, w_in = x.shape
        assert c_arr == cin
        hq = max(oh + (kh_sz - 1) // sh, (ph_pad + h_in - 1) // sh + 1)
        wq = w_in + 2 * pw_pad
        scratch_shapes.append(pltpu.VMEM((n_batch, sh * cin, hq, wq), jnp.float32))

    kernel = functools.partial(
        _fused_conv_block_kernel, n_batch=n_batch, cin=cin, cout=cout,
        kh_sz=kh_sz, kw_sz=kw_sz, sh=sh, sw=sw, ph_pad=ph_pad, pw_pad=pw_pad,
        h_in=h_in, w_in=w_in, oh=oh, ow=ow,
        decompose_in_kernel=decompose_in_kernel,
        has_hardtanh=has_ht, ht_min=ht_min, ht_max=ht_max)

    # No grid: whole batch in one invocation (toy shapes are grid-overhead
    # bound).  TODO(synk): for real utterances use grid=(N, cdiv(OW, TW)) with a
    # (KW-1)//SW time halo, both axes "parallel" (v7x 2-TC), and raise
    # vmem_limit_bytes on v5e/v6e if keeping whole-utterance blocks.
    return pl.pallas_call(
        kernel,
        out_shape=jax.ShapeDtypeStruct((n_batch, cout, oh, ow), out_dtype),
        in_specs=[
            pl.BlockSpec(memory_space=pltpu.MemorySpace.SMEM),   # seq lengths
            pl.BlockSpec(memory_space=pltpu.MemorySpace.VMEM),   # activation
            pl.BlockSpec(memory_space=pltpu.MemorySpace.SMEM),   # folded weights
            pl.BlockSpec(memory_space=pltpu.MemorySpace.SMEM),   # folded bias
        ],
        out_specs=pl.BlockSpec(memory_space=pltpu.MemorySpace.VMEM),
        scratch_shapes=scratch_shapes,
    )(seq_out, x, w_flat, b_vec)


# ------------------------------- glue (JAX) -----------------------------------

def _conv_out_len(length, k, s, p, d=1):
    # Matches torch: ((L + 2p - d(k-1) - 1) / s + 1).int()
    return (length + 2 * p - d * (k - 1) - 1) // s + 1


def _phase_decompose(x_nchw, ksize, stride, padding):
    """Zero-pad and space-to-depth by the conv strides (first block only)."""
    KH, KW = ksize
    SH, SW = stride
    PH, PW = padding
    N, C, H, W = x_nchw.shape
    OH = _conv_out_len(H, KH, SH, PH)
    OW = _conv_out_len(W, KW, SW, PW)
    Hq = OH + (KH - 1) // SH
    Wq = OW + (KW - 1) // SW
    Hp = max(SH * Hq, H + 2 * PH)
    Wp = max(SW * Wq, W + 2 * PW)
    xp = jnp.pad(x_nchw, ((0, 0), (0, 0), (PH, Hp - H - PH), (PW, Wp - W - PW)))
    phases = []
    for ph in range(SH):
        for pw in range(SW):
            phases.append(
                xp[:, :,
                   ph: ph + SH * (Hq - 1) + 1: SH,
                   pw: pw + SW * (Wq - 1) + 1: SW])          # (N, C, Hq, Wq)
    xph = jnp.stack(phases, axis=2)                           # (N, C, SH*SW, Hq, Wq)
    return xph.reshape(N, C * SH * SW, Hq, Wq), OH, OW


def mask_cnn_forward(inputs_nchw, seq_lengths, modules, *,
                     activation_dtype=jnp.float32):
    """Pallas-backed MaskCNN.forward.  Returns (output NCHW f32, seq_lengths)."""
    seq = seq_lengths.astype(jnp.int32)
    x = inputs_nchw.astype(activation_dtype)

    # Group modules into fused blocks: Conv2d [+ BatchNorm2d] [+ Hardtanh].
    blocks, i = [], 0
    while i < len(modules):
        if modules[i]["type"] != "conv":
            raise ValueError("each fused block must start with a Conv2d module")
        conv = modules[i]; i += 1
        bn = ht = None
        if i < len(modules) and modules[i]["type"] == "bn":
            bn = modules[i]; i += 1
        if i < len(modules) and modules[i]["type"] == "hardtanh":
            ht = modules[i]; i += 1
        blocks.append((conv, bn, ht))

    for bidx, (conv, bn, ht) in enumerate(blocks):
        w = conv["weight"].astype(jnp.float32)     # (Cout, Cin, KH, KW)
        b = conv["bias"].astype(jnp.float32)       # (Cout,)
        if bn is not None:
            # TODO(synk): BatchNorm2d folded in inference mode (running stats);
            # training-mode batch statistics are not reproduced.
            scale = bn["gamma"] / jnp.sqrt(bn["var"] + bn["eps"])
            shift = bn["beta"] - bn["mean"] * scale
            w = w * scale[:, None, None, None]
            b = b * scale + shift
        cout, cin, _, _ = w.shape

        # Sequence lengths follow the time (W) axis == dim=1 of conv params.
        seq = _conv_out_len(seq, conv["kernel"][1], conv["stride"][1],
                            conv["padding"][1]).astype(jnp.int32)

        _, _, h_cur, w_cur = x.shape
        oh = _conv_out_len(h_cur, conv["kernel"][0], conv["stride"][0],
                           conv["padding"][0])
        ow = _conv_out_len(w_cur, conv["kernel"][1], conv["stride"][1],
                           conv["padding"][1])

        decompose_in_kernel = conv["stride"][1] == 1
        if decompose_in_kernel:
            x_in = x                                  # plain NCHW straight in
        else:
            # TODO(synk): time-strided (SW>1) convs (only the raw-input block in
            # DeepSpeech2) still phase-decompose in the wrapper; SW>1 in-kernel
            # would need lane-strided copies.
            x_in, oh, ow = _phase_decompose(x, conv["kernel"], conv["stride"],
                                            conv["padding"])

        is_last = bidx == len(blocks) - 1
        x = _fused_conv_block_call(
            seq, x_in, w.reshape(-1), b,
            cin=cin, cout=cout, ksize=conv["kernel"], stride=conv["stride"],
            padding=conv["padding"], oh=oh, ow=ow,
            hardtanh=(ht["min"], ht["max"]) if ht is not None else None,
            decompose_in_kernel=decompose_in_kernel,
            out_dtype=jnp.float32 if is_last else activation_dtype)

    return x, seq   # NCHW


# ----------------------------- pure-JAX reference -----------------------------

def mask_cnn_reference(inputs_nchw, seq_lengths, modules):
    seq = seq_lengths.astype(jnp.int32)
    x = inputs_nchw.astype(jnp.float32)
    for m in modules:
        if m["type"] == "conv":
            x = lax.conv_general_dilated(
                x, m["weight"], window_strides=m["stride"],
                padding=[(m["padding"][0],) * 2, (m["padding"][1],) * 2],
                dimension_numbers=("NCHW", "OIHW", "NCHW"),
                precision=lax.Precision.HIGHEST,
            ) + m["bias"].reshape(1, -1, 1, 1)
            seq = _conv_out_len(seq, m["kernel"][1], m["stride"][1],
                                m["padding"][1]).astype(jnp.int32)
        elif m["type"] == "bn":
            scale = m["gamma"] / jnp.sqrt(m["var"] + m["eps"])
            shift = m["beta"] - m["mean"] * scale
            x = x * scale.reshape(1, -1, 1, 1) + shift.reshape(1, -1, 1, 1)
        else:
            x = jnp.clip(x, m["min"], m["max"])
        W = x.shape[3]
        tmask = jnp.arange(W, dtype=jnp.int32)[None, :] >= seq[:, None]   # (N, W)
        x = jnp.where(tmask[:, None, None, :], 0.0, x)
    return x, seq


# ----------------------------------- main --------------------------------------

def _build_modules():
    kp = jax.random.split(jax.random.PRNGKey(1), 12)
    C1, C2 = 4, 4
    modules = [
        dict(type="conv",
             weight=0.1 * jax.random.normal(kp[0], (C1, 1, 3, 3), jnp.float32),
             bias=0.1 * jax.random.normal(kp[1], (C1,), jnp.float32),
             kernel=(3, 3), stride=(2, 2), padding=(1, 1)),
        dict(type="bn",
             gamma=1.0 + 0.1 * jax.random.normal(kp[2], (C1,), jnp.float32),
             beta=0.1 * jax.random.normal(kp[3], (C1,), jnp.float32),
             mean=0.1 * jax.random.normal(kp[4], (C1,), jnp.float32),
             var=0.5 + 0.5 * jnp.abs(jax.random.normal(kp[5], (C1,), jnp.float32)),
             eps=1e-5),
        dict(type="hardtanh", min=0.0, max=20.0),
        dict(type="conv",
             weight=0.1 * jax.random.normal(kp[6], (C2, C1, 3, 3), jnp.float32),
             bias=0.1 * jax.random.normal(kp[7], (C2,), jnp.float32),
             kernel=(3, 3), stride=(2, 1), padding=(1, 1)),
        dict(type="bn",
             gamma=1.0 + 0.1 * jax.random.normal(kp[8], (C2,), jnp.float32),
             beta=0.1 * jax.random.normal(kp[9], (C2,), jnp.float32),
             mean=0.1 * jax.random.normal(kp[10], (C2,), jnp.float32),
             var=0.5 + 0.5 * jnp.abs(jax.random.normal(kp[11], (C2,), jnp.float32)),
             eps=1e-5),
        dict(type="hardtanh", min=0.0, max=20.0),
    ]
    return modules


if __name__ == "__main__":
    key = jax.random.PRNGKey(0)
    N, Cin, H, W = 2, 1, 16, 16          # NCHW: (batch, channel, freq, time)
    x = jax.random.normal(key, (N, Cin, H, W), jnp.float32)
    seq_lengths = jnp.array([16, 11], dtype=jnp.int32)

    modules = _build_modules()

    # activation_dtype=jnp.bfloat16 halves inter-block HBM traffic in
    # production; f32 here so the 1e-3 check against the f32 reference holds.
    fwd = jax.jit(lambda xx, ss: mask_cnn_forward(xx, ss, modules,
                                                  activation_dtype=jnp.float32))
    out, out_lens = fwd(x, seq_lengths)
    out = jax.block_until_ready(out)
    out_lens = jax.block_until_ready(out_lens)

    ref_out, ref_lens = mask_cnn_reference(x, seq_lengths, modules)
    np.testing.assert_allclose(np.asarray(out), np.asarray(ref_out),
                               rtol=1e-3, atol=1e-3)
    np.testing.assert_array_equal(np.asarray(out_lens), np.asarray(ref_lens))

    print("KERNEL_OK")
</pallas_src>

<mosaic_0001>
module attributes {stable_mosaic.version = 11 : i64} {
  func.func @_fused_conv_block_kernel(%arg0: memref<2xi32, #tpu.memory_space<smem>>, %arg1: memref<2x4x8x8xf32, #tpu.memory_space<vmem>>, %arg2: memref<144xf32, #tpu.memory_space<smem>>, %arg3: memref<4xf32, #tpu.memory_space<smem>>, %arg4: memref<2x4x4x8xf32, #tpu.memory_space<vmem>>, %arg5: memref<2x8x5x10xf32, #tpu.memory_space<vmem>>) attributes {dimension_semantics = [], scalar_prefetch = 0 : i64, scratch_operands = 1 : i64, tpu.core_type = #tpu.core_type<tc>} {
    %cst = arith.constant 0.000000e+00 : f32
    %0 = vector.broadcast %cst : f32 to vector<2x8x5x10xf32>
    %c0 = arith.constant 0 : index
    %c0_0 = arith.constant 0 : index
    %c0_1 = arith.constant 0 : index
    %c0_2 = arith.constant 0 : index
    %1 = vector.load %arg5[%c0, %c0_0, %c0_1, %c0_2] : memref<2x8x5x10xf32, #tpu.memory_space<vmem>>, vector<2x8x5x10xf32>
    tpu.vector_store %arg5[%c0, %c0_0, %c0_1, %c0_2], %0 {strides = array<i32>} : memref<2x8x5x10xf32, #tpu.memory_space<vmem>>, vector<2x8x5x10xf32>,
    %c0_3 = arith.constant 0 : index
    %c0_4 = arith.constant 0 : index
    %c0_5 = arith.constant 0 : index
    %c0_6 = arith.constant 0 : index
    %2 = vector.load %arg1[%c0_3, %c0_4, %c0_5, %c0_6] : memref<2x4x8x8xf32, #tpu.memory_space<vmem>>, vector<2x4x1x8xf32>
    %c0_7 = arith.constant 0 : index
    %c4 = arith.constant 4 : index
    %c0_8 = arith.constant 0 : index
    %c1 = arith.constant 1 : index
    %3 = vector.load %arg5[%c0_7, %c4, %c0_8, %c1] : memref<2x8x5x10xf32, #tpu.memory_space<vmem>>, vector<2x4x1x8xf32>
    tpu.vector_store %arg5[%c0_7, %c4, %c0_8, %c1], %2 {strides = array<i32>} : memref<2x8x5x10xf32, #tpu.memory_space<vmem>>, vector<2x4x1x8xf32>,
    %c0_9 = arith.constant 0 : index
    %c0_10 = arith.constant 0 : index
    %c1_11 = arith.constant 1 : index
    %c0_12 = arith.constant 0 : index
    %4 = vector.load %arg1[%c0_9, %c0_10, %c1_11, %c0_12] : memref<2x4x8x8xf32, #tpu.memory_space<vmem>>, vector<2x4x1x8xf32>
    %c0_13 = arith.constant 0 : index
    %c0_14 = arith.constant 0 : index
    %c1_15 = arith.constant 1 : index
    %c1_16 = arith.constant 1 : index
    %5 = vector.load %arg5[%c0_13, %c0_14, %c1_15, %c1_16] : memref<2x8x5x10xf32, #tpu.memory_space<vmem>>, vector<2x4x1x8xf32>
    tpu.vector_store %arg5[%c0_13, %c0_14, %c1_15, %c1_16], %4 {strides = array<i32>} : memref<2x8x5x10xf32, #tpu.memory_space<vmem>>, vector<2x4x1x8xf32>,
    %c0_17 = arith.constant 0 : index
    %c0_18 = arith.constant 0 : index
    %c2 = arith.constant 2 : index
    %c0_19 = arith.constant 0 : index
    %6 = vector.load %arg1[%c0_17, %c0_18, %c2, %c0_19] : memref<2x4x8x8xf32, #tpu.memory_space<vmem>>, vector<2x4x1x8xf32>
    %c0_20 = arith.constant 0 : index
    %c4_21 = arith.constant 4 : index
    %c1_22 = arith.constant 1 : index
    %c1_23 = arith.constant 1 : index
    %7 = vector.load %arg5[%c0_20, %c4_21, %c1_22, %c1_23] : memref<2x8x5x10xf32, #tpu.memory_space<vmem>>, vector<2x4x1x8xf32>
    tpu.vector_store %arg5[%c0_20, %c4_21, %c1_22, %c1_23], %6 {strides = array<i32>} : memref<2x8x5x10xf32, #tpu.memory_space<vmem>>, vector<2x4x1x8xf32>,
    %c0_24 = arith.constant 0 : index
    %c0_25 = arith.constant 0 : index
    %c3 = arith.constant 3 : index
    %c0_26 = arith.constant 0 : index
    %8 = vector.load %arg1[%c0_24, %c0_25, %c3, %c0_26] : memref<2x4x8x8xf32, #tpu.memory_space<vmem>>, vector<2x4x1x8xf32>
    %c0_27 = arith.constant 0 : index
    %c0_28 = arith.constant 0 : index
    %c2_29 = arith.constant 2 : index
    %c1_30 = arith.constant 1 : index
    %9 = vector.load %arg5[%c0_27, %c0_28, %c2_29, %c1_30] : memref<2x8x5x10xf32, #tpu.memory_space<vmem>>, vector<2x4x1x8xf32>
    tpu.vector_store %arg5[%c0_27, %c0_28, %c2_29, %c1_30], %8 {strides = array<i32>} : memref<2x8x5x10xf32, #tpu.memory_space<vmem>>, vector<2x4x1x8xf32>,
    %c0_31 = arith.constant 0 : index
    %c0_32 = arith.constant 0 : index
    %c4_33 = arith.constant 4 : index
    %c0_34 = arith.constant 0 : index
    %10 = vector.load %arg1[%c0_31, %c0_32, %c4_33, %c0_34] : memref<2x4x8x8xf32, #tpu.memory_space<vmem>>, vector<2x4x1x8xf32>
    %c0_35 = arith.constant 0 : index
    %c4_36 = arith.constant 4 : index
    %c2_37 = arith.constant 2 : index
    %c1_38 = arith.constant 1 : index
    %11 = vector.load %arg5[%c0_35, %c4_36, %c2_37, %c1_38] : memref<2x8x5x10xf32, #tpu.memory_space<vmem>>, vector<2x4x1x8xf32>
    tpu.vector_store %arg5[%c0_35, %c4_36, %c2_37, %c1_38], %10 {strides = array<i32>} : memref<2x8x5x10xf32, #tpu.memory_space<vmem>>, vector<2x4x1x8xf32>,
    %c0_39 = arith.constant 0 : index
    %c0_40 = arith.constant 0 : index
    %c5 = arith.constant 5 : index
    %c0_41 = arith.constant 0 : index
    %12 = vector.load %arg1[%c0_39, %c0_40, %c5, %c0_41] : memref<2x4x8x8xf32, #tpu.memory_space<vmem>>, vector<2x4x1x8xf32>
    %c0_42 = arith.constant 0 : index
    %c0_43 = arith.constant 0 : index
    %c3_44 = arith.constant 3 : index
    %c1_45 = arith.constant 1 : index
    %13 = vector.load %arg5[%c0_42, %c0_43, %c3_44, %c1_45] : memref<2x8x5x10xf32, #tpu.memory_space<vmem>>, vector<2x4x1x8xf32>
    tpu.vector_store %arg5[%c0_42, %c0_43, %c3_44, %c1_45], %12 {strides = array<i32>} : memref<2x8x5x10xf32, #tpu.memory_space<vmem>>, vector<2x4x1x8xf32>,
    %c0_46 = arith.constant 0 : index
    %c0_47 = arith.constant 0 : index
    %c6 = arith.constant 6 : index
    %c0_48 = arith.constant 0 : index
    %14 = vector.load %arg1[%c0_46, %c0_47, %c6, %c0_48] : memref<2x4x8x8xf32, #tpu.memory_space<vmem>>, vector<2x4x1x8xf32>
    %c0_49 = arith.constant 0 : index
    %c4_50 = arith.constant 4 : index
    %c3_51 = arith.constant 3 : index
    %c1_52 = arith.constant 1 : index
    %15 = vector.load %arg5[%c0_49, %c4_50, %c3_51, %c1_52] : memref<2x8x5x10xf32, #tpu.memory_space<vmem>>, vector<2x4x1x8xf32>
    tpu.vector_store %arg5[%c0_49, %c4_50, %c3_51, %c1_52], %14 {strides = array<i32>} : memref<2x8x5x10xf32, #tpu.memory_space<vmem>>, vector<2x4x1x8xf32>,
    %c0_53 = arith.constant 0 : index
    %c0_54 = arith.constant 0 : index
    %c7 = arith.constant 7 : index
    %c0_55 = arith.constant 0 : index
    %16 = vector.load %arg1[%c0_53, %c0_54, %c7, %c0_55] : memref<2x4x8x8xf32, #tpu.memory_space<vmem>>, vector<2x4x1x8xf32>
    %c0_56 = arith.constant 0 : index
    %c0_57 = arith.constant 0 : index
    %c4_58 = arith.constant 4 : index
    %c1_59 = arith.constant 1 : index
    %17 = vector.load %arg5[%c0_56, %c0_57, %c4_58, %c1_59] : memref<2x8x5x10xf32, #tpu.memory_space<vmem>>, vector<2x4x1x8xf32>
    tpu.vector_store %arg5[%c0_56, %c0_57, %c4_58, %c1_59], %16 {strides = array<i32>} : memref<2x8x5x10xf32, #tpu.memory_space<vmem>>, vector<2x4x1x8xf32>,
    %cst_60 = arith.constant 0.000000e+00 : f32
    %18 = vector.broadcast %cst_60 : f32 to vector<2x4x8xf32>
    %cst_61 = arith.constant 0.000000e+00 : f32
    %19 = vector.broadcast %cst_61 : f32 to vector<2x4x8xf32>
    %cst_62 = arith.constant 0.000000e+00 : f32
    %20 = vector.broadcast %cst_62 : f32 to vector<2x4x8xf32>
    %cst_63 = arith.constant 0.000000e+00 : f32
    %21 = vector.broadcast %cst_63 : f32 to vector<2x4x8xf32>
    %c0_64 = arith.constant 0 : index
    %c0_65 = arith.constant 0 : index
    %c0_66 = arith.constant 0 : index
    %c0_67 = arith.constant 0 : index
    %22 = vector.load %arg5[%c0_64, %c0_65, %c0_66, %c0_67] : memref<2x8x5x10xf32, #tpu.memory_space<vmem>>, vector<2x1x4x8xf32>
    %23 = vector.shape_cast %22 : vector<2x1x4x8xf32> to vector<2x4x8xf32>
    %c0_68 = arith.constant 0 : index
    %24 = memref.load %arg2[%c0_68] : memref<144xf32, #tpu.memory_space<smem>>
    %25 = vector.broadcast %24 : f32 to vector<2x4x8xf32>
    %26 = arith.mulf %25, %23 : vector<2x4x8xf32>
    %27 = arith.addf %18, %26 : vector<2x4x8xf32>
    %c36 = arith.constant 36 : index
    %28 = memref.load %arg2[%c36] : memref<144xf32, #tpu.memory_space<smem>>
    %29 = vector.broadcast %28 : f32 to vector<2x4x8xf32>
    %30 = arith.mulf %29, %23 : vector<2x4x8xf32>
    %31 = arith.addf %19, %30 : vector<2x4x8xf32>
    %c72 = arith.constant 72 : index
    %32 = memref.load %arg2[%c72] : memref<144xf32, #tpu.memory_space<smem>>
    %33 = vector.broadcast %32 : f32 to vector<2x4x8xf32>
    %34 = arith.mulf %33, %23 : vector<2x4x8xf32>
    %35 = arith.addf %20, %34 : vector<2x4x8xf32>
    %c108 = arith.constant 108 : index
    %36 = memref.load %arg2[%c108] : memref<144xf32, #tpu.memory_space<smem>>
    %37 = vector.broadcast %36 : f32 to vector<2x4x8xf32>
    %38 = arith.mulf %37, %23 : vector<2x4x8xf32>
    %39 = arith.addf %21, %38 : vector<2x4x8xf32>
    %c0_69 = arith.constant 0 : index
    %c0_70 = arith.constant 0 : index
    %c0_71 = arith.constant 0 : index
    %c1_72 = arith.constant 1 : index
    %40 = vector.load %arg5[%c0_69, %c0_70, %c0_71, %c1_72] : memref<2x8x5x10xf32, #tpu.memory_space<vmem>>, vector<2x1x4x8xf32>
    %41 = vector.shape_cast %40 : vector<2x1x4x8xf32> to vector<2x4x8xf32>
    %c1_73 = arith.constant 1 : index
    %42 = memref.load %arg2[%c1_73] : memref<144xf32, #tpu.memory_space<smem>>
    %43 = vector.broadcast %42 : f32 to vector<2x4x8xf32>
    %44 = arith.mulf %43, %41 : vector<2x4x8xf32>
    %45 = arith.addf %27, %44 : vector<2x4x8xf32>
    %c37 = arith.constant 37 : index
    %46 = memref.load %arg2[%c37] : memref<144xf32, #tpu.memory_space<smem>>
    %47 = vector.broadcast %46 : f32 to vector<2x4x8xf32>
    %48 = arith.mulf %47, %41 : vector<2x4x8xf32>
    %49 = arith.addf %31, %48 : vector<2x4x8xf32>
    %c73 = arith.constant 73 : index
    %50 = memref.load %arg2[%c73] : memref<144xf32, #tpu.memory_space<smem>>
    %51 = vector.broadcast %50 : f32 to vector<2x4x8xf32>
    %52 = arith.mulf %51, %41 : vector<2x4x8xf32>
    %53 = arith.addf %35, %52 : vector<2x4x8xf32>
    %c109 = arith.constant 109 : index
    %54 = memref.load %arg2[%c109] : memref<144xf32, #tpu.memory_space<smem>>
    %55 = vector.broadcast %54 : f32 to vector<2x4x8xf32>
    %56 = arith.mulf %55, %41 : vector<2x4x8xf32>
    %57 = arith.addf %39, %56 : vector<2x4x8xf32>
    %c0_74 = arith.constant 0 : index
    %c0_75 = arith.constant 0 : index
    %c0_76 = arith.constant 0 : index
    %c2_77 = arith.constant 2 : index
    %58 = vector.load %arg5[%c0_74, %c0_75, %c0_76, %c2_77] : memref<2x8x5x10xf32, #tpu.memory_space<vmem>>, vector<2x1x4x8xf32>
    %59 = vector.shape_cast %58 : vector<2x1x4x8xf32> to vector<2x4x8xf32>
    %c2_78 = arith.constant 2 : index
    %60 = memref.load %arg2[%c2_78] : memref<144xf32, #tpu.memory_space<smem>>
    %61 = vector.broadcast %60 : f32 to vector<2x4x8xf32>
    %62 = arith.mulf %61, %59 : vector<2x4x8xf32>
    %63 = arith.addf %45, %62 : vector<2x4x8xf32>
    %c38 = arith.constant 38 : index
    %64 = memref.load %arg2[%c38] : memref<144xf32, #tpu.memory_space<smem>>
    %65 = vector.broadcast %64 : f32 to vector<2x4x8xf32>
    %66 = arith.mulf %65, %59 : vector<2x4x8xf32>
    %67 = arith.addf %49, %66 : vector<2x4x8xf32>
    %c74 = arith.constant 74 : index
    %68 = memref.load %arg2[%c74] : memref<144xf32, #tpu.memory_space<smem>>
    %69 = vector.broadcast %68 : f32 to vector<2x4x8xf32>
    %70 = arith.mulf %69, %59 : vector<2x4x8xf32>
    %71 = arith.addf %53, %70 : vector<2x4x8xf32>
    %c110 = arith.constant 110 : index
    %72 = memref.load %arg2[%c110] : memref<144xf32, #tpu.memory_space<smem>>
    %73 = vector.broadcast %72 : f32 to vector<2x4x8xf32>
    %74 = arith.mulf %73, %59 : vector<2x4x8xf32>
    %75 = arith.addf %57, %74 : vector<2x4x8xf32>
    %c0_79 = arith.constant 0 : index
    %c4_80 = arith.constant 4 : index
    %c0_81 = arith.constant 0 : index
    %c0_82 = arith.constant 0 : index
    %76 = vector.load %arg5[%c0_79, %c4_80, %c0_81, %c0_82] : memref<2x8x5x10xf32, #tpu.memory_space<vmem>>, vector<2x1x4x8xf32>
    %77 = vector.shape_cast %76 : vector<2x1x4x8xf32> to vector<2x4x8xf32>
    %c3_83 = arith.constant 3 : index
    %78 = memref.load %arg2[%c3_83] : memref<144xf32, #tpu.memory_space<smem>>
    %79 = vector.broadcast %78 : f32 to vector<2x4x8xf32>
    %80 = arith.mulf %79, %77 : vector<2x4x8xf32>
    %81 = arith.addf %63, %80 : vector<2x4x8xf32>
    %c39 = arith.constant 39 : index
    %82 = memref.load %arg2[%c39] : memref<144xf32, #tpu.memory_space<smem>>
    %83 = vector.broadcast %82 : f32 to vector<2x4x8xf32>
    %84 = arith.mulf %83, %77 : vector<2x4x8xf32>
    %85 = arith.addf %67, %84 : vector<2x4x8xf32>
    %c75 = arith.constant 75 : index
    %86 = memref.load %arg2[%c75] : memref<144xf32, #tpu.memory_space<smem>>
    %87 = vector.broadcast %86 : f32 to vector<2x4x8xf32>
    %88 = arith.mulf %87, %77 : vector<2x4x8xf32>
    %89 = arith.addf %71, %88 : vector<2x4x8xf32>
    %c111 = arith.constant 111 : index
    %90 = memref.load %arg2[%c111] : memref<144xf32, #tpu.memory_space<smem>>
    %91 = vector.broadcast %90 : f32 to vector<2x4x8xf32>
    %92 = arith.mulf %91, %77 : vector<2x4x8xf32>
    %93 = arith.addf %75, %92 : vector<2x4x8xf32>
    %c0_84 = arith.constant 0 : index
    %c4_85 = arith.constant 4 : index
    %c0_86 = arith.constant 0 : index
    %c1_87 = arith.constant 1 : index
    %94 = vector.load %arg5[%c0_84, %c4_85, %c0_86, %c1_87] : memref<2x8x5x10xf32, #tpu.memory_space<vmem>>, vector<2x1x4x8xf32>
    %95 = vector.shape_cast %94 : vector<2x1x4x8xf32> to vector<2x4x8xf32>
    %c4_88 = arith.constant 4 : index
    %96 = memref.load %arg2[%c4_88] : memref<144xf32, #tpu.memory_space<smem>>
    %97 = vector.broadcast %96 : f32 to vector<2x4x8xf32>
    %98 = arith.mulf %97, %95 : vector<2x4x8xf32>
    %99 = arith.addf %81, %98 : vector<2x4x8xf32>
    %c40 = arith.constant 40 : index
    %100 = memref.load %arg2[%c40] : memref<144xf32, #tpu.memory_space<smem>>
    %101 = vector.broadcast %100 : f32 to vector<2x4x8xf32>
    %102 = arith.mulf %101, %95 : vector<2x4x8xf32>
    %103 = arith.addf %85, %102 : vector<2x4x8xf32>
    %c76 = arith.constant 76 : index
    %104 = memref.load %arg2[%c76] : memref<144xf32, #tpu.memory_space<smem>>
    %105 = vector.broadcast %104 : f32 to vector<2x4x8xf32>
    %106 = arith.mulf %105, %95 : vector<2x4x8xf32>
    %107 = arith.addf %89, %106 : vector<2x4x8xf32>
    %c112 = arith.constant 112 : index
    %108 = memref.load %arg2[%c112] : memref<144xf32, #tpu.memory_space<smem>>
    %109 = vector.broadcast %108 : f32 to vector<2x4x8xf32>
    %110 = arith.mulf %109, %95 : vector<2x4x8xf32>
    %111 = arith.addf %93, %110 : vector<2x4x8xf32>
    %c0_89 = arith.constant 0 : index
    %c4_90 = arith.constant 4 : index
    %c0_91 = arith.constant 0 : index
    %c2_92 = arith.constant 2 : index
    %112 = vector.load %arg5[%c0_89, %c4_90, %c0_91, %c2_92] : memref<2x8x5x10xf32, #tpu.memory_space<vmem>>, vector<2x1x4x8xf32>
    %113 = vector.shape_cast %112 : vector<2x1x4x8xf32> to vector<2x4x8xf32>
    %c5_93 = arith.constant 5 : index
    %114 = memref.load %arg2[%c5_93] : memref<144xf32, #tpu.memory_space<smem>>
    %115 = vector.broadcast %114 : f32 to vector<2x4x8xf32>
    %116 = arith.mulf %115, %113 : vector<2x4x8xf32>
    %117 = arith.addf %99, %116 : vector<2x4x8xf32>
    %c41 = arith.constant 41 : index
    %118 = memref.load %arg2[%c41] : memref<144xf32, #tpu.memory_space<smem>>
    %119 = vector.broadcast %118 : f32 to vector<2x4x8xf32>
    %120 = arith.mulf %119, %113 : vector<2x4x8xf32>
    %121 = arith.addf %103, %120 : vector<2x4x8xf32>
    %c77 = arith.constant 77 : index
    %122 = memref.load %arg2[%c77] : memref<144xf32, #tpu.memory_space<smem>>
    %123 = vector.broadcast %122 : f32 to vector<2x4x8xf32>
    %124 = arith.mulf %123, %113 : vector<2x4x8xf32>
    %125 = arith.addf %107, %124 : vector<2x4x8xf32>
    %c113 = arith.constant 113 : index
    %126 = memref.load %arg2[%c113] : memref<144xf32, #tpu.memory_space<smem>>
    %127 = vector.broadcast %126 : f32 to vector<2x4x8xf32>
    %128 = arith.mulf %127, %113 : vector<2x4x8xf32>
    %129 = arith.addf %111, %128 : vector<2x4x8xf32>
    %c0_94 = arith.constant 0 : index
    %c0_95 = arith.constant 0 : index
    %c1_96 = arith.constant 1 : index
    %c0_97 = arith.constant 0 : index
    %130 = vector.load %arg5[%c0_94, %c0_95, %c1_96, %c0_97] : memref<2x8x5x10xf32, #tpu.memory_space<vmem>>, vector<2x1x4x8xf32>
    %131 = vector.shape_cast %130 : vector<2x1x4x8xf32> to vector<2x4x8xf32>
    %c6_98 = arith.constant 6 : index
    %132 = memref.load %arg2[%c6_98] : memref<144xf32, #tpu.memory_space<smem>>
    %133 = vector.broadcast %132 : f32 to vector<2x4x8xf32>
    %134 = arith.mulf %133, %131 : vector<2x4x8xf32>
    %135 = arith.addf %117, %134 : vector<2x4x8xf32>
    %c42 = arith.constant 42 : index
    %136 = memref.load %arg2[%c42] : memref<144xf32, #tpu.memory_space<smem>>
    %137 = vector.broadcast %136 : f32 to vector<2x4x8xf32>
    %138 = arith.mulf %137, %131 : vector<2x4x8xf32>
    %139 = arith.addf %121, %138 : vector<2x4x8xf32>
    %c78 = arith.constant 78 : index
    %140 = memref.load %arg2[%c78] : memref<144xf32, #tpu.memory_space<smem>>
    %141 = vector.broadcast %140 : f32 to vector<2x4x8xf32>
    %142 = arith.mulf %141, %131 : vector<2x4x8xf32>
    %143 = arith.addf %125, %142 : vector<2x4x8xf32>
    %c114 = arith.constant 114 : index
    %144 = memref.load %arg2[%c114] : memref<144xf32, #tpu.memory_space<smem>>
    %145 = vector.broadcast %144 : f32 to vector<2x4x8xf32>
    %146 = arith.mulf %145, %131 : vector<2x4x8xf32>
    %147 = arith.addf %129, %146 : vector<2x4x8xf32>
    %c0_99 = arith.constant 0 : index
    %c0_100 = arith.constant 0 : index
    %c1_101 = arith.constant 1 : index
    %c1_102 = arith.constant 1 : index
    %148 = vector.load %arg5[%c0_99, %c0_100, %c1_101, %c1_102] : memref<2x8x5x10xf32, #tpu.memory_space<vmem>>, vector<2x1x4x8xf32>
    %149 = vector.shape_cast %148 : vector<2x1x4x8xf32> to vector<2x4x8xf32>
    %c7_103 = arith.constant 7 : index
    %150 = memref.load %arg2[%c7_103] : memref<144xf32, #tpu.memory_space<smem>>
    %151 = vector.broadcast %150 : f32 to vector<2x4x8xf32>
    %152 = arith.mulf %151, %149 : vector<2x4x8xf32>
    %153 = arith.addf %135, %152 : vector<2x4x8xf32>
    %c43 = arith.constant 43 : index
    %154 = memref.load %arg2[%c43] : memref<144xf32, #tpu.memory_space<smem>>
    %155 = vector.broadcast %154 : f32 to vector<2x4x8xf32>
    %156 = arith.mulf %155, %149 : vector<2x4x8xf32>
    %157 = arith.addf %139, %156 : vector<2x4x8xf32>
    %c79 = arith.constant 79 : index
    %158 = memref.load %arg2[%c79] : memref<144xf32, #tpu.memory_space<smem>>
    %159 = vector.broadcast %158 : f32 to vector<2x4x8xf32>
    %160 = arith.mulf %159, %149 : vector<2x4x8xf32>
    %161 = arith.addf %143, %160 : vector<2x4x8xf32>
    %c115 = arith.constant 115 : index
    %162 = memref.load %arg2[%c115] : memref<144xf32, #tpu.memory_space<smem>>
    %163 = vector.broadcast %162 : f32 to vector<2x4x8xf32>
    %164 = arith.mulf %163, %149 : vector<2x4x8xf32>
    %165 = arith.addf %147, %164 : vector<2x4x8xf32>
    %c0_104 = arith.constant 0 : index
    %c0_105 = arith.constant 0 : index
    %c1_106 = arith.constant 1 : index
    %c2_107 = arith.constant 2 : index
    %166 = vector.load %arg5[%c0_104, %c0_105, %c1_106, %c2_107] : memref<2x8x5x10xf32, #tpu.memory_space<vmem>>, vector<2x1x4x8xf32>
    %167 = vector.shape_cast %166 : vector<2x1x4x8xf32> to vector<2x4x8xf32>
    %c8 = arith.constant 8 : index
    %168 = memref.load %arg2[%c8] : memref<144xf32, #tpu.memory_space<smem>>
    %169 = vector.broadcast %168 : f32 to vector<2x4x8xf32>
    %170 = arith.mulf %169, %167 : vector<2x4x8xf32>
    %171 = arith.addf %153, %170 : vector<2x4x8xf32>
    %c44 = arith.constant 44 : index
    %172 = memref.load %arg2[%c44] : memref<144xf32, #tpu.memory_space<smem>>
    %173 = vector.broadcast %172 : f32 to vector<2x4x8xf32>
    %174 = arith.mulf %173, %167 : vector<2x4x8xf32>
    %175 = arith.addf %157, %174 : vector<2x4x8xf32>
    %c80 = arith.constant 80 : index
    %176 = memref.load %arg2[%c80] : memref<144xf32, #tpu.memory_space<smem>>
    %177 = vector.broadcast %176 : f32 to vector<2x4x8xf32>
    %178 = arith.mulf %177, %167 : vector<2x4x8xf32>
    %179 = arith.addf %161, %178 : vector<2x4x8xf32>
    %c116 = arith.constant 116 : index
    %180 = memref.load %arg2[%c116] : memref<144xf32, #tpu.memory_space<smem>>
    %181 = vector.broadcast %180 : f32 to vector<2x4x8xf32>
    %182 = arith.mulf %181, %167 : vector<2x4x8xf32>
    %183 = arith.addf %165, %182 : vector<2x4x8xf32>
    %c0_108 = arith.constant 0 : index
    %c1_109 = arith.constant 1 : index
    %c0_110 = arith.constant 0 : index
    %c0_111 = arith.constant 0 : index
    %184 = vector.load %arg5[%c0_108, %c1_109, %c0_110, %c0_111] : memref<2x8x5x10xf32, #tpu.memory_space<vmem>>, vector<2x1x4x8xf32>
    %185 = vector.shape_cast %184 : vector<2x1x4x8xf32> to vector<2x4x8xf32>
    %c9 = arith.constant 9 : index
    %186 = memref.load %arg2[%c9] : memref<144xf32, #tpu.memory_space<smem>>
    %187 = vector.broadcast %186 : f32 to vector<2x4x8xf32>
    %188 = arith.mulf %187, %185 : vector<2x4x8xf32>
    %189 = arith.addf %171, %188 : vector<2x4x8xf32>
    %c45 = arith.constant 45 : index
    %190 = memref.load %arg2[%c45] : memref<144xf32, #tpu.memory_space<smem>>
    %191 = vector.broadcast %190 : f32 to vector<2x4x8xf32>
    %192 = arith.mulf %191, %185 : vector<2x4x8xf32>
    %193 = arith.addf %175, %192 : vector<2x4x8xf32>
    %c81 = arith.constant 81 : index
    %194 = memref.load %arg2[%c81] : memref<144xf32, #tpu.memory_space<smem>>
    %195 = vector.broadcast %194 : f32 to vector<2x4x8xf32>
    %196 = arith.mulf %195, %185 : vector<2x4x8xf32>
    %197 = arith.addf %179, %196 : vector<2x4x8xf32>
    %c117 = arith.constant 117 : index
    %198 = memref.load %arg2[%c117] : memref<144xf32, #tpu.memory_space<smem>>
    %199 = vector.broadcast %198 : f32 to vector<2x4x8xf32>
    %200 = arith.mulf %199, %185 : vector<2x4x8xf32>
    %201 = arith.addf %183, %200 : vector<2x4x8xf32>
    %c0_112 = arith.constant 0 : index
    %c1_113 = arith.constant 1 : index
    %c0_114 = arith.constant 0 : index
    %c1_115 = arith.constant 1 : index
    %202 = vector.load %arg5[%c0_112, %c1_113, %c0_114, %c1_115] : memref<2x8x5x10xf32, #tpu.memory_space<vmem>>, vector<2x1x4x8xf32>
    %203 = vector.shape_cast %202 : vector<2x1x4x8xf32> to vector<2x4x8xf32>
    %c10 = arith.constant 10 : index
    %204 = memref.load %arg2[%c10] : memref<144xf32, #tpu.memory_space<smem>>
    %205 = vector.broadcast %204 : f32 to vector<2x4x8xf32>
    %206 = arith.mulf %205, %203 : vector<2x4x8xf32>
    %207 = arith.addf %189, %206 : vector<2x4x8xf32>
    %c46 = arith.constant 46 : index
    %208 = memref.load %arg2[%c46] : memref<144xf32, #tpu.memory_space<smem>>
    %209 = vector.broadcast %208 : f32 to vector<2x4x8xf32>
    %210 = arith.mulf %209, %203 : vector<2x4x8xf32>
    %211 = arith.addf %193, %210 : vector<2x4x8xf32>
    %c82 = arith.constant 82 : index
    %212 = memref.load %arg2[%c82] : memref<144xf32, #tpu.memory_space<smem>>
    %213 = vector.broadcast %212 : f32 to vector<2x4x8xf32>
    %214 = arith.mulf %213, %203 : vector<2x4x8xf32>
    %215 = arith.addf %197, %214 : vector<2x4x8xf32>
    %c118 = arith.constant 118 : index
    %216 = memref.load %arg2[%c118] : memref<144xf32, #tpu.memory_space<smem>>
    %217 = vector.broadcast %216 : f32 to vector<2x4x8xf32>
    %218 = arith.mulf %217, %203 : vector<2x4x8xf32>
    %219 = arith.addf %201, %218 : vector<2x4x8xf32>
    %c0_116 = arith.constant 0 : index
    %c1_117 = arith.constant 1 : index
    %c0_118 = arith.constant 0 : index
    %c2_119 = arith.constant 2 : index
    %220 = vector.load %arg5[%c0_116, %c1_117, %c0_118, %c2_119] : memref<2x8x5x10xf32, #tpu.memory_space<vmem>>, vector<2x1x4x8xf32>
    %221 = vector.shape_cast %220 : vector<2x1x4x8xf32> to vector<2x4x8xf32>
    %c11 = arith.constant 11 : index
    %222 = memref.load %arg2[%c11] : memref<144xf32, #tpu.memory_space<smem>>
    %223 = vector.broadcast %222 : f32 to vector<2x4x8xf32>
    %224 = arith.mulf %223, %221 : vector<2x4x8xf32>
    %225 = arith.addf %207, %224 : vector<2x4x8xf32>
    %c47 = arith.constant 47 : index
    %226 = memref.load %arg2[%c47] : memref<144xf32, #tpu.memory_space<smem>>
    %227 = vector.broadcast %226 : f32 to vector<2x4x8xf32>
    %228 = arith.mulf %227, %221 : vector<2x4x8xf32>
    %229 = arith.addf %211, %228 : vector<2x4x8xf32>
    %c83 = arith.constant 83 : index
    %230 = memref.load %arg2[%c83] : memref<144xf32, #tpu.memory_space<smem>>
    %231 = vector.broadcast %230 : f32 to vector<2x4x8xf32>
    %232 = arith.mulf %231, %221 : vector<2x4x8xf32>
    %233 = arith.addf %215, %232 : vector<2x4x8xf32>
    %c119 = arith.constant 119 : index
    %234 = memref.load %arg2[%c119] : memref<144xf32, #tpu.memory_space<smem>>
    %235 = vector.broadcast %234 : f32 to vector<2x4x8xf32>
    %236 = arith.mulf %235, %221 : vector<2x4x8xf32>
    %237 = arith.addf %219, %236 : vector<2x4x8xf32>
    %c0_120 = arith.constant 0 : index
    %c5_121 = arith.constant 5 : index
    %c0_122 = arith.constant 0 : index
    %c0_123 = arith.constant 0 : index
    %238 = vector.load %arg5[%c0_120, %c5_121, %c0_122, %c0_123] : memref<2x8x5x10xf32, #tpu.memory_space<vmem>>, vector<2x1x4x8xf32>
    %239 = vector.shape_cast %238 : vector<2x1x4x8xf32> to vector<2x4x8xf32>
    %c12 = arith.constant 12 : index
    %240 = memref.load %arg2[%c12] : memref<144xf32, #tpu.memory_space<smem>>
    %241 = vector.broadcast %240 : f32 to vector<2x4x8xf32>
    %242 = arith.mulf %241, %239 : vector<2x4x8xf32>
    %243 = arith.addf %225, %242 : vector<2x4x8xf32>
    %c48 = arith.constant 48 : index
    %244 = memref.load %arg2[%c48] : memref<144xf32, #tpu.memory_space<smem>>
    %245 = vector.broadcast %244 : f32 to vector<2x4x8xf32>
    %246 = arith.mulf %245, %239 : vector<2x4x8xf32>
    %247 = arith.addf %229, %246 : vector<2x4x8xf32>
    %c84 = arith.constant 84 : index
    %248 = memref.load %arg2[%c84] : memref<144xf32, #tpu.memory_space<smem>>
    %249 = vector.broadcast %248 : f32 to vector<2x4x8xf32>
    %250 = arith.mulf %249, %239 : vector<2x4x8xf32>
    %251 = arith.addf %233, %250 : vector<2x4x8xf32>
    %c120 = arith.constant 120 : index
    %252 = memref.load %arg2[%c120] : memref<144xf32, #tpu.memory_space<smem>>
    %253 = vector.broadcast %252 : f32 to vector<2x4x8xf32>
    %254 = arith.mulf %253, %239 : vector<2x4x8xf32>
    %255 = arith.addf %237, %254 : vector<2x4x8xf32>
    %c0_124 = arith.constant 0 : index
    %c5_125 = arith.constant 5 : index
    %c0_126 = arith.constant 0 : index
    %c1_127 = arith.constant 1 : index
    %256 = vector.load %arg5[%c0_124, %c5_125, %c0_126, %c1_127] : memref<2x8x5x10xf32, #tpu.memory_space<vmem>>, vector<2x1x4x8xf32>
    %257 = vector.shape_cast %256 : vector<2x1x4x8xf32> to vector<2x4x8xf32>
    %c13 = arith.constant 13 : index
    %258 = memref.load %arg2[%c13] : memref<144xf32, #tpu.memory_space<smem>>
    %259 = vector.broadcast %258 : f32 to vector<2x4x8xf32>
    %260 = arith.mulf %259, %257 : vector<2x4x8xf32>
    %261 = arith.addf %243, %260 : vector<2x4x8xf32>
    %c49 = arith.constant 49 : index
    %262 = memref.load %arg2[%c49] : memref<144xf32, #tpu.memory_space<smem>>
    %263 = vector.broadcast %262 : f32 to vector<2x4x8xf32>
    %264 = arith.mulf %263, %257 : vector<2x4x8xf32>
    %265 = arith.addf %247, %264 : vector<2x4x8xf32>
    %c85 = arith.constant 85 : index
    %266 = memref.load %arg2[%c85] : memref<144xf32, #tpu.memory_space<smem>>
    %267 = vector.broadcast %266 : f32 to vector<2x4x8xf32>
    %268 = arith.mulf %267, %257 : vector<2x4x8xf32>
    %269 = arith.addf %251, %268 : vector<2x4x8xf32>
    %c121 = arith.constant 121 : index
    %270 = memref.load %arg2[%c121] : memref<144xf32, #tpu.memory_space<smem>>
    %271 = vector.broadcast %270 : f32 to vector<2x4x8xf32>
    %272 = arith.mulf %271, %257 : vector<2x4x8xf32>
    %273 = arith.addf %255, %272 : vector<2x4x8xf32>
    %c0_128 = arith.constant 0 : index
    %c5_129 = arith.constant 5 : index
    %c0_130 = arith.constant 0 : index
    %c2_131 = arith.constant 2 : index
    %274 = vector.load %arg5[%c0_128, %c5_129, %c0_130, %c2_131] : memref<2x8x5x10xf32, #tpu.memory_space<vmem>>, vector<2x1x4x8xf32>
    %275 = vector.shape_cast %274 : vector<2x1x4x8xf32> to vector<2x4x8xf32>
    %c14 = arith.constant 14 : index
    %276 = memref.load %arg2[%c14] : memref<144xf32, #tpu.memory_space<smem>>
    %277 = vector.broadcast %276 : f32 to vector<2x4x8xf32>
    %278 = arith.mulf %277, %275 : vector<2x4x8xf32>
    %279 = arith.addf %261, %278 : vector<2x4x8xf32>
    %c50 = arith.constant 50 : index
    %280 = memref.load %arg2[%c50] : memref<144xf32, #tpu.memory_space<smem>>
    %281 = vector.broadcast %280 : f32 to vector<2x4x8xf32>
    %282 = arith.mulf %281, %275 : vector<2x4x8xf32>
    %283 = arith.addf %265, %282 : vector<2x4x8xf32>
    %c86 = arith.constant 86 : index
    %284 = memref.load %arg2[%c86] : memref<144xf32, #tpu.memory_space<smem>>
    %285 = vector.broadcast %284 : f32 to vector<2x4x8xf32>
    %286 = arith.mulf %285, %275 : vector<2x4x8xf32>
    %287 = arith.addf %269, %286 : vector<2x4x8xf32>
    %c122 = arith.constant 122 : index
    %288 = memref.load %arg2[%c122] : memref<144xf32, #tpu.memory_space<smem>>
    %289 = vector.broadcast %288 : f32 to vector<2x4x8xf32>
    %290 = arith.mulf %289, %275 : vector<2x4x8xf32>
    %291 = arith.addf %273, %290 : vector<2x4x8xf32>
    %c0_132 = arith.constant 0 : index
    %c1_133 = arith.constant 1 : index
    %c1_134 = arith.constant 1 : index
    %c0_135 = arith.constant 0 : index
    %292 = vector.load %arg5[%c0_132, %c1_133, %c1_134, %c0_135] : memref<2x8x5x10xf32, #tpu.memory_space<vmem>>, vector<2x1x4x8xf32>
    %293 = vector.shape_cast %292 : vector<2x1x4x8xf32> to vector<2x4x8xf32>
    %c15 = arith.constant 15 : index
    %294 = memref.load %arg2[%c15] : memref<144xf32, #tpu.memory_space<smem>>
    %295 = vector.broadcast %294 : f32 to vector<2x4x8xf32>
    %296 = arith.mulf %295, %293 : vector<2x4x8xf32>
    %297 = arith.addf %279, %296 : vector<2x4x8xf32>
    %c51 = arith.constant 51 : index
    %298 = memref.load %arg2[%c51] : memref<144xf32, #tpu.memory_space<smem>>
    %299 = vector.broadcast %298 : f32 to vector<2x4x8xf32>
    %300 = arith.mulf %299, %293 : vector<2x4x8xf32>
    %301 = arith.addf %283, %300 : vector<2x4x8xf32>
    %c87 = arith.constant 87 : index
    %302 = memref.load %arg2[%c87] : memref<144xf32, #tpu.memory_space<smem>>
    %303 = vector.broadcast %302 : f32 to vector<2x4x8xf32>
    %304 = arith.mulf %303, %293 : vector<2x4x8xf32>
    %305 = arith.addf %287, %304 : vector<2x4x8xf32>
    %c123 = arith.constant 123 : index
    %306 = memref.load %arg2[%c123] : memref<144xf32, #tpu.memory_space<smem>>
    %307 = vector.broadcast %306 : f32 to vector<2x4x8xf32>
    %308 = arith.mulf %307, %293 : vector<2x4x8xf32>
    %309 = arith.addf %291, %308 : vector<2x4x8xf32>
    %c0_136 = arith.constant 0 : index
    %c1_137 = arith.constant 1 : index
    %c1_138 = arith.constant 1 : index
    %c1_139 = arith.constant 1 : index
    %310 = vector.load %arg5[%c0_136, %c1_137, %c1_138, %c1_139] : memref<2x8x5x10xf32, #tpu.memory_space<vmem>>, vector<2x1x4x8xf32>
    %311 = vector.shape_cast %310 : vector<2x1x4x8xf32> to vector<2x4x8xf32>
    %c16 = arith.constant 16 : index
    %312 = memref.load %arg2[%c16] : memref<144xf32, #tpu.memory_space<smem>>
    %313 = vector.broadcast %312 : f32 to vector<2x4x8xf32>
    %314 = arith.mulf %313, %311 : vector<2x4x8xf32>
    %315 = arith.addf %297, %314 : vector<2x4x8xf32>
    %c52 = arith.constant 52 : index
    %316 = memref.load %arg2[%c52] : memref<144xf32, #tpu.memory_space<smem>>
    %317 = vector.broadcast %316 : f32 to vector<2x4x8xf32>
    %318 = arith.mulf %317, %311 : vector<2x4x8xf32>
    %319 = arith.addf %301, %318 : vector<2x4x8xf32>
    %c88 = arith.constant 88 : index
    %320 = memref.load %arg2[%c88] : memref<144xf32, #tpu.memory_space<smem>>
    %321 = vector.broadcast %320 : f32 to vector<2x4x8xf32>
    %322 = arith.mulf %321, %311 : vector<2x4x8xf32>
    %323 = arith.addf %305, %322 : vector<2x4x8xf32>
    %c124 = arith.constant 124 : index
    %324 = memref.load %arg2[%c124] : memref<144xf32, #tpu.memory_space<smem>>
    %325 = vector.broadcast %324 : f32 to vector<2x4x8xf32>
    %326 = arith.mulf %325, %311 : vector<2x4x8xf32>
    %327 = arith.addf %309, %326 : vector<2x4x8xf32>
    %c0_140 = arith.constant 0 : index
    %c1_141 = arith.constant 1 : index
    %c1_142 = arith.constant 1 : index
    %c2_143 = arith.constant 2 : index
    %328 = vector.load %arg5[%c0_140, %c1_141, %c1_142, %c2_143] : memref<2x8x5x10xf32, #tpu.memory_space<vmem>>, vector<2x1x4x8xf32>
    %329 = vector.shape_cast %328 : vector<2x1x4x8xf32> to vector<2x4x8xf32>
    %c17 = arith.constant 17 : index
    %330 = memref.load %arg2[%c17] : memref<144xf32, #tpu.memory_space<smem>>
    %331 = vector.broadcast %330 : f32 to vector<2x4x8xf32>
    %332 = arith.mulf %331, %329 : vector<2x4x8xf32>
    %333 = arith.addf %315, %332 : vector<2x4x8xf32>
    %c53 = arith.constant 53 : index
    %334 = memref.load %arg2[%c53] : memref<144xf32, #tpu.memory_space<smem>>
    %335 = vector.broadcast %334 : f32 to vector<2x4x8xf32>
    %336 = arith.mulf %335, %329 : vector<2x4x8xf32>
    %337 = arith.addf %319, %336 : vector<2x4x8xf32>
    %c89 = arith.constant 89 : index
    %338 = memref.load %arg2[%c89] : memref<144xf32, #tpu.memory_space<smem>>
    %339 = vector.broadcast %338 : f32 to vector<2x4x8xf32>
    %340 = arith.mulf %339, %329 : vector<2x4x8xf32>
    %341 = arith.addf %323, %340 : vector<2x4x8xf32>
    %c125 = arith.constant 125 : index
    %342 = memref.load %arg2[%c125] : memref<144xf32, #tpu.memory_space<smem>>
    %343 = vector.broadcast %342 : f32 to vector<2x4x8xf32>
    %344 = arith.mulf %343, %329 : vector<2x4x8xf32>
    %345 = arith.addf %327, %344 : vector<2x4x8xf32>
    %c0_144 = arith.constant 0 : index
    %c2_145 = arith.constant 2 : index
    %c0_146 = arith.constant 0 : index
    %c0_147 = arith.constant 0 : index
    %346 = vector.load %arg5[%c0_144, %c2_145, %c0_146, %c0_147] : memref<2x8x5x10xf32, #tpu.memory_space<vmem>>, vector<2x1x4x8xf32>
    %347 = vector.shape_cast %346 : vector<2x1x4x8xf32> to vector<2x4x8xf32>
    %c18 = arith.constant 18 : index
    %348 = memref.load %arg2[%c18] : memref<144xf32, #tpu.memory_space<smem>>
    %349 = vector.broadcast %348 : f32 to vector<2x4x8xf32>
    %350 = arith.mulf %349, %347 : vector<2x4x8xf32>
    %351 = arith.addf %333, %350 : vector<2x4x8xf32>
    %c54 = arith.constant 54 : index
    %352 = memref.load %arg2[%c54] : memref<144xf32, #tpu.memory_space<smem>>
    %353 = vector.broadcast %352 : f32 to vector<2x4x8xf32>
    %354 = arith.mulf %353, %347 : vector<2x4x8xf32>
    %355 = arith.addf %337, %354 : vector<2x4x8xf32>
    %c90 = arith.constant 90 : index
    %356 = memref.load %arg2[%c90] : memref<144xf32, #tpu.memory_space<smem>>
    %357 = vector.broadcast %356 : f32 to vector<2x4x8xf32>
    %358 = arith.mulf %357, %347 : vector<2x4x8xf32>
    %359 = arith.addf %341, %358 : vector<2x4x8xf32>
    %c126 = arith.constant 126 : index
    %360 = memref.load %arg2[%c126] : memref<144xf32, #tpu.memory_space<smem>>
    %361 = vector.broadcast %360 : f32 to vector<2x4x8xf32>
    %362 = arith.mulf %361, %347 : vector<2x4x8xf32>
    %363 = arith.addf %345, %362 : vector<2x4x8xf32>
    %c0_148 = arith.constant 0 : index
    %c2_149 = arith.constant 2 : index
    %c0_150 = arith.constant 0 : index
    %c1_151 = arith.constant 1 : index
    %364 = vector.load %arg5[%c0_148, %c2_149, %c0_150, %c1_151] : memref<2x8x5x10xf32, #tpu.memory_space<vmem>>, vector<2x1x4x8xf32>
    %365 = vector.shape_cast %364 : vector<2x1x4x8xf32> to vector<2x4x8xf32>
    %c19 = arith.constant 19 : index
    %366 = memref.load %arg2[%c19] : memref<144xf32, #tpu.memory_space<smem>>
    %367 = vector.broadcast %366 : f32 to vector<2x4x8xf32>
    %368 = arith.mulf %367, %365 : vector<2x4x8xf32>
    %369 = arith.addf %351, %368 : vector<2x4x8xf32>
    %c55 = arith.constant 55 : index
    %370 = memref.load %arg2[%c55] : memref<144xf32, #tpu.memory_space<smem>>
    %371 = vector.broadcast %370 : f32 to vector<2x4x8xf32>
    %372 = arith.mulf %371, %365 : vector<2x4x8xf32>
    %373 = arith.addf %355, %372 : vector<2x4x8xf32>
    %c91 = arith.constant 91 : index
    %374 = memref.load %arg2[%c91] : memref<144xf32, #tpu.memory_space<smem>>
    %375 = vector.broadcast %374 : f32 to vector<2x4x8xf32>
    %376 = arith.mulf %375, %365 : vector<2x4x8xf32>
    %377 = arith.addf %359, %376 : vector<2x4x8xf32>
    %c127 = arith.constant 127 : index
    %378 = memref.load %arg2[%c127] : memref<144xf32, #tpu.memory_space<smem>>
    %379 = vector.broadcast %378 : f32 to vector<2x4x8xf32>
    %380 = arith.mulf %379, %365 : vector<2x4x8xf32>
    %381 = arith.addf %363, %380 : vector<2x4x8xf32>
    %c0_152 = arith.constant 0 : index
    %c2_153 = arith.constant 2 : index
    %c0_154 = arith.constant 0 : index
    %c2_155 = arith.constant 2 : index
    %382 = vector.load %arg5[%c0_152, %c2_153, %c0_154, %c2_155] : memref<2x8x5x10xf32, #tpu.memory_space<vmem>>, vector<2x1x4x8xf32>
    %383 = vector.shape_cast %382 : vector<2x1x4x8xf32> to vector<2x4x8xf32>
    %c20 = arith.constant 20 : index
    %384 = memref.load %arg2[%c20] : memref<144xf32, #tpu.memory_space<smem>>
    %385 = vector.broadcast %384 : f32 to vector<2x4x8xf32>
    %386 = arith.mulf %385, %383 : vector<2x4x8xf32>
    %387 = arith.addf %369, %386 : vector<2x4x8xf32>
    %c56 = arith.constant 56 : index
    %388 = memref.load %arg2[%c56] : memref<144xf32, #tpu.memory_space<smem>>
    %389 = vector.broadcast %388 : f32 to vector<2x4x8xf32>
    %390 = arith.mulf %389, %383 : vector<2x4x8xf32>
    %391 = arith.addf %373, %390 : vector<2x4x8xf32>
    %c92 = arith.constant 92 : index
    %392 = memref.load %arg2[%c92] : memref<144xf32, #tpu.memory_space<smem>>
    %393 = vector.broadcast %392 : f32 to vector<2x4x8xf32>
    %394 = arith.mulf %393, %383 : vector<2x4x8xf32>
    %395 = arith.addf %377, %394 : vector<2x4x8xf32>
    %c128 = arith.constant 128 : index
    %396 = memref.load %arg2[%c128] : memref<144xf32, #tpu.memory_space<smem>>
    %397 = vector.broadcast %396 : f32 to vector<2x4x8xf32>
    %398 = arith.mulf %397, %383 : vector<2x4x8xf32>
    %399 = arith.addf %381, %398 : vector<2x4x8xf32>
    %c0_156 = arith.constant 0 : index
    %c6_157 = arith.constant 6 : index
    %c0_158 = arith.constant 0 : index
    %c0_159 = arith.constant 0 : index
    %400 = vector.load %arg5[%c0_156, %c6_157, %c0_158, %c0_159] : memref<2x8x5x10xf32, #tpu.memory_space<vmem>>, vector<2x1x4x8xf32>
    %401 = vector.shape_cast %400 : vector<2x1x4x8xf32> to vector<2x4x8xf32>
    %c21 = arith.constant 21 : index
    %402 = memref.load %arg2[%c21] : memref<144xf32, #tpu.memory_space<smem>>
    %403 = vector.broadcast %402 : f32 to vector<2x4x8xf32>
    %404 = arith.mulf %403, %401 : vector<2x4x8xf32>
    %405 = arith.addf %387, %404 : vector<2x4x8xf32>
    %c57 = arith.constant 57 : index
    %406 = memref.load %arg2[%c57] : memref<144xf32, #tpu.memory_space<smem>>
    %407 = vector.broadcast %406 : f32 to vector<2x4x8xf32>
    %408 = arith.mulf %407, %401 : vector<2x4x8xf32>
    %409 = arith.addf %391, %408 : vector<2x4x8xf32>
    %c93 = arith.constant 93 : index
    %410 = memref.load %arg2[%c93] : memref<144xf32, #tpu.memory_space<smem>>
    %411 = vector.broadcast %410 : f32 to vector<2x4x8xf32>
    %412 = arith.mulf %411, %401 : vector<2x4x8xf32>
    %413 = arith.addf %395, %412 : vector<2x4x8xf32>
    %c129 = arith.constant 129 : index
    %414 = memref.load %arg2[%c129] : memref<144xf32, #tpu.memory_space<smem>>
    %415 = vector.broadcast %414 : f32 to vector<2x4x8xf32>
    %416 = arith.mulf %415, %401 : vector<2x4x8xf32>
    %417 = arith.addf %399, %416 : vector<2x4x8xf32>
    %c0_160 = arith.constant 0 : index
    %c6_161 = arith.constant 6 : index
    %c0_162 = arith.constant 0 : index
    %c1_163 = arith.constant 1 : index
    %418 = vector.load %arg5[%c0_160, %c6_161, %c0_162, %c1_163] : memref<2x8x5x10xf32, #tpu.memory_space<vmem>>, vector<2x1x4x8xf32>
    %419 = vector.shape_cast %418 : vector<2x1x4x8xf32> to vector<2x4x8xf32>
    %c22 = arith.constant 22 : index
    %420 = memref.load %arg2[%c22] : memref<144xf32, #tpu.memory_space<smem>>
    %421 = vector.broadcast %420 : f32 to vector<2x4x8xf32>
    %422 = arith.mulf %421, %419 : vector<2x4x8xf32>
    %423 = arith.addf %405, %422 : vector<2x4x8xf32>
    %c58 = arith.constant 58 : index
    %424 = memref.load %arg2[%c58] : memref<144xf32, #tpu.memory_space<smem>>
    %425 = vector.broadcast %424 : f32 to vector<2x4x8xf32>
    %426 = arith.mulf %425, %419 : vector<2x4x8xf32>
    %427 = arith.addf %409, %426 : vector<2x4x8xf32>
    %c94 = arith.constant 94 : index
    %428 = memref.load %arg2[%c94] : memref<144xf32, #tpu.memory_space<smem>>
    %429 = vector.broadcast %428 : f32 to vector<2x4x8xf32>
    %430 = arith.mulf %429, %419 : vector<2x4x8xf32>
    %431 = arith.addf %413, %430 : vector<2x4x8xf32>
    %c130 = arith.constant 130 : index
    %432 = memref.load %arg2[%c130] : memref<144xf32, #tpu.memory_space<smem>>
    %433 = vector.broadcast %432 : f32 to vector<2x4x8xf32>
    %434 = arith.mulf %433, %419 : vector<2x4x8xf32>
    %435 = arith.addf %417, %434 : vector<2x4x8xf32>
    %c0_164 = arith.constant 0 : index
    %c6_165 = arith.constant 6 : index
    %c0_166 = arith.constant 0 : index
    %c2_167 = arith.constant 2 : index
    %436 = vector.load %arg5[%c0_164, %c6_165, %c0_166, %c2_167] : memref<2x8x5x10xf32, #tpu.memory_space<vmem>>, vector<2x1x4x8xf32>
    %437 = vector.shape_cast %436 : vector<2x1x4x8xf32> to vector<2x4x8xf32>
    %c23 = arith.constant 23 : index
    %438 = memref.load %arg2[%c23] : memref<144xf32, #tpu.memory_space<smem>>
    %439 = vector.broadcast %438 : f32 to vector<2x4x8xf32>
    %440 = arith.mulf %439, %437 : vector<2x4x8xf32>
    %441 = arith.addf %423, %440 : vector<2x4x8xf32>
    %c59 = arith.constant 59 : index
    %442 = memref.load %arg2[%c59] : memref<144xf32, #tpu.memory_space<smem>>
    %443 = vector.broadcast %442 : f32 to vector<2x4x8xf32>
    %444 = arith.mulf %443, %437 : vector<2x4x8xf32>
    %445 = arith.addf %427, %444 : vector<2x4x8xf32>
    %c95 = arith.constant 95 : index
    %446 = memref.load %arg2[%c95] : memref<144xf32, #tpu.memory_space<smem>>
    %447 = vector.broadcast %446 : f32 to vector<2x4x8xf32>
    %448 = arith.mulf %447, %437 : vector<2x4x8xf32>
    %449 = arith.addf %431, %448 : vector<2x4x8xf32>
    %c131 = arith.constant 131 : index
    %450 = memref.load %arg2[%c131] : memref<144xf32, #tpu.memory_space<smem>>
    %451 = vector.broadcast %450 : f32 to vector<2x4x8xf32>
    %452 = arith.mulf %451, %437 : vector<2x4x8xf32>
    %453 = arith.addf %435, %452 : vector<2x4x8xf32>
    %c0_168 = arith.constant 0 : index
    %c2_169 = arith.constant 2 : index
    %c1_170 = arith.constant 1 : index
    %c0_171 = arith.constant 0 : index
    %454 = vector.load %arg5[%c0_168, %c2_169, %c1_170, %c0_171] : memref<2x8x5x10xf32, #tpu.memory_space<vmem>>, vector<2x1x4x8xf32>
    %455 = vector.shape_cast %454 : vector<2x1x4x8xf32> to vector<2x4x8xf32>
    %c24 = arith.constant 24 : index
    %456 = memref.load %arg2[%c24] : memref<144xf32, #tpu.memory_space<smem>>
    %457 = vector.broadcast %456 : f32 to vector<2x4x8xf32>
    %458 = arith.mulf %457, %455 : vector<2x4x8xf32>
    %459 = arith.addf %441, %458 : vector<2x4x8xf32>
    %c60 = arith.constant 60 : index
    %460 = memref.load %arg2[%c60] : memref<144xf32, #tpu.memory_space<smem>>
    %461 = vector.broadcast %460 : f32 to vector<2x4x8xf32>
    %462 = arith.mulf %461, %455 : vector<2x4x8xf32>
    %463 = arith.addf %445, %462 : vector<2x4x8xf32>
    %c96 = arith.constant 96 : index
    %464 = memref.load %arg2[%c96] : memref<144xf32, #tpu.memory_space<smem>>
    %465 = vector.broadcast %464 : f32 to vector<2x4x8xf32>
    %466 = arith.mulf %465, %455 : vector<2x4x8xf32>
    %467 = arith.addf %449, %466 : vector<2x4x8xf32>
    %c132 = arith.constant 132 : index
    %468 = memref.load %arg2[%c132] : memref<144xf32, #tpu.memory_space<smem>>
    %469 = vector.broadcast %468 : f32 to vector<2x4x8xf32>
    %470 = arith.mulf %469, %455 : vector<2x4x8xf32>
    %471 = arith.addf %453, %470 : vector<2x4x8xf32>
    %c0_172 = arith.constant 0 : index
    %c2_173 = arith.constant 2 : index
    %c1_174 = arith.constant 1 : index
    %c1_175 = arith.constant 1 : index
    %472 = vector.load %arg5[%c0_172, %c2_173, %c1_174, %c1_175] : memref<2x8x5x10xf32, #tpu.memory_space<vmem>>, vector<2x1x4x8xf32>
    %473 = vector.shape_cast %472 : vector<2x1x4x8xf32> to vector<2x4x8xf32>
    %c25 = arith.constant 25 : index
    %474 = memref.load %arg2[%c25] : memref<144xf32, #tpu.memory_space<smem>>
    %475 = vector.broadcast %474 : f32 to vector<2x4x8xf32>
    %476 = arith.mulf %475, %473 : vector<2x4x8xf32>
    %477 = arith.addf %459, %476 : vector<2x4x8xf32>
    %c61 = arith.constant 61 : index
    %478 = memref.load %arg2[%c61] : memref<144xf32, #tpu.memory_space<smem>>
    %479 = vector.broadcast %478 : f32 to vector<2x4x8xf32>
    %480 = arith.mulf %479, %473 : vector<2x4x8xf32>
    %481 = arith.addf %463, %480 : vector<2x4x8xf32>
    %c97 = arith.constant 97 : index
    %482 = memref.load %arg2[%c97] : memref<144xf32, #tpu.memory_space<smem>>
    %483 = vector.broadcast %482 : f32 to vector<2x4x8xf32>
    %484 = arith.mulf %483, %473 : vector<2x4x8xf32>
    %485 = arith.addf %467, %484 : vector<2x4x8xf32>
    %c133 = arith.constant 133 : index
    %486 = memref.load %arg2[%c133] : memref<144xf32, #tpu.memory_space<smem>>
    %487 = vector.broadcast %486 : f32 to vector<2x4x8xf32>
    %488 = arith.mulf %487, %473 : vector<2x4x8xf32>
    %489 = arith.addf %471, %488 : vector<2x4x8xf32>
    %c0_176 = arith.constant 0 : index
    %c2_177 = arith.constant 2 : index
    %c1_178 = arith.constant 1 : index
    %c2_179 = arith.constant 2 : index
    %490 = vector.load %arg5[%c0_176, %c2_177, %c1_178, %c2_179] : memref<2x8x5x10xf32, #tpu.memory_space<vmem>>, vector<2x1x4x8xf32>
    %491 = vector.shape_cast %490 : vector<2x1x4x8xf32> to vector<2x4x8xf32>
    %c26 = arith.constant 26 : index
    %492 = memref.load %arg2[%c26] : memref<144xf32, #tpu.memory_space<smem>>
    %493 = vector.broadcast %492 : f32 to vector<2x4x8xf32>
    %494 = arith.mulf %493, %491 : vector<2x4x8xf32>
    %495 = arith.addf %477, %494 : vector<2x4x8xf32>
    %c62 = arith.constant 62 : index
    %496 = memref.load %arg2[%c62] : memref<144xf32, #tpu.memory_space<smem>>
    %497 = vector.broadcast %496 : f32 to vector<2x4x8xf32>
    %498 = arith.mulf %497, %491 : vector<2x4x8xf32>
    %499 = arith.addf %481, %498 : vector<2x4x8xf32>
    %c98 = arith.constant 98 : index
    %500 = memref.load %arg2[%c98] : memref<144xf32, #tpu.memory_space<smem>>
    %501 = vector.broadcast %500 : f32 to vector<2x4x8xf32>
    %502 = arith.mulf %501, %491 : vector<2x4x8xf32>
    %503 = arith.addf %485, %502 : vector<2x4x8xf32>
    %c134 = arith.constant 134 : index
    %504 = memref.load %arg2[%c134] : memref<144xf32, #tpu.memory_space<smem>>
    %505 = vector.broadcast %504 : f32 to vector<2x4x8xf32>
    %506 = arith.mulf %505, %491 : vector<2x4x8xf32>
    %507 = arith.addf %489, %506 : vector<2x4x8xf32>
    %c0_180 = arith.constant 0 : index
    %c3_181 = arith.constant 3 : index
    %c0_182 = arith.constant 0 : index
    %c0_183 = arith.constant 0 : index
    %508 = vector.load %arg5[%c0_180, %c3_181, %c0_182, %c0_183] : memref<2x8x5x10xf32, #tpu.memory_space<vmem>>, vector<2x1x4x8xf32>
    %509 = vector.shape_cast %508 : vector<2x1x4x8xf32> to vector<2x4x8xf32>
    %c27 = arith.constant 27 : index
    %510 = memref.load %arg2[%c27] : memref<144xf32, #tpu.memory_space<smem>>
    %511 = vector.broadcast %510 : f32 to vector<2x4x8xf32>
    %512 = arith.mulf %511, %509 : vector<2x4x8xf32>
    %513 = arith.addf %495, %512 : vector<2x4x8xf32>
    %c63 = arith.constant 63 : index
    %514 = memref.load %arg2[%c63] : memref<144xf32, #tpu.memory_space<smem>>
    %515 = vector.broadcast %514 : f32 to vector<2x4x8xf32>
    %516 = arith.mulf %515, %509 : vector<2x4x8xf32>
    %517 = arith.addf %499, %516 : vector<2x4x8xf32>
    %c99 = arith.constant 99 : index
    %518 = memref.load %arg2[%c99] : memref<144xf32, #tpu.memory_space<smem>>
    %519 = vector.broadcast %518 : f32 to vector<2x4x8xf32>
    %520 = arith.mulf %519, %509 : vector<2x4x8xf32>
    %521 = arith.addf %503, %520 : vector<2x4x8xf32>
    %c135 = arith.constant 135 : index
    %522 = memref.load %arg2[%c135] : memref<144xf32, #tpu.memory_space<smem>>
    %523 = vector.broadcast %522 : f32 to vector<2x4x8xf32>
    %524 = arith.mulf %523, %509 : vector<2x4x8xf32>
    %525 = arith.addf %507, %524 : vector<2x4x8xf32>
    %c0_184 = arith.constant 0 : index
    %c3_185 = arith.constant 3 : index
    %c0_186 = arith.constant 0 : index
    %c1_187 = arith.constant 1 : index
    %526 = vector.load %arg5[%c0_184, %c3_185, %c0_186, %c1_187] : memref<2x8x5x10xf32, #tpu.memory_space<vmem>>, vector<2x1x4x8xf32>
    %527 = vector.shape_cast %526 : vector<2x1x4x8xf32> to vector<2x4x8xf32>
    %c28 = arith.constant 28 : index
    %528 = memref.load %arg2[%c28] : memref<144xf32, #tpu.memory_space<smem>>
    %529 = vector.broadcast %528 : f32 to vector<2x4x8xf32>
    %530 = arith.mulf %529, %527 : vector<2x4x8xf32>
    %531 = arith.addf %513, %530 : vector<2x4x8xf32>
    %c64 = arith.constant 64 : index
    %532 = memref.load %arg2[%c64] : memref<144xf32, #tpu.memory_space<smem>>
    %533 = vector.broadcast %532 : f32 to vector<2x4x8xf32>
    %534 = arith.mulf %533, %527 : vector<2x4x8xf32>
    %535 = arith.addf %517, %534 : vector<2x4x8xf32>
    %c100 = arith.constant 100 : index
    %536 = memref.load %arg2[%c100] : memref<144xf32, #tpu.memory_space<smem>>
    %537 = vector.broadcast %536 : f32 to vector<2x4x8xf32>
    %538 = arith.mulf %537, %527 : vector<2x4x8xf32>
    %539 = arith.addf %521, %538 : vector<2x4x8xf32>
    %c136 = arith.constant 136 : index
    %540 = memref.load %arg2[%c136] : memref<144xf32, #tpu.memory_space<smem>>
    %541 = vector.broadcast %540 : f32 to vector<2x4x8xf32>
    %542 = arith.mulf %541, %527 : vector<2x4x8xf32>
    %543 = arith.addf %525, %542 : vector<2x4x8xf32>
    %c0_188 = arith.constant 0 : index
    %c3_189 = arith.constant 3 : index
    %c0_190 = arith.constant 0 : index
    %c2_191 = arith.constant 2 : index
    %544 = vector.load %arg5[%c0_188, %c3_189, %c0_190, %c2_191] : memref<2x8x5x10xf32, #tpu.memory_space<vmem>>, vector<2x1x4x8xf32>
    %545 = vector.shape_cast %544 : vector<2x1x4x8xf32> to vector<2x4x8xf32>
    %c29 = arith.constant 29 : index
    %546 = memref.load %arg2[%c29] : memref<144xf32, #tpu.memory_space<smem>>
    %547 = vector.broadcast %546 : f32 to vector<2x4x8xf32>
    %548 = arith.mulf %547, %545 : vector<2x4x8xf32>
    %549 = arith.addf %531, %548 : vector<2x4x8xf32>
    %c65 = arith.constant 65 : index
    %550 = memref.load %arg2[%c65] : memref<144xf32, #tpu.memory_space<smem>>
    %551 = vector.broadcast %550 : f32 to vector<2x4x8xf32>
    %552 = arith.mulf %551, %545 : vector<2x4x8xf32>
    %553 = arith.addf %535, %552 : vector<2x4x8xf32>
    %c101 = arith.constant 101 : index
    %554 = memref.load %arg2[%c101] : memref<144xf32, #tpu.memory_space<smem>>
    %555 = vector.broadcast %554 : f32 to vector<2x4x8xf32>
    %556 = arith.mulf %555, %545 : vector<2x4x8xf32>
    %557 = arith.addf %539, %556 : vector<2x4x8xf32>
    %c137 = arith.constant 137 : index
    %558 = memref.load %arg2[%c137] : memref<144xf32, #tpu.memory_space<smem>>
    %559 = vector.broadcast %558 : f32 to vector<2x4x8xf32>
    %560 = arith.mulf %559, %545 : vector<2x4x8xf32>
    %561 = arith.addf %543, %560 : vector<2x4x8xf32>
    %c0_192 = arith.constant 0 : index
    %c7_193 = arith.constant 7 : index
    %c0_194 = arith.constant 0 : index
    %c0_195 = arith.constant 0 : index
    %562 = vector.load %arg5[%c0_192, %c7_193, %c0_194, %c0_195] : memref<2x8x5x10xf32, #tpu.memory_space<vmem>>, vector<2x1x4x8xf32>
    %563 = vector.shape_cast %562 : vector<2x1x4x8xf32> to vector<2x4x8xf32>
    %c30 = arith.constant 30 : index
    %564 = memref.load %arg2[%c30] : memref<144xf32, #tpu.memory_space<smem>>
    %565 = vector.broadcast %564 : f32 to vector<2x4x8xf32>
    %566 = arith.mulf %565, %563 : vector<2x4x8xf32>
    %567 = arith.addf %549, %566 : vector<2x4x8xf32>
    %c66 = arith.constant 66 : index
    %568 = memref.load %arg2[%c66] : memref<144xf32, #tpu.memory_space<smem>>
    %569 = vector.broadcast %568 : f32 to vector<2x4x8xf32>
    %570 = arith.mulf %569, %563 : vector<2x4x8xf32>
    %571 = arith.addf %553, %570 : vector<2x4x8xf32>
    %c102 = arith.constant 102 : index
    %572 = memref.load %arg2[%c102] : memref<144xf32, #tpu.memory_space<smem>>
    %573 = vector.broadcast %572 : f32 to vector<2x4x8xf32>
    %574 = arith.mulf %573, %563 : vector<2x4x8xf32>
    %575 = arith.addf %557, %574 : vector<2x4x8xf32>
    %c138 = arith.constant 138 : index
    %576 = memref.load %arg2[%c138] : memref<144xf32, #tpu.memory_space<smem>>
    %577 = vector.broadcast %576 : f32 to vector<2x4x8xf32>
    %578 = arith.mulf %577, %563 : vector<2x4x8xf32>
    %579 = arith.addf %561, %578 : vector<2x4x8xf32>
    %c0_196 = arith.constant 0 : index
    %c7_197 = arith.constant 7 : index
    %c0_198 = arith.constant 0 : index
    %c1_199 = arith.constant 1 : index
    %580 = vector.load %arg5[%c0_196, %c7_197, %c0_198, %c1_199] : memref<2x8x5x10xf32, #tpu.memory_space<vmem>>, vector<2x1x4x8xf32>
    %581 = vector.shape_cast %580 : vector<2x1x4x8xf32> to vector<2x4x8xf32>
    %c31 = arith.constant 31 : index
    %582 = memref.load %arg2[%c31] : memref<144xf32, #tpu.memory_space<smem>>
    %583 = vector.broadcast %582 : f32 to vector<2x4x8xf32>
    %584 = arith.mulf %583, %581 : vector<2x4x8xf32>
    %585 = arith.addf %567, %584 : vector<2x4x8xf32>
    %c67 = arith.constant 67 : index
    %586 = memref.load %arg2[%c67] : memref<144xf32, #tpu.memory_space<smem>>
    %587 = vector.broadcast %586 : f32 to vector<2x4x8xf32>
    %588 = arith.mulf %587, %581 : vector<2x4x8xf32>
    %589 = arith.addf %571, %588 : vector<2x4x8xf32>
    %c103 = arith.constant 103 : index
    %590 = memref.load %arg2[%c103] : memref<144xf32, #tpu.memory_space<smem>>
    %591 = vector.broadcast %590 : f32 to vector<2x4x8xf32>
    %592 = arith.mulf %591, %581 : vector<2x4x8xf32>
    %593 = arith.addf %575, %592 : vector<2x4x8xf32>
    %c139 = arith.constant 139 : index
    %594 = memref.load %arg2[%c139] : memref<144xf32, #tpu.memory_space<smem>>
    %595 = vector.broadcast %594 : f32 to vector<2x4x8xf32>
    %596 = arith.mulf %595, %581 : vector<2x4x8xf32>
    %597 = arith.addf %579, %596 : vector<2x4x8xf32>
    %c0_200 = arith.constant 0 : index
    %c7_201 = arith.constant 7 : index
    %c0_202 = arith.constant 0 : index
    %c2_203 = arith.constant 2 : index
    %598 = vector.load %arg5[%c0_200, %c7_201, %c0_202, %c2_203] : memref<2x8x5x10xf32, #tpu.memory_space<vmem>>, vector<2x1x4x8xf32>
    %599 = vector.shape_cast %598 : vector<2x1x4x8xf32> to vector<2x4x8xf32>
    %c32 = arith.constant 32 : index
    %600 = memref.load %arg2[%c32] : memref<144xf32, #tpu.memory_space<smem>>
    %601 = vector.broadcast %600 : f32 to vector<2x4x8xf32>
    %602 = arith.mulf %601, %599 : vector<2x4x8xf32>
    %603 = arith.addf %585, %602 : vector<2x4x8xf32>
    %c68 = arith.constant 68 : index
    %604 = memref.load %arg2[%c68] : memref<144xf32, #tpu.memory_space<smem>>
    %605 = vector.broadcast %604 : f32 to vector<2x4x8xf32>
    %606 = arith.mulf %605, %599 : vector<2x4x8xf32>
    %607 = arith.addf %589, %606 : vector<2x4x8xf32>
    %c104 = arith.constant 104 : index
    %608 = memref.load %arg2[%c104] : memref<144xf32, #tpu.memory_space<smem>>
    %609 = vector.broadcast %608 : f32 to vector<2x4x8xf32>
    %610 = arith.mulf %609, %599 : vector<2x4x8xf32>
    %611 = arith.addf %593, %610 : vector<2x4x8xf32>
    %c140 = arith.constant 140 : index
    %612 = memref.load %arg2[%c140] : memref<144xf32, #tpu.memory_space<smem>>
    %613 = vector.broadcast %612 : f32 to vector<2x4x8xf32>
    %614 = arith.mulf %613, %599 : vector<2x4x8xf32>
    %615 = arith.addf %597, %614 : vector<2x4x8xf32>
    %c0_204 = arith.constant 0 : index
    %c3_205 = arith.constant 3 : index
    %c1_206 = arith.constant 1 : index
    %c0_207 = arith.constant 0 : index
    %616 = vector.load %arg5[%c0_204, %c3_205, %c1_206, %c0_207] : memref<2x8x5x10xf32, #tpu.memory_space<vmem>>, vector<2x1x4x8xf32>
    %617 = vector.shape_cast %616 : vector<2x1x4x8xf32> to vector<2x4x8xf32>
    %c33 = arith.constant 33 : index
    %618 = memref.load %arg2[%c33] : memref<144xf32, #tpu.memory_space<smem>>
    %619 = vector.broadcast %618 : f32 to vector<2x4x8xf32>
    %620 = arith.mulf %619, %617 : vector<2x4x8xf32>
    %621 = arith.addf %603, %620 : vector<2x4x8xf32>
    %c69 = arith.constant 69 : index
    %622 = memref.load %arg2[%c69] : memref<144xf32, #tpu.memory_space<smem>>
    %623 = vector.broadcast %622 : f32 to vector<2x4x8xf32>
    %624 = arith.mulf %623, %617 : vector<2x4x8xf32>
    %625 = arith.addf %607, %624 : vector<2x4x8xf32>
    %c105 = arith.constant 105 : index
    %626 = memref.load %arg2[%c105] : memref<144xf32, #tpu.memory_space<smem>>
    %627 = vector.broadcast %626 : f32 to vector<2x4x8xf32>
    %628 = arith.mulf %627, %617 : vector<2x4x8xf32>
    %629 = arith.addf %611, %628 : vector<2x4x8xf32>
    %c141 = arith.constant 141 : index
    %630 = memref.load %arg2[%c141] : memref<144xf32, #tpu.memory_space<smem>>
    %631 = vector.broadcast %630 : f32 to vector<2x4x8xf32>
    %632 = arith.mulf %631, %617 : vector<2x4x8xf32>
    %633 = arith.addf %615, %632 : vector<2x4x8xf32>
    %c0_208 = arith.constant 0 : index
    %c3_209 = arith.constant 3 : index
    %c1_210 = arith.constant 1 : index
    %c1_211 = arith.constant 1 : index
    %634 = vector.load %arg5[%c0_208, %c3_209, %c1_210, %c1_211] : memref<2x8x5x10xf32, #tpu.memory_space<vmem>>, vector<2x1x4x8xf32>
    %635 = vector.shape_cast %634 : vector<2x1x4x8xf32> to vector<2x4x8xf32>
    %c34 = arith.constant 34 : index
    %636 = memref.load %arg2[%c34] : memref<144xf32, #tpu.memory_space<smem>>
    %637 = vector.broadcast %636 : f32 to vector<2x4x8xf32>
    %638 = arith.mulf %637, %635 : vector<2x4x8xf32>
    %639 = arith.addf %621, %638 : vector<2x4x8xf32>
    %c70 = arith.constant 70 : index
    %640 = memref.load %arg2[%c70] : memref<144xf32, #tpu.memory_space<smem>>
    %641 = vector.broadcast %640 : f32 to vector<2x4x8xf32>
    %642 = arith.mulf %641, %635 : vector<2x4x8xf32>
    %643 = arith.addf %625, %642 : vector<2x4x8xf32>
    %c106 = arith.constant 106 : index
    %644 = memref.load %arg2[%c106] : memref<144xf32, #tpu.memory_space<smem>>
    %645 = vector.broadcast %644 : f32 to vector<2x4x8xf32>
    %646 = arith.mulf %645, %635 : vector<2x4x8xf32>
    %647 = arith.addf %629, %646 : vector<2x4x8xf32>
    %c142 = arith.constant 142 : index
    %648 = memref.load %arg2[%c142] : memref<144xf32, #tpu.memory_space<smem>>
    %649 = vector.broadcast %648 : f32 to vector<2x4x8xf32>
    %650 = arith.mulf %649, %635 : vector<2x4x8xf32>
    %651 = arith.addf %633, %650 : vector<2x4x8xf32>
    %c0_212 = arith.constant 0 : index
    %c3_213 = arith.constant 3 : index
    %c1_214 = arith.constant 1 : index
    %c2_215 = arith.constant 2 : index
    %652 = vector.load %arg5[%c0_212, %c3_213, %c1_214, %c2_215] : memref<2x8x5x10xf32, #tpu.memory_space<vmem>>, vector<2x1x4x8xf32>
    %653 = vector.shape_cast %652 : vector<2x1x4x8xf32> to vector<2x4x8xf32>
    %c35 = arith.constant 35 : index
    %654 = memref.load %arg2[%c35] : memref<144xf32, #tpu.memory_space<smem>>
    %655 = vector.broadcast %654 : f32 to vector<2x4x8xf32>
    %656 = arith.mulf %655, %653 : vector<2x4x8xf32>
    %657 = arith.addf %639, %656 : vector<2x4x8xf32>
    %c71 = arith.constant 71 : index
    %658 = memref.load %arg2[%c71] : memref<144xf32, #tpu.memory_space<smem>>
    %659 = vector.broadcast %658 : f32 to vector<2x4x8xf32>
    %660 = arith.mulf %659, %653 : vector<2x4x8xf32>
    %661 = arith.addf %643, %660 : vector<2x4x8xf32>
    %c107 = arith.constant 107 : index
    %662 = memref.load %arg2[%c107] : memref<144xf32, #tpu.memory_space<smem>>
    %663 = vector.broadcast %662 : f32 to vector<2x4x8xf32>
    %664 = arith.mulf %663, %653 : vector<2x4x8xf32>
    %665 = arith.addf %647, %664 : vector<2x4x8xf32>
    %c143 = arith.constant 143 : index
    %666 = memref.load %arg2[%c143] : memref<144xf32, #tpu.memory_space<smem>>
    %667 = vector.broadcast %666 : f32 to vector<2x4x8xf32>
    %668 = arith.mulf %667, %653 : vector<2x4x8xf32>
    %669 = arith.addf %651, %668 : vector<2x4x8xf32>
    %c0_216 = arith.constant 0 : index
    %670 = memref.load %arg3[%c0_216] : memref<4xf32, #tpu.memory_space<smem>>
    %671 = vector.broadcast %670 : f32 to vector<2x4x8xf32>
    %672 = arith.addf %657, %671 : vector<2x4x8xf32>
    %cst_217 = arith.constant 0.000000e+00 : f32
    %cst_218 = arith.constant 2.000000e+01 : f32
    %673 = vector.broadcast %cst_217 : f32 to vector<2x4x8xf32>
    %674 = arith.maximumf %673, %672 : vector<2x4x8xf32>
    %675 = vector.broadcast %cst_218 : f32 to vector<2x4x8xf32>
    %676 = arith.minimumf %675, %674 : vector<2x4x8xf32>
    %c1_219 = arith.constant 1 : index
    %677 = memref.load %arg3[%c1_219] : memref<4xf32, #tpu.memory_space<smem>>
    %678 = vector.broadcast %677 : f32 to vector<2x4x8xf32>
    %679 = arith.addf %661, %678 : vector<2x4x8xf32>
    %cst_220 = arith.constant 0.000000e+00 : f32
    %cst_221 = arith.constant 2.000000e+01 : f32
    %680 = vector.broadcast %cst_220 : f32 to vector<2x4x8xf32>
    %681 = arith.maximumf %680, %679 : vector<2x4x8xf32>
    %682 = vector.broadcast %cst_221 : f32 to vector<2x4x8xf32>
    %683 = arith.minimumf %682, %681 : vector<2x4x8xf32>
    %c2_222 = arith.constant 2 : index
    %684 = memref.load %arg3[%c2_222] : memref<4xf32, #tpu.memory_space<smem>>
    %685 = vector.broadcast %684 : f32 to vector<2x4x8xf32>
    %686 = arith.addf %665, %685 : vector<2x4x8xf32>
    %cst_223 = arith.constant 0.000000e+00 : f32
    %cst_224 = arith.constant 2.000000e+01 : f32
    %687 = vector.broadcast %cst_223 : f32 to vector<2x4x8xf32>
    %688 = arith.maximumf %687, %686 : vector<2x4x8xf32>
    %689 = vector.broadcast %cst_224 : f32 to vector<2x4x8xf32>
    %690 = arith.minimumf %689, %688 : vector<2x4x8xf32>
    %c3_225 = arith.constant 3 : index
    %691 = memref.load %arg3[%c3_225] : memref<4xf32, #tpu.memory_space<smem>>
    %692 = vector.broadcast %691 : f32 to vector<2x4x8xf32>
    %693 = arith.addf %669, %692 : vector<2x4x8xf32>
    %cst_226 = arith.constant 0.000000e+00 : f32
    %cst_227 = arith.constant 2.000000e+01 : f32
    %694 = vector.broadcast %cst_226 : f32 to vector<2x4x8xf32>
    %695 = arith.maximumf %694, %693 : vector<2x4x8xf32>
    %696 = vector.broadcast %cst_227 : f32 to vector<2x4x8xf32>
    %697 = arith.minimumf %696, %695 : vector<2x4x8xf32>
    %698 = vector.shape_cast %676 : vector<2x4x8xf32> to vector<2x1x4x8xf32>
    %699 = vector.shape_cast %683 : vector<2x4x8xf32> to vector<2x1x4x8xf32>
    %700 = vector.shape_cast %690 : vector<2x4x8xf32> to vector<2x1x4x8xf32>
    %701 = vector.shape_cast %697 : vector<2x4x8xf32> to vector<2x1x4x8xf32>
    %702 = tpu.concatenate %698, %699, %700, %701 in 1 : vector<2x1x4x8xf32>, vector<2x1x4x8xf32>, vector<2x1x4x8xf32>, vector<2x1x4x8xf32> -> vector<2x4x4x8xf32>
    %703 = tpu.iota {dimensions = array<i32: 2>} : vector<4x4x8xi32>
    %c0_228 = arith.constant 0 : index
    %704 = memref.load %arg0[%c0_228] : memref<2xi32, #tpu.memory_space<smem>>
    %705 = vector.broadcast %704 : i32 to vector<4x4x8xi32>
    %706 = arith.cmpi sge, %703, %705 : vector<4x4x8xi32>
    %707 = vector.extract_strided_slice %702 {offsets = [0, 0, 0, 0], sizes = [1, 4, 4, 8], strides = [1, 1, 1, 1]} : vector<2x4x4x8xf32> to vector<1x4x4x8xf32>
    %708 = vector.shape_cast %707 : vector<1x4x4x8xf32> to vector<4x4x8xf32>
    %cst_229 = arith.constant 0.000000e+00 : f32
    %709 = vector.broadcast %cst_229 : f32 to vector<4x4x8xf32>
    %710 = arith.select %706, %709, %708 : vector<4x4x8xi1>, vector<4x4x8xf32>
    %c1_230 = arith.constant 1 : index
    %711 = memref.load %arg0[%c1_230] : memref<2xi32, #tpu.memory_space<smem>>
    %712 = vector.broadcast %711 : i32 to vector<4x4x8xi32>
    %713 = arith.cmpi sge, %703, %712 : vector<4x4x8xi32>
    %714 = vector.extract_strided_slice %702 {offsets = [1, 0, 0, 0], sizes = [1, 4, 4, 8], strides = [1, 1, 1, 1]} : vector<2x4x4x8xf32> to vector<1x4x4x8xf32>
    %715 = vector.shape_cast %714 : vector<1x4x4x8xf32> to vector<4x4x8xf32>
    %cst_231 = arith.constant 0.000000e+00 : f32
    %716 = vector.broadcast %cst_231 : f32 to vector<4x4x8xf32>
    %717 = arith.select %713, %716, %715 : vector<4x4x8xi1>, vector<4x4x8xf32>
    %718 = vector.shape_cast %710 : vector<4x4x8xf32> to vector<1x4x4x8xf32>
    %719 = vector.shape_cast %717 : vector<4x4x8xf32> to vector<1x4x4x8xf32>
    %720 = tpu.concatenate %718, %719 in 0 : vector<1x4x4x8xf32>, vector<1x4x4x8xf32> -> vector<2x4x4x8xf32>
    %c0_232 = arith.constant 0 : index
    %c0_233 = arith.constant 0 : index
    %c0_234 = arith.constant 0 : index
    %c0_235 = arith.constant 0 : index
    %721 = vector.load %arg4[%c0_232, %c0_233, %c0_234, %c0_235] : memref<2x4x4x8xf32, #tpu.memory_space<vmem>>, vector<2x4x4x8xf32>
    tpu.vector_store %arg4[%c0_232, %c0_233, %c0_234, %c0_235], %720 {strides = array<i32>} : memref<2x4x4x8xf32, #tpu.memory_space<vmem>>, vector<2x4x4x8xf32>,
    return
  }
}

module attributes {stable_mosaic.version = 11 : i64} {
  func.func @_fused_conv_block_kernel(%arg0: memref<2xi32, #tpu.memory_space<smem>>, %arg1: memref<2x4x9x9xf32, #tpu.memory_space<vmem>>, %arg2: memref<36xf32, #tpu.memory_space<smem>>, %arg3: memref<4xf32, #tpu.memory_space<smem>>, %arg4: memref<2x4x8x8xf32, #tpu.memory_space<vmem>>) attributes {dimension_semantics = [], scalar_prefetch = 0 : i64, scratch_operands = 0 : i64, tpu.core_type = #tpu.core_type<tc>} {
    %cst = arith.constant 0.000000e+00 : f32
    %0 = vector.broadcast %cst : f32 to vector<2x8x8xf32>
    %cst_0 = arith.constant 0.000000e+00 : f32
    %1 = vector.broadcast %cst_0 : f32 to vector<2x8x8xf32>
    %cst_1 = arith.constant 0.000000e+00 : f32
    %2 = vector.broadcast %cst_1 : f32 to vector<2x8x8xf32>
    %cst_2 = arith.constant 0.000000e+00 : f32
    %3 = vector.broadcast %cst_2 : f32 to vector<2x8x8xf32>
    %c0 = arith.constant 0 : index
    %c0_3 = arith.constant 0 : index
    %c0_4 = arith.constant 0 : index
    %c0_5 = arith.constant 0 : index
    %4 = vector.load %arg1[%c0, %c0_3, %c0_4, %c0_5] : memref<2x4x9x9xf32, #tpu.memory_space<vmem>>, vector<2x1x8x8xf32>
    %5 = vector.shape_cast %4 : vector<2x1x8x8xf32> to vector<2x8x8xf32>
    %c0_6 = arith.constant 0 : index
    %6 = memref.load %arg2[%c0_6] : memref<36xf32, #tpu.memory_space<smem>>
    %7 = vector.broadcast %6 : f32 to vector<2x8x8xf32>
    %8 = arith.mulf %7, %5 : vector<2x8x8xf32>
    %9 = arith.addf %0, %8 : vector<2x8x8xf32>
    %c9 = arith.constant 9 : index
    %10 = memref.load %arg2[%c9] : memref<36xf32, #tpu.memory_space<smem>>
    %11 = vector.broadcast %10 : f32 to vector<2x8x8xf32>
    %12 = arith.mulf %11, %5 : vector<2x8x8xf32>
    %13 = arith.addf %1, %12 : vector<2x8x8xf32>
    %c18 = arith.constant 18 : index
    %14 = memref.load %arg2[%c18] : memref<36xf32, #tpu.memory_space<smem>>
    %15 = vector.broadcast %14 : f32 to vector<2x8x8xf32>
    %16 = arith.mulf %15, %5 : vector<2x8x8xf32>
    %17 = arith.addf %2, %16 : vector<2x8x8xf32>
    %c27 = arith.constant 27 : index
    %18 = memref.load %arg2[%c27] : memref<36xf32, #tpu.memory_space<smem>>
    %19 = vector.broadcast %18 : f32 to vector<2x8x8xf32>
    %20 = arith.mulf %19, %5 : vector<2x8x8xf32>
    %21 = arith.addf %3, %20 : vector<2x8x8xf32>
    %c0_7 = arith.constant 0 : index
    %c1 = arith.constant 1 : index
    %c0_8 = arith.constant 0 : index
    %c0_9 = arith.constant 0 : index
    %22 = vector.load %arg1[%c0_7, %c1, %c0_8, %c0_9] : memref<2x4x9x9xf32, #tpu.memory_space<vmem>>, vector<2x1x8x8xf32>
    %23 = vector.shape_cast %22 : vector<2x1x8x8xf32> to vector<2x8x8xf32>
    %c1_10 = arith.constant 1 : index
    %24 = memref.load %arg2[%c1_10] : memref<36xf32, #tpu.memory_space<smem>>
    %25 = vector.broadcast %24 : f32 to vector<2x8x8xf32>
    %26 = arith.mulf %25, %23 : vector<2x8x8xf32>
    %27 = arith.addf %9, %26 : vector<2x8x8xf32>
    %c10 = arith.constant 10 : index
    %28 = memref.load %arg2[%c10] : memref<36xf32, #tpu.memory_space<smem>>
    %29 = vector.broadcast %28 : f32 to vector<2x8x8xf32>
    %30 = arith.mulf %29, %23 : vector<2x8x8xf32>
    %31 = arith.addf %13, %30 : vector<2x8x8xf32>
    %c19 = arith.constant 19 : index
    %32 = memref.load %arg2[%c19] : memref<36xf32, #tpu.memory_space<smem>>
    %33 = vector.broadcast %32 : f32 to vector<2x8x8xf32>
    %34 = arith.mulf %33, %23 : vector<2x8x8xf32>
    %35 = arith.addf %17, %34 : vector<2x8x8xf32>
    %c28 = arith.constant 28 : index
    %36 = memref.load %arg2[%c28] : memref<36xf32, #tpu.memory_space<smem>>
    %37 = vector.broadcast %36 : f32 to vector<2x8x8xf32>
    %38 = arith.mulf %37, %23 : vector<2x8x8xf32>
    %39 = arith.addf %21, %38 : vector<2x8x8xf32>
    %c0_11 = arith.constant 0 : index
    %c0_12 = arith.constant 0 : index
    %c0_13 = arith.constant 0 : index
    %c1_14 = arith.constant 1 : index
    %40 = vector.load %arg1[%c0_11, %c0_12, %c0_13, %c1_14] : memref<2x4x9x9xf32, #tpu.memory_space<vmem>>, vector<2x1x8x8xf32>
    %41 = vector.shape_cast %40 : vector<2x1x8x8xf32> to vector<2x8x8xf32>
    %c2 = arith.constant 2 : index
    %42 = memref.load %arg2[%c2] : memref<36xf32, #tpu.memory_space<smem>>
    %43 = vector.broadcast %42 : f32 to vector<2x8x8xf32>
    %44 = arith.mulf %43, %41 : vector<2x8x8xf32>
    %45 = arith.addf %27, %44 : vector<2x8x8xf32>
    %c11 = arith.constant 11 : index
    %46 = memref.load %arg2[%c11] : memref<36xf32, #tpu.memory_space<smem>>
    %47 = vector.broadcast %46 : f32 to vector<2x8x8xf32>
    %48 = arith.mulf %47, %41 : vector<2x8x8xf32>
    %49 = arith.addf %31, %48 : vector<2x8x8xf32>
    %c20 = arith.constant 20 : index
    %50 = memref.load %arg2[%c20] : memref<36xf32, #tpu.memory_space<smem>>
    %51 = vector.broadcast %50 : f32 to vector<2x8x8xf32>
    %52 = arith.mulf %51, %41 : vector<2x8x8xf32>
    %53 = arith.addf %35, %52 : vector<2x8x8xf32>
    %c29 = arith.constant 29 : index
    %54 = memref.load %arg2[%c29] : memref<36xf32, #tpu.memory_space<smem>>
    %55 = vector.broadcast %54 : f32 to vector<2x8x8xf32>
    %56 = arith.mulf %55, %41 : vector<2x8x8xf32>
    %57 = arith.addf %39, %56 : vector<2x8x8xf32>
    %c0_15 = arith.constant 0 : index
    %c2_16 = arith.constant 2 : index
    %c0_17 = arith.constant 0 : index
    %c0_18 = arith.constant 0 : index
    %58 = vector.load %arg1[%c0_15, %c2_16, %c0_17, %c0_18] : memref<2x4x9x9xf32, #tpu.memory_space<vmem>>, vector<2x1x8x8xf32>
    %59 = vector.shape_cast %58 : vector<2x1x8x8xf32> to vector<2x8x8xf32>
    %c3 = arith.constant 3 : index
    %60 = memref.load %arg2[%c3] : memref<36xf32, #tpu.memory_space<smem>>
    %61 = vector.broadcast %60 : f32 to vector<2x8x8xf32>
    %62 = arith.mulf %61, %59 : vector<2x8x8xf32>
    %63 = arith.addf %45, %62 : vector<2x8x8xf32>
    %c12 = arith.constant 12 : index
    %64 = memref.load %arg2[%c12] : memref<36xf32, #tpu.memory_space<smem>>
    %65 = vector.broadcast %64 : f32 to vector<2x8x8xf32>
    %66 = arith.mulf %65, %59 : vector<2x8x8xf32>
    %67 = arith.addf %49, %66 : vector<2x8x8xf32>
    %c21 = arith.constant 21 : index
    %68 = memref.load %arg2[%c21] : memref<36xf32, #tpu.memory_space<smem>>
    %69 = vector.broadcast %68 : f32 to vector<2x8x8xf32>
    %70 = arith.mulf %69, %59 : vector<2x8x8xf32>
    %71 = arith.addf %53, %70 : vector<2x8x8xf32>
    %c30 = arith.constant 30 : index
    %72 = memref.load %arg2[%c30] : memref<36xf32, #tpu.memory_space<smem>>
    %73 = vector.broadcast %72 : f32 to vector<2x8x8xf32>
    %74 = arith.mulf %73, %59 : vector<2x8x8xf32>
    %75 = arith.addf %57, %74 : vector<2x8x8xf32>
    %c0_19 = arith.constant 0 : index
    %c3_20 = arith.constant 3 : index
    %c0_21 = arith.constant 0 : index
    %c0_22 = arith.constant 0 : index
    %76 = vector.load %arg1[%c0_19, %c3_20, %c0_21, %c0_22] : memref<2x4x9x9xf32, #tpu.memory_space<vmem>>, vector<2x1x8x8xf32>
    %77 = vector.shape_cast %76 : vector<2x1x8x8xf32> to vector<2x8x8xf32>
    %c4 = arith.constant 4 : index
    %78 = memref.load %arg2[%c4] : memref<36xf32, #tpu.memory_space<smem>>
    %79 = vector.broadcast %78 : f32 to vector<2x8x8xf32>
    %80 = arith.mulf %79, %77 : vector<2x8x8xf32>
    %81 = arith.addf %63, %80 : vector<2x8x8xf32>
    %c13 = arith.constant 13 : index
    %82 = memref.load %arg2[%c13] : memref<36xf32, #tpu.memory_space<smem>>
    %83 = vector.broadcast %82 : f32 to vector<2x8x8xf32>
    %84 = arith.mulf %83, %77 : vector<2x8x8xf32>
    %85 = arith.addf %67, %84 : vector<2x8x8xf32>
    %c22 = arith.constant 22 : index
    %86 = memref.load %arg2[%c22] : memref<36xf32, #tpu.memory_space<smem>>
    %87 = vector.broadcast %86 : f32 to vector<2x8x8xf32>
    %88 = arith.mulf %87, %77 : vector<2x8x8xf32>
    %89 = arith.addf %71, %88 : vector<2x8x8xf32>
    %c31 = arith.constant 31 : index
    %90 = memref.load %arg2[%c31] : memref<36xf32, #tpu.memory_space<smem>>
    %91 = vector.broadcast %90 : f32 to vector<2x8x8xf32>
    %92 = arith.mulf %91, %77 : vector<2x8x8xf32>
    %93 = arith.addf %75, %92 : vector<2x8x8xf32>
    %c0_23 = arith.constant 0 : index
    %c2_24 = arith.constant 2 : index
    %c0_25 = arith.constant 0 : index
    %c1_26 = arith.constant 1 : index
    %94 = vector.load %arg1[%c0_23, %c2_24, %c0_25, %c1_26] : memref<2x4x9x9xf32, #tpu.memory_space<vmem>>, vector<2x1x8x8xf32>
    %95 = vector.shape_cast %94 : vector<2x1x8x8xf32> to vector<2x8x8xf32>
    %c5 = arith.constant 5 : index
    %96 = memref.load %arg2[%c5] : memref<36xf32, #tpu.memory_space<smem>>
    %97 = vector.broadcast %96 : f32 to vector<2x8x8xf32>
    %98 = arith.mulf %97, %95 : vector<2x8x8xf32>
    %99 = arith.addf %81, %98 : vector<2x8x8xf32>
    %c14 = arith.constant 14 : index
    %100 = memref.load %arg2[%c14] : memref<36xf32, #tpu.memory_space<smem>>
    %101 = vector.broadcast %100 : f32 to vector<2x8x8xf32>
    %102 = arith.mulf %101, %95 : vector<2x8x8xf32>
    %103 = arith.addf %85, %102 : vector<2x8x8xf32>
    %c23 = arith.constant 23 : index
    %104 = memref.load %arg2[%c23] : memref<36xf32, #tpu.memory_space<smem>>
    %105 = vector.broadcast %104 : f32 to vector<2x8x8xf32>
    %106 = arith.mulf %105, %95 : vector<2x8x8xf32>
    %107 = arith.addf %89, %106 : vector<2x8x8xf32>
    %c32 = arith.constant 32 : index
    %108 = memref.load %arg2[%c32] : memref<36xf32, #tpu.memory_space<smem>>
    %109 = vector.broadcast %108 : f32 to vector<2x8x8xf32>
    %110 = arith.mulf %109, %95 : vector<2x8x8xf32>
    %111 = arith.addf %93, %110 : vector<2x8x8xf32>
    %c0_27 = arith.constant 0 : index
    %c0_28 = arith.constant 0 : index
    %c1_29 = arith.constant 1 : index
    %c0_30 = arith.constant 0 : index
    %112 = vector.load %arg1[%c0_27, %c0_28, %c1_29, %c0_30] : memref<2x4x9x9xf32, #tpu.memory_space<vmem>>, vector<2x1x8x8xf32>
    %113 = vector.shape_cast %112 : vector<2x1x8x8xf32> to vector<2x8x8xf32>
    %c6 = arith.constant 6 : index
    %114 = memref.load %arg2[%c6] : memref<36xf32, #tpu.memory_space<smem>>
    %115 = vector.broadcast %114 : f32 to vector<2x8x8xf32>
    %116 = arith.mulf %115, %113 : vector<2x8x8xf32>
    %117 = arith.addf %99, %116 : vector<2x8x8xf32>
    %c15 = arith.constant 15 : index
    %118 = memref.load %arg2[%c15] : memref<36xf32, #tpu.memory_space<smem>>
    %119 = vector.broadcast %118 : f32 to vector<2x8x8xf32>
    %120 = arith.mulf %119, %113 : vector<2x8x8xf32>
    %121 = arith.addf %103, %120 : vector<2x8x8xf32>
    %c24 = arith.constant 24 : index
    %122 = memref.load %arg2[%c24] : memref<36xf32, #tpu.memory_space<smem>>
    %123 = vector.broadcast %122 : f32 to vector<2x8x8xf32>
    %124 = arith.mulf %123, %113 : vector<2x8x8xf32>
    %125 = arith.addf %107, %124 : vector<2x8x8xf32>
    %c33 = arith.constant 33 : index
    %126 = memref.load %arg2[%c33] : memref<36xf32, #tpu.memory_space<smem>>
    %127 = vector.broadcast %126 : f32 to vector<2x8x8xf32>
    %128 = arith.mulf %127, %113 : vector<2x8x8xf32>
    %129 = arith.addf %111, %128 : vector<2x8x8xf32>
    %c0_31 = arith.constant 0 : index
    %c1_32 = arith.constant 1 : index
    %c1_33 = arith.constant 1 : index
    %c0_34 = arith.constant 0 : index
    %130 = vector.load %arg1[%c0_31, %c1_32, %c1_33, %c0_34] : memref<2x4x9x9xf32, #tpu.memory_space<vmem>>, vector<2x1x8x8xf32>
    %131 = vector.shape_cast %130 : vector<2x1x8x8xf32> to vector<2x8x8xf32>
    %c7 = arith.constant 7 : index
    %132 = memref.load %arg2[%c7] : memref<36xf32, #tpu.memory_space<smem>>
    %133 = vector.broadcast %132 : f32 to vector<2x8x8xf32>
    %134 = arith.mulf %133, %131 : vector<2x8x8xf32>
    %135 = arith.addf %117, %134 : vector<2x8x8xf32>
    %c16 = arith.constant 16 : index
    %136 = memref.load %arg2[%c16] : memref<36xf32, #tpu.memory_space<smem>>
    %137 = vector.broadcast %136 : f32 to vector<2x8x8xf32>
    %138 = arith.mulf %137, %131 : vector<2x8x8xf32>
    %139 = arith.addf %121, %138 : vector<2x8x8xf32>
    %c25 = arith.constant 25 : index
    %140 = memref.load %arg2[%c25] : memref<36xf32, #tpu.memory_space<smem>>
    %141 = vector.broadcast %140 : f32 to vector<2x8x8xf32>
    %142 = arith.mulf %141, %131 : vector<2x8x8xf32>
    %143 = arith.addf %125, %142 : vector<2x8x8xf32>
    %c34 = arith.constant 34 : index
    %144 = memref.load %arg2[%c34] : memref<36xf32, #tpu.memory_space<smem>>
    %145 = vector.broadcast %144 : f32 to vector<2x8x8xf32>
    %146 = arith.mulf %145, %131 : vector<2x8x8xf32>
    %147 = arith.addf %129, %146 : vector<2x8x8xf32>
    %c0_35 = arith.constant 0 : index
    %c0_36 = arith.constant 0 : index
    %c1_37 = arith.constant 1 : index
    %c1_38 = arith.constant 1 : index
    %148 = vector.load %arg1[%c0_35, %c0_36, %c1_37, %c1_38] : memref<2x4x9x9xf32, #tpu.memory_space<vmem>>, vector<2x1x8x8xf32>
    %149 = vector.shape_cast %148 : vector<2x1x8x8xf32> to vector<2x8x8xf32>
    %c8 = arith.constant 8 : index
    %150 = memref.load %arg2[%c8] : memref<36xf32, #tpu.memory_space<smem>>
    %151 = vector.broadcast %150 : f32 to vector<2x8x8xf32>
    %152 = arith.mulf %151, %149 : vector<2x8x8xf32>
    %153 = arith.addf %135, %152 : vector<2x8x8xf32>
    %c17 = arith.constant 17 : index
    %154 = memref.load %arg2[%c17] : memref<36xf32, #tpu.memory_space<smem>>
    %155 = vector.broadcast %154 : f32 to vector<2x8x8xf32>
    %156 = arith.mulf %155, %149 : vector<2x8x8xf32>
    %157 = arith.addf %139, %156 : vector<2x8x8xf32>
    %c26 = arith.constant 26 : index
    %158 = memref.load %arg2[%c26] : memref<36xf32, #tpu.memory_space<smem>>
    %159 = vector.broadcast %158 : f32 to vector<2x8x8xf32>
    %160 = arith.mulf %159, %149 : vector<2x8x8xf32>
    %161 = arith.addf %143, %160 : vector<2x8x8xf32>
    %c35 = arith.constant 35 : index
    %162 = memref.load %arg2[%c35] : memref<36xf32, #tpu.memory_space<smem>>
    %163 = vector.broadcast %162 : f32 to vector<2x8x8xf32>
    %164 = arith.mulf %163, %149 : vector<2x8x8xf32>
    %165 = arith.addf %147, %164 : vector<2x8x8xf32>
    %c0_39 = arith.constant 0 : index
    %166 = memref.load %arg3[%c0_39] : memref<4xf32, #tpu.memory_space<smem>>
    %167 = vector.broadcast %166 : f32 to vector<2x8x8xf32>
    %168 = arith.addf %153, %167 : vector<2x8x8xf32>
    %cst_40 = arith.constant 0.000000e+00 : f32
    %cst_41 = arith.constant 2.000000e+01 : f32
    %169 = vector.broadcast %cst_40 : f32 to vector<2x8x8xf32>
    %170 = arith.maximumf %169, %168 : vector<2x8x8xf32>
    %171 = vector.broadcast %cst_41 : f32 to vector<2x8x8xf32>
    %172 = arith.minimumf %171, %170 : vector<2x8x8xf32>
    %c1_42 = arith.constant 1 : index
    %173 = memref.load %arg3[%c1_42] : memref<4xf32, #tpu.memory_space<smem>>
    %174 = vector.broadcast %173 : f32 to vector<2x8x8xf32>
    %175 = arith.addf %157, %174 : vector<2x8x8xf32>
    %cst_43 = arith.constant 0.000000e+00 : f32
    %cst_44 = arith.constant 2.000000e+01 : f32
    %176 = vector.broadcast %cst_43 : f32 to vector<2x8x8xf32>
    %177 = arith.maximumf %176, %175 : vector<2x8x8xf32>
    %178 = vector.broadcast %cst_44 : f32 to vector<2x8x8xf32>
    %179 = arith.minimumf %178, %177 : vector<2x8x8xf32>
    %c2_45 = arith.constant 2 : index
    %180 = memref.load %arg3[%c2_45] : memref<4xf32, #tpu.memory_space<smem>>
    %181 = vector.broadcast %180 : f32 to vector<2x8x8xf32>
    %182 = arith.addf %161, %181 : vector<2x8x8xf32>
    %cst_46 = arith.constant 0.000000e+00 : f32
    %cst_47 = arith.constant 2.000000e+01 : f32
    %183 = vector.broadcast %cst_46 : f32 to vector<2x8x8xf32>
    %184 = arith.maximumf %183, %182 : vector<2x8x8xf32>
    %185 = vector.broadcast %cst_47 : f32 to vector<2x8x8xf32>
    %186 = arith.minimumf %185, %184 : vector<2x8x8xf32>
    %c3_48 = arith.constant 3 : index
    %187 = memref.load %arg3[%c3_48] : memref<4xf32, #tpu.memory_space<smem>>
    %188 = vector.broadcast %187 : f32 to vector<2x8x8xf32>
    %189 = arith.addf %165, %188 : vector<2x8x8xf32>
    %cst_49 = arith.constant 0.000000e+00 : f32
    %cst_50 = arith.constant 2.000000e+01 : f32
    %190 = vector.broadcast %cst_49 : f32 to vector<2x8x8xf32>
    %191 = arith.maximumf %190, %189 : vector<2x8x8xf32>
    %192 = vector.broadcast %cst_50 : f32 to vector<2x8x8xf32>
    %193 = arith.minimumf %192, %191 : vector<2x8x8xf32>
    %194 = vector.shape_cast %172 : vector<2x8x8xf32> to vector<2x1x8x8xf32>
    %195 = vector.shape_cast %179 : vector<2x8x8xf32> to vector<2x1x8x8xf32>
    %196 = vector.shape_cast %186 : vector<2x8x8xf32> to vector<2x1x8x8xf32>
    %197 = vector.shape_cast %193 : vector<2x8x8xf32> to vector<2x1x8x8xf32>
    %198 = tpu.concatenate %194, %195, %196, %197 in 1 : vector<2x1x8x8xf32>, vector<2x1x8x8xf32>, vector<2x1x8x8xf32>, vector<2x1x8x8xf32> -> vector<2x4x8x8xf32>
    %199 = tpu.iota {dimensions = array<i32: 2>} : vector<4x8x8xi32>
    %c0_51 = arith.constant 0 : index
    %200 = memref.load %arg0[%c0_51] : memref<2xi32, #tpu.memory_space<smem>>
    %201 = vector.broadcast %200 : i32 to vector<4x8x8xi32>
    %202 = arith.cmpi sge, %199, %201 : vector<4x8x8xi32>
    %203 = vector.extract_strided_slice %198 {offsets = [0, 0, 0, 0], sizes = [1, 4, 8, 8], strides = [1, 1, 1, 1]} : vector<2x4x8x8xf32> to vector<1x4x8x8xf32>
    %204 = vector.shape_cast %203 : vector<1x4x8x8xf32> to vector<4x8x8xf32>
    %cst_52 = arith.constant 0.000000e+00 : f32
    %205 = vector.broadcast %cst_52 : f32 to vector<4x8x8xf32>
    %206 = arith.select %202, %205, %204 : vector<4x8x8xi1>, vector<4x8x8xf32>
    %c1_53 = arith.constant 1 : index
    %207 = memref.load %arg0[%c1_53] : memref<2xi32, #tpu.memory_space<smem>>
    %208 = vector.broadcast %207 : i32 to vector<4x8x8xi32>
    %209 = arith.cmpi sge, %199, %208 : vector<4x8x8xi32>
    %210 = vector.extract_strided_slice %198 {offsets = [1, 0, 0, 0], sizes = [1, 4, 8, 8], strides = [1, 1, 1, 1]} : vector<2x4x8x8xf32> to vector<1x4x8x8xf32>
    %211 = vector.shape_cast %210 : vector<1x4x8x8xf32> to vector<4x8x8xf32>
    %cst_54 = arith.constant 0.000000e+00 : f32
    %212 = vector.broadcast %cst_54 : f32 to vector<4x8x8xf32>
    %213 = arith.select %209, %212, %211 : vector<4x8x8xi1>, vector<4x8x8xf32>
    %214 = vector.shape_cast %206 : vector<4x8x8xf32> to vector<1x4x8x8xf32>
    %215 = vector.shape_cast %213 : vector<4x8x8xf32> to vector<1x4x8x8xf32>
    %216 = tpu.concatenate %214, %215 in 0 : vector<1x4x8x8xf32>, vector<1x4x8x8xf32> -> vector<2x4x8x8xf32>
    %c0_55 = arith.constant 0 : index
    %c0_56 = arith.constant 0 : index
    %c0_57 = arith.constant 0 : index
    %c0_58 = arith.constant 0 : index
    %217 = vector.load %arg4[%c0_55, %c0_56, %c0_57, %c0_58] : memref<2x4x8x8xf32, #tpu.memory_space<vmem>>, vector<2x4x8x8xf32>
    tpu.vector_store %arg4[%c0_55, %c0_56, %c0_57, %c0_58], %216 {strides = array<i32>} : memref<2x4x8x8xf32, #tpu.memory_space<vmem>>, vector<2x4x8x8xf32>,
    return
  }
}

</mosaic_0001>

<bundles_post_ra>
// kernel: _lambda_.2
= control target key start
LH: loop header
LB: loop body
LE: loop exit
PB: predicated region body
PF: predicated region fallthrough
CT: control target
= control target key end

     0   :  { %9 = vsyncpa [#allocation3], 0  ;;  %s841_s0 = inlined_call_operand.vmem [shape: s32[2], index: 0, kind: input, shape index: {}]   ;;  %s842_s1 = inlined_call_operand.vmem [shape: f32[2,4,9,9], index: 1, kind: input, shape index: {}]   ;;  %s843_s2 = inlined_call_operand.vmem [shape: f32[36], index: 2, kind: input, shape index: {}]   ;;  %s844_s3 = inlined_call_operand.vmem [shape: f32[4], index: 3, kind: input, shape index: {}]   ;;  %s845_s4 = inlined_call_operand.vmem [shape: f32[2,4,8,8], index: 4, kind: output, shape index: {}]  }
   0x1   :  { %10 = vsyncpa [#allocation5], 0  ;;  %s29_s17 = sshll.u32 %s843_s2, 4  ;;  %s17_s20 = sshll.u32 %s841_s0, 4  ;;  %s30_s17 = int_to_ptr.vmem [resolvable:$true] %s29_s17  ;;  %s18_s20 = int_to_ptr.vmem [resolvable:$true] %s17_s20 }
   0x2   :  { %s494_s21 = scalar_lea.vmem %s30_s17, 16  ;;  %p499_p1 = scmp.lt.s32.totalorder %s30_s17, %s30_s17 }
   0x3   :  { %p495_p0 = scmp.ne.s32.totalorder %s30_s17, %s494_s21  ;;  %p500_p2 = scmp.lt.s32.totalorder %s494_s21, %s494_s21 }
   0x5   :  { %p501_p3 = por %p500_p2, %p499_p1 }
   0x7   :  { %p502_p4 = pnand %p501_p3, %p495_p0 }
   0x9   :  { %505 = shalt.err (!%p502_p4)
}
   0xa   :  { %s534_s22 = smov [#allocation4]   ;;  %s506_s23 = scalar_lea.vmem %s18_s20, 16 }
   0xb   :  { %32 = dma.vmem_to_smem %s30_s17, 16, %s534_s22, [#allocation5]  }
   0xc   :  { %p507_p5 = scmp.ne.s32.totalorder %s18_s20, %s506_s23  ;;  %p511_p6 = scmp.lt.s32.totalorder %s18_s20, %s18_s20 }
   0xd   :  { %p512_p7 = scmp.lt.s32.totalorder %s506_s23, %s506_s23 }
   0xf   :  { %p513_p8 = por %p512_p7, %p511_p6 }
  0x11   :  { %p514_p9 = pnand %p513_p8, %p507_p5 }
  0x13   :  { %517 = shalt.err (!%p514_p9)
}
  0x14   :  { %s535_s2 = smov [#allocation2]   ;;  %s39_s25 = sshll.u32 %s844_s3, 4  ;;  %s40_s25 = int_to_ptr.vmem [resolvable:$true] %s39_s25 }
  0x15   :  { %20 = dma.vmem_to_smem %s18_s20, 16, %s535_s2, [#allocation3]  }
  0x16   :  { %s518_s26 = scalar_lea.vmem %s40_s25, 16  ;;  %p523_p11 = scmp.lt.s32.totalorder %s40_s25, %s40_s25 }
  0x17   :  { %p519_p10 = scmp.ne.s32.totalorder %s40_s25, %s518_s26  ;;  %p524_p12 = scmp.lt.s32.totalorder %s518_s26, %s518_s26 }
  0x19   :  { %p525_p13 = por %p524_p12, %p523_p11 }
  0x1b   :  { %p526_p0 = pnand %p525_p13, %p519_p10 }
  0x1d   :  { %529 = shalt.err (!%p526_p0)
}
  0x1e   :  { %s536_s27 = smov [#allocation6]  }
  0x1f   :  { %42 = dma.vmem_to_smem %s40_s25, 16, %s536_s27, [#allocation5]  }
  0x20   :  { %530 = dma.done.wait [#allocation3], 16  }
  0x21   :  { %531 = vsyncadd [#allocation3], 4294967280 }
  0x22   :  { %532 = dma.done.wait [#allocation5], 32  }
  0x23   :  { %533 = vsyncadd [#allocation5], 4294967264 }
  0x24   :  { %52 = sfence }
  0x25   :  { %s453_s28 = sld [smem:[#allocation4 + $0xb]]  ;;  %s452_s29 = sld [smem:[#allocation4 + $0x2]]  ;;  %v575_v0 = vld [vmem:[%s842_s1] sm:$0xff]  ;;  %v446_v43 = vld [vmem:[%s842_s1 + $0x10] sm:$0xff]  ;;  %vm428_vm1 = vcmask 64512  }
  0x26   :  { %s454_s30 = sld [smem:[#allocation4 + $0x14]]  ;;  %v580_v1 = vld [vmem:[%s842_s1 + $0x40] sm:$0xff]  ;;  %s455_s8 = sld [smem:[#allocation4 + $0x1d]]  ;;  %v447_v49 = vld [vmem:[%s842_s1 + $0x50] sm:$0xff] }
  0x27   :  { %s537_s9 = smov 127   ;;  %s468_s10 = sld [smem:[#allocation4 + $0x5]]  ;;  %v599_v14 = vld [vmem:[%s842_s1 + $0x60] sm:$0xff] }
  0x28   :  { %s469_s11 = sld [smem:[#allocation4 + $0xe]]  ;;  %s470_s14 = sld [smem:[#allocation4 + $0x17]]  ;;  %v604_v16 = vld [vmem:[%s842_s1 + $0x20] sm:$0xff] }
  0x29   :  { %s471_s17 = sld [smem:[#allocation4 + $0x20]]  ;;  %s483_s19 = sld [smem:[#allocation4 + $0x11]]  ;;  %v625_v28 = vld [vmem:[%s842_s1 + $0x41] sm:$0xff] }
  0x2a   :  { %s482_s18 = sld [smem:[#allocation4 + $0x8]]  ;;  %s484_s22 = sld [smem:[#allocation4 + $0x1a]]  ;;  %v630_v30 = vld [vmem:[%s842_s1 + $0x1] sm:$0xff] }
  0x2b   :  { %v121_v2 = vstv %s453_s28  ;;  %v107_v4 = vstv %s452_s29  ;;  %s485_s0 = sld [smem:[#allocation4 + $0x23]]  ;;  %s443_s24 = sld [smem:[#allocation4 + $0x9]] }
  0x2c   :  { %v122_v3 = vmul.f32 %v121_v2, %v575_v0  ;;  %v108_v5 = vmul.f32 %v107_v4, %v575_v0  ;;  %v123_v6 = vmul.f32 %v121_v2, %v580_v1  ;;  %v109_v7 = vmul.f32 %v107_v4, %v580_v1  ;;  %s449_s25 = sld [smem:[#allocation4 + $0xa]]  ;;  %s55_s26 = sld [smem:[#allocation4]] }
  0x2d   :  { %v135_v8 = vstv %s454_s30  ;;  %v149_v11 = vstv %s455_s8  ;;  %v217_v15 = vstv %s468_s10  ;;  %s448_s27 = sld [smem:[#allocation4 + $0x1]]  ;;  %s650_s28 = sld [smem:[#allocation4 + $0xc]] }
  0x2e   :  { %126 = vrot.lane.b32.xlu1 %v122_v3, %s537_s9  ;;  %112 = vrot.lane.b32.xlu0 %v108_v5, %s537_s9  ;;  %v137_v9 = vmul.f32 %v135_v8, %v580_v1  ;;  %v136_v10 = vmul.f32 %v135_v8, %v575_v0  ;;  %v151_v12 = vmul.f32 %v149_v11, %v580_v1  ;;  %v231_v19 = vstv %s469_s11  ;;  %s652_s29 = sld [smem:[#allocation4 + $0x3]]  ;;  %s657_s3 = sld [smem:[#allocation4 + $0x12]] }
  0x2f   :  { %v150_v13 = vmul.f32 %v149_v11, %v575_v0  ;;  %v219_v17 = vmul.f32 %v599_v14, %v217_v15  ;;  %v218_v18 = vmul.f32 %v604_v16, %v217_v15  ;;  %v233_v20 = vmul.f32 %v599_v14, %v231_v19  ;;  %s659_s6 = sld [smem:[#allocation4 + $0x13]]  ;;  %s668_s10 = sld [smem:[#allocation4 + $0x1c]] }
  0x30   :  { %v232_v21 = vmul.f32 %v604_v16, %v231_v19  ;;  %v245_v22 = vstv %s470_s14  ;;  %v259_v25 = vstv %s471_s17  ;;  %v325_v29 = vstv %s482_s18  ;;  %s673_s11 = sld [smem:[#allocation4 + $0x15]]  ;;  %s680_s12 = sld [smem:[#allocation4 + $0x1e]] }
  0x31   :  { %v247_v23 = vmul.f32 %v599_v14, %v245_v22  ;;  %v246_v24 = vmul.f32 %v604_v16, %v245_v22  ;;  %v261_v26 = vmul.f32 %v599_v14, %v259_v25  ;;  %v260_v27 = vmul.f32 %v604_v16, %v259_v25  ;;  %s683_s13 = sld [smem:[#allocation4 + $0x4]]  ;;  %s691_s14 = sld [smem:[#allocation4 + $0x6]] }
  0x32   :  { %128 = vrot.lane.b32.xlu1 %v123_v6, %s537_s9  ;;  %114 = vrot.lane.b32.xlu0 %v109_v7, %s537_s9  ;;  %v327_v31 = vmul.f32 %v325_v29, %v625_v28  ;;  %v326_v32 = vmul.f32 %v325_v29, %v630_v30  ;;  %v339_v33 = vstv %s483_s19  ;;  %v353_v36 = vstv %s484_s22  ;;  %s696_s15 = sld [smem:[#allocation4 + $0xd]]  ;;  %s700_s16 = sld [smem:[#allocation4 + $0xf]] }
  0x33   :  { %v341_v34 = vmul.f32 %v339_v33, %v625_v28  ;;  %v340_v35 = vmul.f32 %v339_v33, %v630_v30  ;;  %v355_v37 = vmul.f32 %v353_v36, %v625_v28  ;;  %v354_v38 = vmul.f32 %v353_v36, %v630_v30  ;;  %s707_s19 = sld [smem:[#allocation4 + $0x16]]  ;;  %s715_s22 = sld [smem:[#allocation4 + $0x18]] }
  0x34   :  { %v367_v39 = vstv %s485_s0  ;;  %v62_v42 = vstv %s443_s24  ;;  %v89_v44 = vstv %s449_s25  ;;  %v56_v45 = vstv %s55_s26  ;;  %s718_s23 = sld [smem:[#allocation4 + $0x1f]]  ;;  %s724_s2 = sld [smem:[#allocation4 + $0x21]] }
  0x35   :  { %v369_v40 = vmul.f32 %v367_v39, %v625_v28  ;;  %v368_v41 = vmul.f32 %v367_v39, %v630_v30  ;;  %v83_v46 = vstv %s448_s27  ;;  %v90_v47 = vmul.f32 %v446_v43, %v89_v44  ;;  %s727_s0 = sld [smem:[#allocation4 + $0x7]]  ;;  %s734_s24 = sld [smem:[#allocation4 + $0x10]] }
  0x36   :  { %142 = vrot.lane.b32.xlu1 %v137_v9, %s537_s9  ;;  %140 = vrot.lane.b32.xlu0 %v136_v10, %s537_s9  ;;  %v63_v48 = vmul.f32 %v62_v42, %v575_v0  ;;  %v84_v50 = vmul.f32 %v446_v43, %v83_v46  ;;  %v57_v51 = vmul.f32 %v56_v45, %v575_v0  ;;  %v172_v52 = vstv %s650_s28  ;;  %s739_s25 = sld [smem:[#allocation6]]  ;;  %s747_s28 = sld [smem:[#allocation4 + $0x19]] }
  0x37   :  { %v64_v53 = vmul.f32 %v62_v42, %v580_v1  ;;  %v91_v54 = vmul.f32 %v447_v49, %v89_v44  ;;  %v58_v55 = vmul.f32 %v56_v45, %v580_v1  ;;  %v85_v56 = vmul.f32 %v447_v49, %v83_v46  ;;  %v462_v42 = vld [vmem:[%s842_s1 + $0x30] sm:$0xff]  ;;  %s755_s5 = sld [smem:[#allocation2 + $0x1]]  ;;  %s767_s7 = sld [smem:[#allocation6 + $0x2]] }
  0x38   :  { %v92_v57 = vadd.f32 %v90_v47, %v63_v48  ;;  %v166_v58 = vstv %s652_s29  ;;  %v86_v59 = vadd.f32 %v84_v50, %v57_v51  ;;  %v68_v60 = vstv %s657_s3  ;;  %s757_s3 = sld [smem:[#allocation2]]  ;;  %s779_s8 = sld [smem:[#allocation6 + $0x3]] }
  0x39   :  { %v95_v61 = vstv %s659_s6  ;;  %v173_v62 = vmul.f32 %v604_v16, %v172_v52  ;;  %v167_v2 = vmul.f32 %v604_v16, %v166_v58  ;;  %v93_v3 = vadd.f32 %v91_v54, %v64_v53  ;;  %s761_s6 = sld [smem:[#allocation6 + $0x1]] }
  0x3a   :  { %156 = vrot.lane.b32.xlu1 %v151_v12, %s537_s9  ;;  %154 = vrot.lane.b32.xlu0 %v150_v13, %s537_s9  ;;  %v87_v4 = vadd.f32 %v85_v56, %v58_v55  ;;  %v70_v7 = vmul.f32 %v68_v60, %v580_v1  ;;  %v97_v8 = vmul.f32 %v447_v49, %v95_v61  ;;  %v101_v13 = vstv %s668_s10 }
  0x3b   :  { %v96_v9 = vmul.f32 %v446_v43, %v95_v61  ;;  %v69_v11 = vmul.f32 %v68_v60, %v575_v0  ;;  %v275_v48 = vstv %s691_s14  ;;  %v199_v55 = vstv %s696_s15 }
  0x3c   :  { %v281_v61 = vstv %s700_s16 }
  0x3d   :  { %v98_v29 = vadd.f32 %v96_v9, %v69_v11 }
  0x3e   :  { %224 = vrot.lane.b32.xlu1 %v219_v17, %s537_s9  ;;  %222 = vrot.lane.b32.xlu0 %v218_v18, %s537_s9  ;;  %v174_v17 = vmul.f32 %v599_v14, %v172_v52 }
  0x42   :  { %238 = vrot.lane.b32.xlu1 %v233_v20, %s537_s9  ;;  %236 = vrot.lane.b32.xlu0 %v232_v21, %s537_s9  ;;  %v168_v20 = vmul.f32 %v599_v14, %v166_v58  ;;  %v178_v21 = vstv %s673_s11 }
  0x46   :  { %252 = vrot.lane.b32.xlu1 %v247_v23, %s537_s9  ;;  %250 = vrot.lane.b32.xlu0 %v246_v24, %s537_s9  ;;  %v99_v24 = vadd.f32 %v97_v8, %v70_v7  ;;  %v283_v7 = vmul.f32 %v281_v61, %v625_v28  ;;  %v282_v8 = vmul.f32 %v281_v61, %v630_v30 }
  0x4a   :  { %266 = vrot.lane.b32.xlu1 %v261_v26, %s537_s9  ;;  %264 = vrot.lane.b32.xlu0 %v260_v27, %s537_s9  ;;  %v103_v26 = vmul.f32 %v447_v49, %v101_v13 }
  0x4e   :  { %332 = vrot.lane.b32.xlu1 %v327_v31, %s537_s9  ;;  %330 = vrot.lane.b32.xlu0 %v326_v32, %s537_s9  ;;  %v102_v31 = vmul.f32 %v446_v43, %v101_v13 }
  0x52   :  { %346 = vrot.lane.b32.xlu1 %v341_v34, %s537_s9  ;;  %344 = vrot.lane.b32.xlu0 %v340_v35, %s537_s9  ;;  %v180_v34 = vmul.f32 %v599_v14, %v178_v21 }
  0x56   :  { %360 = vrot.lane.b32.xlu1 %v355_v37, %s537_s9  ;;  %358 = vrot.lane.b32.xlu0 %v354_v38, %s537_s9  ;;  %v179_v37 = vmul.f32 %v604_v16, %v178_v21  ;;  %v463_v38 = vld [vmem:[%s842_s1 + $0x70] sm:$0xff] }
  0x57   :  { %v201_v60 = vmul.f32 %v463_v38, %v199_v55 }
  0x5a   :  { %374 = vrot.lane.b32.xlu1 %v369_v40, %s537_s9  ;;  %372 = vrot.lane.b32.xlu0 %v368_v41, %s537_s9  ;;  %s666_s9 = sld [smem:[#allocation4 + $0x1b]]  ;;  %v193_v41 = vstv %s683_s13 }
  0x5b   :  { %v195_v47 = vmul.f32 %v463_v38, %v193_v41  ;;  %v194_v52 = vmul.f32 %v462_v42, %v193_v41 }
  0x60   :  { %v74_v12 = vstv %s666_s9 }
  0x61   :  { %v76_v25 = vmul.f32 %v74_v12, %v580_v1  ;;  %v75_v32 = vmul.f32 %v74_v12, %v575_v0  ;;  %v184_v1 = vstv %s680_s12  ;;  %v287_v12 = vstv %s715_s22 }
  0x62   :  { %v186_v46 = vmul.f32 %v599_v14, %v184_v1  ;;  %v185_v51 = vmul.f32 %v604_v16, %v184_v1  ;;  %v276_v14 = vmul.f32 %v275_v48, %v630_v30 }
  0x63   :  { %v105_v0 = vadd.f32 %v103_v26, %v76_v25  ;;  %v104_v44 = vadd.f32 %v102_v31, %v75_v32  ;;  %v288_v25 = vmul.f32 %v287_v12, %v630_v30  ;;  %v293_v31 = vstv %s724_s2 }
  0xa0   :  { %v127_v63 = vpop.permute.xlu1 %126  ;;  %v113_v6 = vpop.permute.xlu0 %112 }
  0xa1   :  { %v132_v5 = vadd.f32 %v127_v63, %v92_v57  ;;  %v118_v10 = vadd.f32 %v113_v6, %v86_v59  ;;  %v277_v57 = vmul.f32 %v275_v48, %v625_v28 }
  0xa3   :  { %v688_v15 = vadd.f32 %v173_v62, %v132_v5  ;;  %v169_v18 = vadd.f32 %v167_v2, %v118_v10  ;;  %v200_v2 = vmul.f32 %v462_v42, %v199_v55 }
  0xa4   :  { %v129_v19 = vpop.permute.xlu1 %128  ;;  %v115_v23 = vpop.permute.xlu0 %114 }
  0xa5   :  { %v133_v22 = vadd.f32 %v129_v19, %v93_v3  ;;  %v119_v27 = vadd.f32 %v115_v23, %v87_v4  ;;  %v196_v63 = vadd.f32 %v194_v52, %v169_v18  ;;  %v205_v3 = vstv %s707_s19 }
  0xa6   :  { %v207_v11 = vmul.f32 %v463_v38, %v205_v3  ;;  %v202_v18 = vadd.f32 %v200_v2, %v688_v15  ;;  %v206_v19 = vmul.f32 %v462_v42, %v205_v3  ;;  %v381_v52 = vstv %s739_s25 }
  0xa7   :  { %v176_v33 = vadd.f32 %v174_v17, %v133_v22  ;;  %v170_v35 = vadd.f32 %v168_v20, %v119_v27  ;;  %v211_v20 = vstv %s718_s23 }
  0xa8   :  { %v143_v36 = vpop.permute.xlu1 %142  ;;  %v141_v40 = vpop.permute.xlu0 %140 }
  0xa9   :  { %v147_v39 = vadd.f32 %v143_v36, %v99_v24  ;;  %v146_v43 = vadd.f32 %v141_v40, %v98_v29  ;;  %v197_v59 = vadd.f32 %v195_v47, %v170_v35  ;;  %v203_v10 = vadd.f32 %v201_v60, %v176_v33  ;;  %v744_v35 = vld [vmem:[%s842_s1 + $0x51] sm:$0xff] }
  0xaa   :  { %v289_v24 = vmul.f32 %v287_v12, %v625_v28  ;;  %v213_v29 = vmul.f32 %v463_v38, %v211_v20  ;;  %v301_v36 = vstv %s727_s0  ;;  %v752_v38 = vld [vmem:[%s842_s1 + $0x11] sm:$0xff]  ;;  %v295_v40 = vmul.f32 %v293_v31, %v625_v28  ;;  %s765_s1 = sld [smem:[#allocation4 + $0x22]] }
  0xab   :  { %v182_v45 = vadd.f32 %v180_v34, %v147_v39  ;;  %v181_v49 = vadd.f32 %v179_v37, %v146_v43  ;;  %v212_v34 = vmul.f32 %v462_v42, %v211_v20  ;;  %v294_v42 = vmul.f32 %v293_v31, %v630_v30 }
  0xac   :  { %v157_v50 = vpop.permute.xlu1 %156  ;;  %v155_v54 = vpop.permute.xlu0 %154  ;;  %v303_v43 = vmul.f32 %v744_v35, %v301_v36  ;;  %v302_v47 = vmul.f32 %v752_v38, %v301_v36  ;;  %v307_v28 = vstv %s734_s24 }
  0xad   :  { %v161_v53 = vadd.f32 %v157_v50, %v105_v0  ;;  %v160_v56 = vadd.f32 %v155_v54, %v104_v44  ;;  %v209_v27 = vadd.f32 %v207_v11, %v182_v45  ;;  %v208_v33 = vadd.f32 %v206_v19, %v181_v49 }
  0xae   :  { %v412_v50 = vlaneseq  ;;  %v309_v54 = vmul.f32 %v744_v35, %v307_v28 }
  0xaf   :  { %v188_v58 = vadd.f32 %v186_v46, %v161_v53  ;;  %v187_v16 = vadd.f32 %v185_v51, %v160_v56 }
  0xb0   :  { %v225_v62 = vpop.permute.xlu1 %224  ;;  %v223_v5 = vpop.permute.xlu0 %222 }
  0xb1   :  { %v229_v4 = vadd.f32 %v225_v62, %v197_v59  ;;  %v228_v6 = vadd.f32 %v223_v5, %v196_v63  ;;  %v215_v41 = vadd.f32 %v213_v29, %v188_v58  ;;  %v214_v46 = vadd.f32 %v212_v34, %v187_v16 }
  0xb2   :  { %v313_v58 = vstv %s747_s28  ;;  %v413_v59 = vand.u32 127, %v412_v50  ;;  %v422_v16 = vstv %s755_s5  ;;  %v415_v62 = vstv %s757_s3 }
  0xb3   :  { %v279_v9 = vadd.f32 %v277_v57, %v229_v4  ;;  %v278_v13 = vadd.f32 %v276_v14, %v228_v6  ;;  %v308_v14 = vmul.f32 %v752_v38, %v307_v28  ;;  %v389_v4 = vstv %s761_s6 }
  0xb4   :  { %v239_v17 = vpop.permute.xlu1 %238  ;;  %v237_v22 = vpop.permute.xlu0 %236  ;;  %v315_v5 = vmul.f32 %v744_v35, %v313_v58  ;;  %vm781_vm0 = vcmp.ge.s32.totalorder %v413_v59, %v422_v16  ;;  %vm785_vm2 = vcmp.ge.s32.totalorder %v413_v59, %v415_v62 }
  0xb5   :  { %v243_v21 = vadd.f32 %v239_v17, %v203_v10  ;;  %v242_v23 = vadd.f32 %v237_v22, %v202_v18  ;;  %v305_v53 = vadd.f32 %v303_v43, %v279_v9  ;;  %v304_v57 = vadd.f32 %v302_v47, %v278_v13 }
  0xb6   :  { %v314_v9 = vmul.f32 %v752_v38, %v313_v58  ;;  %v319_v10 = vstv %s765_s1 }
  0xb7   :  { %v285_v26 = vadd.f32 %v283_v7, %v243_v21  ;;  %v284_v32 = vadd.f32 %v282_v8, %v242_v23  ;;  %v397_v21 = vstv %s767_s7 }
  0xb8   :  { %v253_v15 = vpop.permute.xlu1 %252  ;;  %v251_v1 = vpop.permute.xlu0 %250 }
  0xb9   :  { %v257_v37 = vadd.f32 %v253_v15, %v209_v27  ;;  %v256_v39 = vadd.f32 %v251_v1, %v208_v33  ;;  %v311_v3 = vadd.f32 %v309_v54, %v285_v26  ;;  %v310_v8 = vadd.f32 %v308_v14, %v284_v32 }
  0xba   :  { %v320_v32 = vmul.f32 %v752_v38, %v319_v10 }
  0xbb   :  { %v291_v0 = vadd.f32 %v289_v24, %v257_v37  ;;  %v290_v44 = vadd.f32 %v288_v25, %v256_v39  ;;  %v321_v25 = vmul.f32 %v744_v35, %v319_v10 }
  0xbc   :  { %v267_v45 = vpop.permute.xlu1 %266  ;;  %v265_v49 = vpop.permute.xlu0 %264 }
  0xbd   :  { %v271_v48 = vadd.f32 %v267_v45, %v215_v41  ;;  %v270_v51 = vadd.f32 %v265_v49, %v214_v46  ;;  %v317_v24 = vadd.f32 %v315_v5, %v291_v0  ;;  %v316_v31 = vadd.f32 %v314_v9, %v290_v44 }
  0xbf   :  { %v297_v30 = vadd.f32 %v295_v40, %v271_v48  ;;  %v296_v55 = vadd.f32 %v294_v42, %v270_v51  ;;  %v405_v42 = vstv %s779_s8 }
  0xc0   :  { %v333_v56 = vpop.permute.xlu1 %332  ;;  %v331_v61 = vpop.permute.xlu0 %330 }
  0xc1   :  { %v337_v60 = vadd.f32 %v333_v56, %v305_v53  ;;  %v336_v63 = vadd.f32 %v331_v61, %v304_v57  ;;  %v323_v40 = vadd.f32 %v321_v25, %v297_v30  ;;  %v322_v44 = vadd.f32 %v320_v32, %v296_v55 }
  0xc3   :  { %v383_v2 = vadd.f32 %v381_v52, %v337_v60  ;;  %v382_v6 = vadd.f32 %v381_v52, %v336_v63 }
  0xc4   :  { %v347_v7 = vpop.permute.xlu1 %346  ;;  %v345_v17 = vpop.permute.xlu0 %344 }
  0xc5   :  { %v385_v12 = vmax.f32 %v383_v2, 0.0  ;;  %v351_v13 = vadd.f32 %v347_v7, %v311_v3  ;;  %v384_v19 = vmax.f32 %v382_v6, 0.0  ;;  %v350_v20 = vadd.f32 %v345_v17, %v310_v8 }
  0xc7   :  { %v387_v22 = vmin.f32 %v385_v12, 20.0  ;;  %v391_v23 = vadd.f32 %v389_v4, %v351_v13  ;;  %v386_v26 = vmin.f32 %v384_v19, 20.0  ;;  %v390_v27 = vadd.f32 %v389_v4, %v350_v20 }
  0xc8   :  { %v361_v29 = vpop.permute.xlu1 %360  ;;  %v359_v36 = vpop.permute.xlu0 %358 }
  0xc9   :  { %v424_v15 = vsel %vm781_vm0, 0.0, %v387_v22  ;;  %v393_v33 = vmax.f32 %v391_v23, 0.0  ;;  %v365_v34 = vadd.f32 %v361_v29, %v317_v24  ;;  %v417_v35 = vsel %vm785_vm2, 0.0, %v386_v26 }
  0xca   :  { %433 = vst.msk [vmem:[%s845_s4 + $0x20] sm:$0xff] %vm428_vm1, %v424_v15  ;;  %v392_v37 = vmax.f32 %v390_v27, 0.0  ;;  %v364_v1 = vadd.f32 %v359_v36, %v316_v31  ;;  %429 = vst.msk [vmem:[%s845_s4] sm:$0xff] %vm428_vm1, %v417_v35 }
  0xcb   :  { %v395_v38 = vmin.f32 %v393_v33, 20.0  ;;  %v399_v39 = vadd.f32 %v397_v21, %v365_v34 }
  0xcc   :  { %v394_v0 = vmin.f32 %v392_v37, 20.0  ;;  %v398_v41 = vadd.f32 %v397_v21, %v364_v1  ;;  %v375_v43 = vpop.permute.xlu1 %374  ;;  %v373_v28 = vpop.permute.xlu0 %372 }
  0xcd   :  { %v425_v45 = vsel %vm781_vm0, 0.0, %v395_v38  ;;  %v401_v46 = vmax.f32 %v399_v39, 0.0  ;;  %v379_v47 = vadd.f32 %v375_v43, %v323_v40  ;;  %v378_v50 = vadd.f32 %v373_v28, %v322_v44 }
  0xce   :  { %434 = vst.msk [vmem:[%s845_s4 + $0x28] sm:$0xff] %vm428_vm1, %v425_v45  ;;  %v418_v48 = vsel %vm785_vm2, 0.0, %v394_v0  ;;  %v400_v49 = vmax.f32 %v398_v41, 0.0 }
  0xcf   :  { %430 = vst.msk [vmem:[%s845_s4 + $0x8] sm:$0xff] %vm428_vm1, %v418_v48  ;;  %v403_v51 = vmin.f32 %v401_v46, 20.0  ;;  %v407_v30 = vadd.f32 %v405_v42, %v379_v47  ;;  %v406_v53 = vadd.f32 %v405_v42, %v378_v50 }
  0xd0   :  { %v402_v52 = vmin.f32 %v400_v49, 20.0 }
  0xd1   :  { %v426_v54 = vsel %vm781_vm0, 0.0, %v403_v51  ;;  %v409_v55 = vmax.f32 %v407_v30, 0.0  ;;  %v408_v57 = vmax.f32 %v406_v53, 0.0 }
  0xd2   :  { %435 = vst.msk [vmem:[%s845_s4 + $0x30] sm:$0xff] %vm428_vm1, %v426_v54  ;;  %v419_v56 = vsel %vm785_vm2, 0.0, %v402_v52 }
  0xd3   :  { %431 = vst.msk [vmem:[%s845_s4 + $0x10] sm:$0xff] %vm428_vm1, %v419_v56  ;;  %v411_v14 = vmin.f32 %v409_v55, 20.0  ;;  %v410_v58 = vmin.f32 %v408_v57, 20.0 }
  0xd5   :  { %v427_v59 = vsel %vm781_vm0, 0.0, %v411_v14  ;;  %v420_v60 = vsel %vm785_vm2, 0.0, %v410_v58 }
  0xd6   :  { %436 = vst.msk [vmem:[%s845_s4 + $0x38] sm:$0xff] %vm428_vm1, %v427_v59  ;;  %432 = vst.msk [vmem:[%s845_s4 + $0x18] sm:$0xff] %vm428_vm1, %v420_v60 }
  0xd7   :  { %441 = vsyncpa [#allocation3], 1 }
  0xd8   :  { %442 = vsyncpa [#allocation5], 1 }

// kernel: _lambda_.3
= control target key start
LH: loop header
LB: loop body
LE: loop exit
PB: predicated region body
PF: predicated region fallthrough
CT: control target
= control target key end

     0   :  { %9 = vsyncpa [#allocation5], 0  ;;  %s3889_s0 = inlined_call_operand.vmem [shape: s32[2], index: 0, kind: input, shape index: {}]   ;;  %s3890_s1 = inlined_call_operand.vmem [shape: f32[2,4,8,8], index: 1, kind: input, shape index: {}]   ;;  %s3891_s2 = inlined_call_operand.vmem [shape: f32[144], index: 2, kind: input, shape index: {}]   ;;  %s3892_s3 = inlined_call_operand.vmem [shape: f32[4], index: 3, kind: input, shape index: {}]   ;;  %s3893_s4 = inlined_call_operand.hbm [shape: f32[2,4,4,8], index: 4, kind: output, shape index: {}]  }
   0x1   :  { %10 = vsyncpa [#allocation7], 0  ;;  %s30_s17 = sshll.u32 %s3891_s2, 4  ;;  %s31_s17 = int_to_ptr.vmem [resolvable:$true] %s30_s17 }
   0x2   :  { %11 = vsyncpa [#allocation4], 0  ;;  %s18_s20 = sshll.u32 %s3889_s0, 4  ;;  %s2351_s21 = scalar_lea.vmem %s31_s17, 32  ;;  %s19_s20 = int_to_ptr.vmem [resolvable:$true] %s18_s20 }
   0x3   :  { %p2352_p0 = scmp.ne.s32.totalorder %s31_s17, %s2351_s21  ;;  %p2356_p1 = scmp.lt.s32.totalorder %s31_s17, %s31_s17 }
   0x4   :  { %p2357_p2 = scmp.lt.s32.totalorder %s2351_s21, %s2351_s21 }
   0x6   :  { %p2358_p3 = por %p2357_p2, %p2356_p1 }
   0x8   :  { %p2359_p4 = pnand %p2358_p3, %p2352_p0 }
   0xa   :  { %2362 = shalt.err (!%p2359_p4)
}
   0xb   :  { %s2415_s22 = smov [#allocation6]   ;;  %s2363_s23 = scalar_lea.vmem %s19_s20, 16 }
   0xc   :  { %33 = dma.vmem_to_smem %s31_s17, 32, %s2415_s22, [#allocation7]  }
   0xd   :  { %p2364_p5 = scmp.ne.s32.totalorder %s19_s20, %s2363_s23  ;;  %p2368_p6 = scmp.lt.s32.totalorder %s19_s20, %s19_s20 }
   0xe   :  { %p2369_p7 = scmp.lt.s32.totalorder %s2363_s23, %s2363_s23 }
  0x10   :  { %p2370_p8 = por %p2369_p7, %p2368_p6 }
  0x12   :  { %p2371_p9 = pnand %p2370_p8, %p2364_p5 }
  0x14   :  { %2374 = shalt.err (!%p2371_p9)
}
  0x15   :  { %s2416_s2 = smov [#allocation3]   ;;  %s40_s25 = sshll.u32 %s3892_s3, 4  ;;  %s41_s25 = int_to_ptr.vmem [resolvable:$true] %s40_s25 }
  0x16   :  { %21 = dma.vmem_to_smem %s19_s20, 16, %s2416_s2, [#allocation5]  }
  0x17   :  { %s2375_s26 = scalar_lea.vmem %s41_s25, 16  ;;  %p2380_p11 = scmp.lt.s32.totalorder %s41_s25, %s41_s25 }
  0x18   :  { %p2376_p10 = scmp.ne.s32.totalorder %s41_s25, %s2375_s26  ;;  %p2381_p12 = scmp.lt.s32.totalorder %s2375_s26, %s2375_s26 }
  0x1a   :  { %p2382_p13 = por %p2381_p12, %p2380_p11 }
  0x1c   :  { %p2383_p0 = pnand %p2382_p13, %p2376_p10 }
  0x1e   :  { %2386 = shalt.err (!%p2383_p0)
}
  0x1f   :  { %s2417_s27 = smov [#allocation8]  }
  0x20   :  { %43 = dma.vmem_to_smem %s41_s25, 16, %s2417_s27, [#allocation7]  }
  0x21   :  { %2409 = dma.done.wait [#allocation5], 16  }
  0x22   :  { %2410 = vsyncadd [#allocation5], 4294967280 }
  0x23   :  { %2411 = dma.done.wait [#allocation7], 48  }
  0x24   :  { %2412 = vsyncadd [#allocation7], 4294967248 }
  0x25   :  { %53 = sfence }
  0x26   :  { %v73_v0 = vld [vmem:[%s3890_s1 + $0x10] sm:$0x1]  ;;  %v71_v1 = vld [vmem:[%s3890_s1] sm:$0x1]  ;;  %s2418_s5 = smov 1   ;;  %vm54_vm0 = vcmask 77824  }
  0x27   :  { %91 = vrot.lane.b32.xlu1 %v73_v0, %s2418_s5  ;;  %87 = vrot.lane.b32.xlu0 %v71_v1, %s2418_s5  ;;  %v74_v2 = vld [vmem:[%s3890_s1 + $0x18] sm:$0x1]  ;;  %v72_v3 = vld [vmem:[%s3890_s1 + $0x8] sm:$0x1]  ;;  %v2419_v4 = vmov 0.0   ;;  %vm112_vm1 = vcmask 65544  }
  0x28   :  { %61 = vst.msk [vmem:[#allocation2 + $0x30] sm:$0x1f] %vm54_vm0, %v2419_v4  ;;  %55 = vst.msk [vmem:[#allocation2] sm:$0x1f] %vm54_vm0, %v2419_v4  ;;  %v76_v5 = vld [vmem:[%s3890_s1 + $0x28] sm:$0x1] }
  0x29   :  { %56 = vst.msk [vmem:[#allocation2 + $0x8] sm:$0x1f] %vm54_vm0, %v2419_v4  ;;  %57 = vst.msk [vmem:[#allocation2 + $0x10] sm:$0x1f] %vm54_vm0, %v2419_v4  ;;  %v75_v6 = vld [vmem:[%s3890_s1 + $0x20] sm:$0x1] }
  0x2a   :  { %58 = vst.msk [vmem:[#allocation2 + $0x18] sm:$0x1f] %vm54_vm0, %v2419_v4  ;;  %59 = vst.msk [vmem:[#allocation2 + $0x20] sm:$0x1f] %vm54_vm0, %v2419_v4  ;;  %v78_v7 = vld [vmem:[%s3890_s1 + $0x38] sm:$0x1] }
  0x2b   :  { %60 = vst.msk [vmem:[#allocation2 + $0x28] sm:$0x1f] %vm54_vm0, %v2419_v4  ;;  %62 = vst.msk [vmem:[#allocation2 + $0x38] sm:$0x1f] %vm54_vm0, %v2419_v4  ;;  %93 = vrot.lane.b32.xlu1 %v74_v2, %s2418_s5  ;;  %89 = vrot.lane.b32.xlu0 %v72_v3, %s2418_s5  ;;  %v77_v8 = vld [vmem:[%s3890_s1 + $0x30] sm:$0x1] }
  0x2c   :  { %63 = vst.msk [vmem:[#allocation2 + $0x40] sm:$0x1f] %vm54_vm0, %v2419_v4  ;;  %64 = vst.msk [vmem:[#allocation2 + $0x48] sm:$0x1f] %vm54_vm0, %v2419_v4  ;;  %v122_v9 = vld [vmem:[%s3890_s1 + $0x9] sm:$0x1] }
  0x2d   :  { %65 = vst.msk [vmem:[#allocation2 + $0x50] sm:$0x1f] %vm54_vm0, %v2419_v4  ;;  %66 = vst.msk [vmem:[#allocation2 + $0x58] sm:$0x1f] %vm54_vm0, %v2419_v4  ;;  %v121_v10 = vld [vmem:[%s3890_s1 + $0x1] sm:$0x1] }
  0x2e   :  { %67 = vst.msk [vmem:[#allocation2 + $0x60] sm:$0x1f] %vm54_vm0, %v2419_v4  ;;  %68 = vst.msk [vmem:[#allocation2 + $0x68] sm:$0x1f] %vm54_vm0, %v2419_v4  ;;  %v124_v11 = vld [vmem:[%s3890_s1 + $0x19] sm:$0x1] }
  0x2f   :  { %69 = vst.msk [vmem:[#allocation2 + $0x70] sm:$0x1f] %vm54_vm0, %v2419_v4  ;;  %70 = vst.msk [vmem:[#allocation2 + $0x78] sm:$0x1f] %vm54_vm0, %v2419_v4  ;;  %97 = vrot.lane.b32.xlu1 %v76_v5, %s2418_s5  ;;  %95 = vrot.lane.b32.xlu0 %v75_v6, %s2418_s5  ;;  %v123_v12 = vld [vmem:[%s3890_s1 + $0x11] sm:$0x1] }
  0x30   :  { %v126_v13 = vld [vmem:[%s3890_s1 + $0x29] sm:$0x1]  ;;  %v125_v14 = vld [vmem:[%s3890_s1 + $0x21] sm:$0x1]  ;;  %v128_v15 = vld [vmem:[%s3890_s1 + $0x39] sm:$0x1] }
  0x31   :  { %v127_v16 = vld [vmem:[%s3890_s1 + $0x31] sm:$0x1]  ;;  %v170_v17 = vld [vmem:[%s3890_s1 + $0xa] sm:$0x1]  ;;  %v169_v18 = vld [vmem:[%s3890_s1 + $0x2] sm:$0x1] }
  0x32   :  { %v172_v19 = vld [vmem:[%s3890_s1 + $0x1a] sm:$0x1]  ;;  %v171_v20 = vld [vmem:[%s3890_s1 + $0x12] sm:$0x1]  ;;  %v174_v21 = vld [vmem:[%s3890_s1 + $0x2a] sm:$0x1] }
  0x33   :  { %101 = vrot.lane.b32.xlu1 %v78_v7, %s2418_s5  ;;  %99 = vrot.lane.b32.xlu0 %v77_v8, %s2418_s5  ;;  %v173_v22 = vld [vmem:[%s3890_s1 + $0x22] sm:$0x1]  ;;  %v176_v23 = vld [vmem:[%s3890_s1 + $0x3a] sm:$0x1]  ;;  %s2780_s18 = sld [smem:[#allocation6 + $0x49]]  ;;  %s2788_s19 = sld [smem:[#allocation6 + $0x6d]] }
  0x34   :  { %v175_v24 = vld [vmem:[%s3890_s1 + $0x32] sm:$0x1]  ;;  %v218_v25 = vld [vmem:[%s3890_s1 + $0xb] sm:$0x1]  ;;  %v217_v26 = vld [vmem:[%s3890_s1 + $0x3] sm:$0x1] }
  0x35   :  { %v220_v27 = vld [vmem:[%s3890_s1 + $0x1b] sm:$0x1]  ;;  %v219_v28 = vld [vmem:[%s3890_s1 + $0x13] sm:$0x1]  ;;  %v222_v29 = vld [vmem:[%s3890_s1 + $0x2b] sm:$0x1] }
  0x36   :  { %v221_v30 = vld [vmem:[%s3890_s1 + $0x23] sm:$0x1]  ;;  %v224_v31 = vld [vmem:[%s3890_s1 + $0x3b] sm:$0x1]  ;;  %v223_v32 = vld [vmem:[%s3890_s1 + $0x33] sm:$0x1] }
  0x37   :  { %139 = vrot.lane.b32.xlu1 %v122_v9, %s2418_s5  ;;  %137 = vrot.lane.b32.xlu0 %v121_v10, %s2418_s5  ;;  %v266_v33 = vld [vmem:[%s3890_s1 + $0xc] sm:$0x1]  ;;  %v265_v34 = vld [vmem:[%s3890_s1 + $0x4] sm:$0x1]  ;;  %s2420_s20 = smov 127   ;;  %s2795_s21 = sld [smem:[#allocation6 + $0x2]] }
  0x38   :  { %v268_v35 = vld [vmem:[%s3890_s1 + $0x1c] sm:$0x1]  ;;  %v267_v36 = vld [vmem:[%s3890_s1 + $0x14] sm:$0x1]  ;;  %v270_v37 = vld [vmem:[%s3890_s1 + $0x2c] sm:$0x1] }
  0x39   :  { %v269_v38 = vld [vmem:[%s3890_s1 + $0x24] sm:$0x1]  ;;  %v272_v39 = vld [vmem:[%s3890_s1 + $0x3c] sm:$0x1]  ;;  %v271_v40 = vld [vmem:[%s3890_s1 + $0x34] sm:$0x1] }
  0x3a   :  { %v314_v41 = vld [vmem:[%s3890_s1 + $0xd] sm:$0x1]  ;;  %v313_v42 = vld [vmem:[%s3890_s1 + $0x5] sm:$0x1]  ;;  %v316_v43 = vld [vmem:[%s3890_s1 + $0x1d] sm:$0x1] }
  0x3b   :  { %143 = vrot.lane.b32.xlu1 %v124_v11, %s2418_s5  ;;  %141 = vrot.lane.b32.xlu0 %v123_v12, %s2418_s5  ;;  %v315_v44 = vld [vmem:[%s3890_s1 + $0x15] sm:$0x1]  ;;  %v318_v45 = vld [vmem:[%s3890_s1 + $0x2d] sm:$0x1]  ;;  %s2805_s22 = sld [smem:[#allocation6 + $0x26]]  ;;  %s2814_s23 = sld [smem:[#allocation6 + $0x4a]] }
  0x3c   :  { %v317_v46 = vld [vmem:[%s3890_s1 + $0x25] sm:$0x1]  ;;  %v320_v47 = vld [vmem:[%s3890_s1 + $0x3d] sm:$0x1]  ;;  %v319_v48 = vld [vmem:[%s3890_s1 + $0x35] sm:$0x1] }
  0x3d   :  { %v362_v49 = vld [vmem:[%s3890_s1 + $0xe] sm:$0x1]  ;;  %v361_v50 = vld [vmem:[%s3890_s1 + $0x6] sm:$0x1]  ;;  %v364_v51 = vld [vmem:[%s3890_s1 + $0x1e] sm:$0x1] }
  0x3e   :  { %v363_v52 = vld [vmem:[%s3890_s1 + $0x16] sm:$0x1]  ;;  %v366_v53 = vld [vmem:[%s3890_s1 + $0x2e] sm:$0x1]  ;;  %v365_v54 = vld [vmem:[%s3890_s1 + $0x26] sm:$0x1] }
  0x3f   :  { %147 = vrot.lane.b32.xlu1 %v126_v13, %s2418_s5  ;;  %145 = vrot.lane.b32.xlu0 %v125_v14, %s2418_s5  ;;  %v368_v55 = vld [vmem:[%s3890_s1 + $0x3e] sm:$0x1]  ;;  %v367_v56 = vld [vmem:[%s3890_s1 + $0x36] sm:$0x1]  ;;  %s2823_s2 = sld [smem:[#allocation6 + $0x6e]]  ;;  %s2421_s0 = smov 126  }
  0x40   :  { %v410_v57 = vld [vmem:[%s3890_s1 + $0xf] sm:$0x1]  ;;  %v409_v58 = vld [vmem:[%s3890_s1 + $0x7] sm:$0x1]  ;;  %v412_v59 = vld [vmem:[%s3890_s1 + $0x1f] sm:$0x1] }
  0x41   :  { %v411_v60 = vld [vmem:[%s3890_s1 + $0x17] sm:$0x1]  ;;  %v414_v63 = vld [vmem:[%s3890_s1 + $0x2f] sm:$0x1]  ;;  %v413_v0 = vld [vmem:[%s3890_s1 + $0x27] sm:$0x1] }
  0x42   :  { %v416_v3 = vld [vmem:[%s3890_s1 + $0x3f] sm:$0x1]  ;;  %v415_v4 = vld [vmem:[%s3890_s1 + $0x37] sm:$0x1]  ;;  %s2771_s1 = sld [smem:[#allocation6 + $0x1]]  ;;  %s2832_s24 = sld [smem:[#allocation6 + $0x4]] }
  0x43   :  { %151 = vrot.lane.b32.xlu1 %v128_v15, %s2418_s5  ;;  %149 = vrot.lane.b32.xlu0 %v127_v16, %s2418_s5  ;;  %s2841_s25 = sld [smem:[#allocation6 + $0x28]]  ;;  %s2852_s26 = sld [smem:[#allocation6 + $0x4c]]  ;;  %vm2167_vm3 = vcmask 60416  }
  0x44   :  { %s2861_s27 = sld [smem:[#allocation6 + $0x70]]  ;;  %s2213_s28 = sld [smem:[#allocation6 + $0x5]] }
  0x45   :  { %s2214_s29 = sld [smem:[#allocation6 + $0x29]]  ;;  %s2215_s3 = sld [smem:[#allocation6 + $0x4d]] }
  0x46   :  { %s2216_s30 = sld [smem:[#allocation6 + $0x71]]  ;;  %s2221_s6 = sld [smem:[#allocation6 + $0x7]] }
  0x47   :  { %187 = vrot.lane.b32.xlu1 %v170_v17, %s2418_s5  ;;  %185 = vrot.lane.b32.xlu0 %v169_v18, %s2418_s5  ;;  %s2222_s7 = sld [smem:[#allocation6 + $0x2b]]  ;;  %s2223_s8 = sld [smem:[#allocation6 + $0x4f]] }
  0x48   :  { %s2224_s9 = sld [smem:[#allocation6 + $0x73]]  ;;  %s2225_s10 = sld [smem:[#allocation6 + $0x8]] }
  0x49   :  { %s2226_s11 = sld [smem:[#allocation6 + $0x2c]]  ;;  %s2227_s12 = sld [smem:[#allocation6 + $0x50]] }
  0x4a   :  { %s2228_s13 = sld [smem:[#allocation6 + $0x74]]  ;;  %s2233_s14 = sld [smem:[#allocation6 + $0xa]] }
  0x4b   :  { %191 = vrot.lane.b32.xlu1 %v172_v19, %s2418_s5  ;;  %189 = vrot.lane.b32.xlu0 %v171_v20, %s2418_s5  ;;  %s2234_s15 = sld [smem:[#allocation6 + $0x2e]]  ;;  %s2235_s16 = sld [smem:[#allocation6 + $0x52]] }
  0x4c   :  { %s2236_s17 = sld [smem:[#allocation6 + $0x76]] }
  0x4f   :  { %195 = vrot.lane.b32.xlu1 %v174_v21, %s2418_s5  ;;  %193 = vrot.lane.b32.xlu0 %v173_v22, %s2418_s5 }
  0x53   :  { %199 = vrot.lane.b32.xlu1 %v176_v23, %s2418_s5  ;;  %197 = vrot.lane.b32.xlu0 %v175_v24, %s2418_s5 }
  0x57   :  { %235 = vrot.lane.b32.xlu1 %v218_v25, %s2418_s5  ;;  %233 = vrot.lane.b32.xlu0 %v217_v26, %s2418_s5 }
  0x5b   :  { %239 = vrot.lane.b32.xlu1 %v220_v27, %s2418_s5  ;;  %237 = vrot.lane.b32.xlu0 %v219_v28, %s2418_s5 }
  0x5f   :  { %243 = vrot.lane.b32.xlu1 %v222_v29, %s2418_s5  ;;  %241 = vrot.lane.b32.xlu0 %v221_v30, %s2418_s5 }
  0x63   :  { %247 = vrot.lane.b32.xlu1 %v224_v31, %s2418_s5  ;;  %245 = vrot.lane.b32.xlu0 %v223_v32, %s2418_s5 }
  0x67   :  { %283 = vrot.lane.b32.xlu1 %v266_v33, %s2418_s5  ;;  %281 = vrot.lane.b32.xlu0 %v265_v34, %s2418_s5 }
  0x6b   :  { %287 = vrot.lane.b32.xlu1 %v268_v35, %s2418_s5  ;;  %285 = vrot.lane.b32.xlu0 %v267_v36, %s2418_s5 }
  0x6f   :  { %291 = vrot.lane.b32.xlu1 %v270_v37, %s2418_s5  ;;  %289 = vrot.lane.b32.xlu0 %v269_v38, %s2418_s5 }
  0x73   :  { %295 = vrot.lane.b32.xlu1 %v272_v39, %s2418_s5  ;;  %293 = vrot.lane.b32.xlu0 %v271_v40, %s2418_s5 }
  0x77   :  { %331 = vrot.lane.b32.xlu1 %v314_v41, %s2418_s5  ;;  %329 = vrot.lane.b32.xlu0 %v313_v42, %s2418_s5 }
  0x7b   :  { %335 = vrot.lane.b32.xlu1 %v316_v43, %s2418_s5  ;;  %333 = vrot.lane.b32.xlu0 %v315_v44, %s2418_s5 }
  0x7f   :  { %339 = vrot.lane.b32.xlu1 %v318_v45, %s2418_s5  ;;  %337 = vrot.lane.b32.xlu0 %v317_v46, %s2418_s5  ;;  %v484_v45 = vstv %s2771_s1  ;;  %s2237_s1 = sld [smem:[#allocation6 + $0xb]] }
  0x83   :  { %343 = vrot.lane.b32.xlu1 %v320_v47, %s2418_s5  ;;  %341 = vrot.lane.b32.xlu0 %v319_v48, %s2418_s5 }
  0x87   :  { %379 = vrot.lane.b32.xlu1 %v362_v49, %s2418_s5  ;;  %377 = vrot.lane.b32.xlu0 %v361_v50, %s2418_s5 }
  0x8b   :  { %383 = vrot.lane.b32.xlu1 %v364_v51, %s2418_s5  ;;  %381 = vrot.lane.b32.xlu0 %v363_v52, %s2418_s5 }
  0x8f   :  { %387 = vrot.lane.b32.xlu1 %v366_v53, %s2418_s5  ;;  %385 = vrot.lane.b32.xlu0 %v365_v54, %s2418_s5  ;;  %v512_v54 = vstv %s2780_s18  ;;  %s2955_s18 = sld [smem:[#allocation6 + $0x53]] }
  0x93   :  { %391 = vrot.lane.b32.xlu1 %v368_v55, %s2418_s5  ;;  %389 = vrot.lane.b32.xlu0 %v367_v56, %s2418_s5 }
  0x97   :  { %427 = vrot.lane.b32.xlu1 %v410_v57, %s2418_s5  ;;  %425 = vrot.lane.b32.xlu0 %v409_v58, %s2418_s5 }
  0x99   :  { %v92_v61 = vpop.permute.xlu1 %91  ;;  %v88_v62 = vpop.permute.xlu0 %87 }
  0x9a   :  { %115 = vst.msk [vmem:[#allocation2 + $0x30] sm:$0x1] %vm112_vm1, %v92_v61  ;;  %113 = vst.msk [vmem:[#allocation2 + $0x20] sm:$0x1] %vm112_vm1, %v88_v62 }
  0x9b   :  { %431 = vrot.lane.b32.xlu1 %v412_v59, %s2418_s5  ;;  %429 = vrot.lane.b32.xlu0 %v411_v60, %s2418_s5  ;;  %v526_v60 = vstv %s2788_s19  ;;  %s2962_s19 = sld [smem:[#allocation6 + $0x77]] }
  0x9d   :  { %v94_v1 = vpop.permute.xlu1 %93  ;;  %v90_v2 = vpop.permute.xlu0 %89 }
  0x9e   :  { %116 = vst.msk [vmem:[#allocation2 + $0x38] sm:$0x1] %vm112_vm1, %v94_v1  ;;  %114 = vst.msk [vmem:[#allocation2 + $0x28] sm:$0x1] %vm112_vm1, %v90_v2  ;;  %v540_v1 = vstv %s2795_s21  ;;  %s2969_s21 = sld [smem:[#allocation6 + $0xd]] }
  0x9f   :  { %435 = vrot.lane.b32.xlu1 %v414_v63, %s2418_s5  ;;  %433 = vrot.lane.b32.xlu0 %v413_v0, %s2418_s5 }
  0xa1   :  { %v98_v5 = vpop.permute.xlu1 %97  ;;  %v96_v6 = vpop.permute.xlu0 %95 }
  0xa2   :  { %118 = vst.msk [vmem:[#allocation2 + $0x68] sm:$0x1] %vm112_vm1, %v98_v5  ;;  %117 = vst.msk [vmem:[#allocation2 + $0x60] sm:$0x1] %vm112_vm1, %v96_v6  ;;  %v554_v6 = vstv %s2805_s22  ;;  %s2971_s22 = sld [smem:[#allocation6]] }
  0xa3   :  { %439 = vrot.lane.b32.xlu1 %v416_v3, %s2418_s5  ;;  %437 = vrot.lane.b32.xlu0 %v415_v4, %s2418_s5  ;;  %s2775_s5 = sld [smem:[#allocation6 + $0x25]] }
  0xa5   :  { %v102_v7 = vpop.permute.xlu1 %101  ;;  %v100_v8 = vpop.permute.xlu0 %99 }
  0xa6   :  { %120 = vst.msk [vmem:[#allocation2 + $0x78] sm:$0x1] %vm112_vm1, %v102_v7  ;;  %119 = vst.msk [vmem:[#allocation2 + $0x70] sm:$0x1] %vm112_vm1, %v100_v8 }
  0xa9   :  { %v140_v9 = vpop.permute.xlu1 %139  ;;  %v138_v10 = vpop.permute.xlu0 %137  ;;  %v498_v50 = vstv %s2775_s5  ;;  %s2949_s5 = sld [smem:[#allocation6 + $0x2f]] }
  0xaa   :  { %162 = vst.msk [vmem:[#allocation2 + $0x9] sm:$0x1] %vm112_vm1, %v140_v9  ;;  %161 = vst.msk [vmem:[#allocation2 + $0x1] sm:$0x1] %vm112_vm1, %v138_v10 }
  0xad   :  { %v144_v11 = vpop.permute.xlu1 %143  ;;  %v142_v12 = vpop.permute.xlu0 %141 }
  0xae   :  { %164 = vst.msk [vmem:[#allocation2 + $0x19] sm:$0x1] %vm112_vm1, %v144_v11  ;;  %163 = vst.msk [vmem:[#allocation2 + $0x11] sm:$0x1] %vm112_vm1, %v142_v12  ;;  %v568_v11 = vstv %s2814_s23  ;;  %s2978_s23 = sld [smem:[#allocation6 + $0x31]] }
  0xb1   :  { %v148_v13 = vpop.permute.xlu1 %147  ;;  %v146_v14 = vpop.permute.xlu0 %145 }
  0xb2   :  { %166 = vst.msk [vmem:[#allocation2 + $0x49] sm:$0x1] %vm112_vm1, %v148_v13  ;;  %165 = vst.msk [vmem:[#allocation2 + $0x41] sm:$0x1] %vm112_vm1, %v146_v14 }
  0xb5   :  { %v152_v15 = vpop.permute.xlu1 %151  ;;  %v150_v16 = vpop.permute.xlu0 %149 }
  0xb6   :  { %168 = vst.msk [vmem:[#allocation2 + $0x59] sm:$0x1] %vm112_vm1, %v152_v15  ;;  %167 = vst.msk [vmem:[#allocation2 + $0x51] sm:$0x1] %vm112_vm1, %v150_v16  ;;  %v582_v16 = vstv %s2823_s2  ;;  %s2980_s2 = sld [smem:[#allocation6 + $0x24]] }
  0xb9   :  { %v188_v17 = vpop.permute.xlu1 %187  ;;  %v186_v18 = vpop.permute.xlu0 %185 }
  0xba   :  { %210 = vst.msk [vmem:[#allocation2 + $0x29] sm:$0x1] %vm112_vm1, %v188_v17  ;;  %209 = vst.msk [vmem:[#allocation2 + $0x21] sm:$0x1] %vm112_vm1, %v186_v18 }
  0xbd   :  { %v192_v19 = vpop.permute.xlu1 %191  ;;  %v190_v20 = vpop.permute.xlu0 %189 }
  0xbe   :  { %212 = vst.msk [vmem:[#allocation2 + $0x39] sm:$0x1] %vm112_vm1, %v192_v19  ;;  %211 = vst.msk [vmem:[#allocation2 + $0x31] sm:$0x1] %vm112_vm1, %v190_v20 }
  0xc1   :  { %v196_v21 = vpop.permute.xlu1 %195  ;;  %v194_v22 = vpop.permute.xlu0 %193 }
  0xc2   :  { %214 = vst.msk [vmem:[#allocation2 + $0x69] sm:$0x1] %vm112_vm1, %v196_v21  ;;  %213 = vst.msk [vmem:[#allocation2 + $0x61] sm:$0x1] %vm112_vm1, %v194_v22  ;;  %v622_v22 = vstv %s2832_s24  ;;  %s2984_s24 = sld [smem:[#allocation6 + $0x3]] }
  0xc5   :  { %v200_v23 = vpop.permute.xlu1 %199  ;;  %v198_v24 = vpop.permute.xlu0 %197 }
  0xc6   :  { %216 = vst.msk [vmem:[#allocation2 + $0x79] sm:$0x1] %vm112_vm1, %v200_v23  ;;  %215 = vst.msk [vmem:[#allocation2 + $0x71] sm:$0x1] %vm112_vm1, %v198_v24 }
  0xc9   :  { %v236_v25 = vpop.permute.xlu1 %235  ;;  %v234_v26 = vpop.permute.xlu0 %233 }
  0xca   :  { %258 = vst.msk [vmem:[#allocation2 + $0xa] sm:$0x1] %vm112_vm1, %v236_v25  ;;  %257 = vst.msk [vmem:[#allocation2 + $0x2] sm:$0x1] %vm112_vm1, %v234_v26 }
  0xcd   :  { %v240_v27 = vpop.permute.xlu1 %239  ;;  %v238_v28 = vpop.permute.xlu0 %237 }
  0xce   :  { %260 = vst.msk [vmem:[#allocation2 + $0x1a] sm:$0x1] %vm112_vm1, %v240_v27  ;;  %259 = vst.msk [vmem:[#allocation2 + $0x12] sm:$0x1] %vm112_vm1, %v238_v28  ;;  %v636_v27 = vstv %s2841_s25  ;;  %s2991_s25 = sld [smem:[#allocation6 + $0x55]] }
  0xd1   :  { %v244_v29 = vpop.permute.xlu1 %243  ;;  %v242_v30 = vpop.permute.xlu0 %241 }
  0xd2   :  { %262 = vst.msk [vmem:[#allocation2 + $0x4a] sm:$0x1] %vm112_vm1, %v244_v29  ;;  %261 = vst.msk [vmem:[#allocation2 + $0x42] sm:$0x1] %vm112_vm1, %v242_v30 }
  0xd5   :  { %v248_v31 = vpop.permute.xlu1 %247  ;;  %v246_v32 = vpop.permute.xlu0 %245 }
  0xd6   :  { %264 = vst.msk [vmem:[#allocation2 + $0x5a] sm:$0x1] %vm112_vm1, %v248_v31  ;;  %263 = vst.msk [vmem:[#allocation2 + $0x52] sm:$0x1] %vm112_vm1, %v246_v32 }
  0xd9   :  { %v284_v33 = vpop.permute.xlu1 %283  ;;  %v282_v34 = vpop.permute.xlu0 %281 }
  0xda   :  { %306 = vst.msk [vmem:[#allocation2 + $0x2a] sm:$0x1] %vm112_vm1, %v284_v33  ;;  %305 = vst.msk [vmem:[#allocation2 + $0x22] sm:$0x1] %vm112_vm1, %v282_v34  ;;  %v650_v33 = vstv %s2852_s26  ;;  %s2994_s26 = sld [smem:[#allocation6 + $0x48]] }
  0xdd   :  { %v288_v35 = vpop.permute.xlu1 %287  ;;  %v286_v36 = vpop.permute.xlu0 %285 }
  0xde   :  { %308 = vst.msk [vmem:[#allocation2 + $0x3a] sm:$0x1] %vm112_vm1, %v288_v35  ;;  %307 = vst.msk [vmem:[#allocation2 + $0x32] sm:$0x1] %vm112_vm1, %v286_v36  ;;  %v664_v36 = vstv %s2861_s27  ;;  %s2998_s27 = sld [smem:[#allocation6 + $0x27]] }
  0xe1   :  { %v292_v37 = vpop.permute.xlu1 %291  ;;  %v290_v38 = vpop.permute.xlu0 %289 }
  0xe2   :  { %310 = vst.msk [vmem:[#allocation2 + $0x6a] sm:$0x1] %vm112_vm1, %v292_v37  ;;  %309 = vst.msk [vmem:[#allocation2 + $0x62] sm:$0x1] %vm112_vm1, %v290_v38 }
  0xe5   :  { %v296_v39 = vpop.permute.xlu1 %295  ;;  %v294_v40 = vpop.permute.xlu0 %293 }
  0xe6   :  { %312 = vst.msk [vmem:[#allocation2 + $0x7a] sm:$0x1] %vm112_vm1, %v296_v39  ;;  %311 = vst.msk [vmem:[#allocation2 + $0x72] sm:$0x1] %vm112_vm1, %v294_v40  ;;  %v678_v39 = vstv %s2213_s28  ;;  %s3002_s28 = sld [smem:[#allocation6 + $0x6c]] }
  0xe9   :  { %v332_v41 = vpop.permute.xlu1 %331  ;;  %v330_v42 = vpop.permute.xlu0 %329 }
  0xea   :  { %354 = vst.msk [vmem:[#allocation2 + $0xb] sm:$0x1] %vm112_vm1, %v332_v41  ;;  %353 = vst.msk [vmem:[#allocation2 + $0x3] sm:$0x1] %vm112_vm1, %v330_v42  ;;  %v692_v42 = vstv %s2214_s29  ;;  %s3006_s29 = sld [smem:[#allocation6 + $0x79]] }
  0xed   :  { %v336_v43 = vpop.permute.xlu1 %335  ;;  %v334_v44 = vpop.permute.xlu0 %333 }
  0xee   :  { %356 = vst.msk [vmem:[#allocation2 + $0x1b] sm:$0x1] %vm112_vm1, %v336_v43  ;;  %355 = vst.msk [vmem:[#allocation2 + $0x13] sm:$0x1] %vm112_vm1, %v334_v44 }
  0xf1   :  { %v2782_v46 = vld [vmem:[#allocation2] sm:$0xf]  ;;  %v340_v47 = vpop.permute.xlu1 %339  ;;  %v338_v48 = vpop.permute.xlu0 %337 }
  0xf2   :  { %358 = vst.msk [vmem:[#allocation2 + $0x4b] sm:$0x1] %vm112_vm1, %v340_v47  ;;  %357 = vst.msk [vmem:[#allocation2 + $0x43] sm:$0x1] %vm112_vm1, %v338_v48  ;;  %v485_v49 = vmul.f32 %v484_v45, %v2782_v46  ;;  %v499_v53 = vmul.f32 %v498_v50, %v2782_v46  ;;  %v513_v59 = vmul.f32 %v512_v54, %v2782_v46 }
  0xf3   :  { %v527_v0 = vmul.f32 %v526_v60, %v2782_v46  ;;  %v541_v5 = vmul.f32 %v540_v1, %v2782_v46  ;;  %v555_v10 = vmul.f32 %v554_v6, %v2782_v46  ;;  %v569_v15 = vmul.f32 %v568_v11, %v2782_v46 }
  0xf4   :  { %489 = vrot.lane.b32.xlu0 %v485_v49, %s2420_s20  ;;  %v583_v20 = vmul.f32 %v582_v16, %v2782_v46  ;;  %v720_v49 = vstv %s2216_s30  ;;  %s3016_s30 = sld [smem:[#allocation6 + $0xe]] }
  0xf5   :  { %v344_v51 = vpop.permute.xlu1 %343  ;;  %v342_v52 = vpop.permute.xlu0 %341 }
  0xf6   :  { %360 = vst.msk [vmem:[#allocation2 + $0x5b] sm:$0x1] %vm112_vm1, %v344_v51  ;;  %359 = vst.msk [vmem:[#allocation2 + $0x53] sm:$0x1] %vm112_vm1, %v342_v52 }
  0xf8   :  { %503 = vrot.lane.b32.xlu0 %v499_v53, %s2420_s20  ;;  %v760_v53 = vstv %s2221_s6  ;;  %s3031_s6 = sld [smem:[#allocation6 + $0x6f]] }
  0xf9   :  { %v2798_v55 = vld [vmem:[#allocation2 + $0x40] sm:$0xf]  ;;  %v380_v56 = vpop.permute.xlu1 %379  ;;  %v378_v57 = vpop.permute.xlu0 %377 }
  0xfa   :  { %402 = vst.msk [vmem:[#allocation2 + $0x2b] sm:$0x1] %vm112_vm1, %v380_v56  ;;  %401 = vst.msk [vmem:[#allocation2 + $0x23] sm:$0x1] %vm112_vm1, %v378_v57  ;;  %v486_v58 = vmul.f32 %v484_v45, %v2798_v55  ;;  %v500_v63 = vmul.f32 %v498_v50, %v2798_v55  ;;  %v514_v4 = vmul.f32 %v512_v54, %v2798_v55  ;;  %v706_v45 = vstv %s2215_s3  ;;  %s3014_s3 = sld [smem:[#allocation6 + $0x4b]] }
  0xfb   :  { %v528_v9 = vmul.f32 %v526_v60, %v2798_v55  ;;  %v542_v14 = vmul.f32 %v540_v1, %v2798_v55  ;;  %v556_v19 = vmul.f32 %v554_v6, %v2798_v55  ;;  %v570_v25 = vmul.f32 %v568_v11, %v2798_v55 }
  0xfc   :  { %491 = vrot.lane.b32.xlu1 %v486_v58, %s2420_s20  ;;  %517 = vrot.lane.b32.xlu0 %v513_v59, %s2420_s20  ;;  %v584_v30 = vmul.f32 %v582_v16, %v2798_v55  ;;  %v774_v57 = vstv %s2222_s7  ;;  %v830_v6 = vstv %s2226_s11  ;;  %s3039_s7 = sld [smem:[#allocation6 + $0x32]]  ;;  %s3095_s11 = sld [smem:[#allocation6 + $0x34]] }
  0xfd   :  { %v384_v61 = vpop.permute.xlu1 %383  ;;  %v382_v62 = vpop.permute.xlu0 %381  ;;  %v899_v16 = vstv %s2233_s14  ;;  %s3113_s14 = sld [smem:[#allocation6 + $0x2a]] }
  0xfe   :  { %404 = vst.msk [vmem:[#allocation2 + $0x3b] sm:$0x1] %vm112_vm1, %v384_v61  ;;  %403 = vst.msk [vmem:[#allocation2 + $0x33] sm:$0x1] %vm112_vm1, %v382_v62  ;;  %v788_v61 = vstv %s2223_s8  ;;  %s3054_s8 = sld [smem:[#allocation6 + $0x56]] }
 0x100   :  { %505 = vrot.lane.b32.xlu1 %v500_v63, %s2420_s20  ;;  %531 = vrot.lane.b32.xlu0 %v527_v0, %s2420_s20  ;;  %v802_v0 = vstv %s2224_s9  ;;  %s3070_s9 = sld [smem:[#allocation6 + $0x7a]] }
 0x101   :  { %v388_v2 = vpop.permute.xlu1 %387  ;;  %v386_v3 = vpop.permute.xlu0 %385  ;;  %v2849_v21 = vld [vmem:[#allocation2 + $0x20] sm:$0xf] }
 0x102   :  { %406 = vst.msk [vmem:[#allocation2 + $0x6b] sm:$0x1] %vm112_vm1, %v388_v2  ;;  %405 = vst.msk [vmem:[#allocation2 + $0x63] sm:$0x1] %vm112_vm1, %v386_v3  ;;  %v623_v26 = vmul.f32 %v622_v22, %v2849_v21  ;;  %v637_v31 = vmul.f32 %v636_v27, %v2849_v21  ;;  %v651_v35 = vmul.f32 %v650_v33, %v2849_v21  ;;  %v816_v3 = vstv %s2225_s10  ;;  %s3085_s10 = sld [smem:[#allocation6 + $0x10]] }
 0x103   :  { %v665_v38 = vmul.f32 %v664_v36, %v2849_v21  ;;  %v679_v41 = vmul.f32 %v678_v39, %v2849_v21  ;;  %v693_v44 = vmul.f32 %v692_v42, %v2849_v21  ;;  %v707_v48 = vmul.f32 %v706_v45, %v2849_v21 }
 0x104   :  { %519 = vrot.lane.b32.xlu1 %v514_v4, %s2420_s20  ;;  %545 = vrot.lane.b32.xlu0 %v541_v5, %s2421_s0  ;;  %v721_v51 = vmul.f32 %v720_v49, %v2849_v21 }
 0x105   :  { %v392_v7 = vpop.permute.xlu1 %391  ;;  %v390_v8 = vpop.permute.xlu0 %389 }
 0x106   :  { %408 = vst.msk [vmem:[#allocation2 + $0x7b] sm:$0x1] %vm112_vm1, %v392_v7  ;;  %407 = vst.msk [vmem:[#allocation2 + $0x73] sm:$0x1] %vm112_vm1, %v390_v8 }
 0x108   :  { %533 = vrot.lane.b32.xlu1 %v528_v9, %s2420_s20  ;;  %559 = vrot.lane.b32.xlu0 %v555_v10, %s2421_s0  ;;  %v844_v9 = vstv %s2227_s12  ;;  %s3100_s12 = sld [smem:[#allocation6 + $0x6]] }
 0x109   :  { %v428_v12 = vpop.permute.xlu1 %427  ;;  %v426_v13 = vpop.permute.xlu0 %425  ;;  %v2869_v32 = vld [vmem:[#allocation2 + $0x60] sm:$0xf] }
 0x10a   :  { %450 = vst.msk [vmem:[#allocation2 + $0xc] sm:$0x1] %vm112_vm1, %v428_v12  ;;  %449 = vst.msk [vmem:[#allocation2 + $0x4] sm:$0x1] %vm112_vm1, %v426_v13  ;;  %v624_v34 = vmul.f32 %v622_v22, %v2869_v32  ;;  %v638_v37 = vmul.f32 %v636_v27, %v2869_v32  ;;  %v652_v40 = vmul.f32 %v650_v33, %v2869_v32  ;;  %v858_v12 = vstv %s2228_s13  ;;  %s3109_s13 = sld [smem:[#allocation6 + $0x58]] }
 0x10b   :  { %v666_v43 = vmul.f32 %v664_v36, %v2869_v32  ;;  %v680_v47 = vmul.f32 %v678_v39, %v2869_v32  ;;  %v694_v50 = vmul.f32 %v692_v42, %v2869_v32  ;;  %v708_v54 = vmul.f32 %v706_v45, %v2869_v32 }
 0x10c   :  { %547 = vrot.lane.b32.xlu1 %v542_v14, %s2421_s0  ;;  %573 = vrot.lane.b32.xlu0 %v569_v15, %s2421_s0  ;;  %v722_v58 = vmul.f32 %v720_v49, %v2869_v32  ;;  %v2933_v15 = vld [vmem:[#allocation2 + $0x8] sm:$0xf]  ;;  %v941_v27 = vstv %s2236_s17  ;;  %v997_v42 = vstv %s2962_s19  ;;  %s3128_s17 = sld [smem:[#allocation6 + $0x11]]  ;;  %s3174_s19 = sld [smem:[#allocation6 + $0x7d]] }
 0x10d   :  { %v432_v17 = vpop.permute.xlu1 %431  ;;  %v430_v18 = vpop.permute.xlu0 %429  ;;  %v1038_v49 = vstv %s2969_s21  ;;  %s3188_s21 = sld [smem:[#allocation6 + $0x13]] }
 0x10e   :  { %452 = vst.msk [vmem:[#allocation2 + $0x1c] sm:$0x1] %vm112_vm1, %v432_v17  ;;  %451 = vst.msk [vmem:[#allocation2 + $0x14] sm:$0x1] %vm112_vm1, %v430_v18  ;;  %v900_v18 = vmul.f32 %v899_v16, %v2933_v15 }
 0x110   :  { %561 = vrot.lane.b32.xlu1 %v556_v19, %s2421_s0  ;;  %587 = vrot.lane.b32.xlu0 %v583_v20, %s2421_s0  ;;  %v913_v19 = vstv %s2234_s15  ;;  %s3118_s15 = sld [smem:[#allocation6 + $0x7c]] }
 0x111   :  { %v436_v23 = vpop.permute.xlu1 %435  ;;  %v434_v24 = vpop.permute.xlu0 %433  ;;  %v2897_v52 = vld [vmem:[#allocation2 + $0x1] sm:$0xf]  ;;  %v914_v22 = vmul.f32 %v913_v19, %v2933_v15 }
 0x112   :  { %454 = vst.msk [vmem:[#allocation2 + $0x4c] sm:$0x1] %vm112_vm1, %v436_v23  ;;  %453 = vst.msk [vmem:[#allocation2 + $0x44] sm:$0x1] %vm112_vm1, %v434_v24  ;;  %v761_v56 = vmul.f32 %v760_v53, %v2897_v52  ;;  %v775_v59 = vmul.f32 %v774_v57, %v2897_v52  ;;  %v789_v63 = vmul.f32 %v788_v61, %v2897_v52  ;;  %v2943_v23 = vld [vmem:[#allocation2 + $0x48] sm:$0xf]  ;;  %v927_v24 = vstv %s2235_s16 }
 0x113   :  { %v803_v2 = vmul.f32 %v802_v0, %v2897_v52  ;;  %v817_v5 = vmul.f32 %v816_v3, %v2897_v52  ;;  %v831_v8 = vmul.f32 %v830_v6, %v2897_v52  ;;  %v845_v11 = vmul.f32 %v844_v9, %v2897_v52  ;;  %s3123_s16 = sld [smem:[#allocation6 + $0x4e]] }
 0x114   :  { %575 = vrot.lane.b32.xlu1 %v570_v25, %s2421_s0  ;;  %627 = vrot.lane.b32.xlu0 %v623_v26, %s2420_s20  ;;  %v859_v14 = vmul.f32 %v858_v12, %v2897_v52  ;;  %v901_v25 = vmul.f32 %v899_v16, %v2943_v23  ;;  %v928_v26 = vmul.f32 %v927_v24, %v2933_v15 }
 0x115   :  { %v440_v28 = vpop.permute.xlu1 %439  ;;  %v438_v29 = vpop.permute.xlu0 %437  ;;  %v943_v36 = vmul.f32 %v941_v27, %v2943_v23 }
 0x116   :  { %456 = vst.msk [vmem:[#allocation2 + $0x5c] sm:$0x1] %vm112_vm1, %v440_v28  ;;  %455 = vst.msk [vmem:[#allocation2 + $0x54] sm:$0x1] %vm112_vm1, %v438_v29  ;;  %v915_v28 = vmul.f32 %v913_v19, %v2943_v23  ;;  %v942_v29 = vmul.f32 %v941_v27, %v2933_v15 }
 0x118   :  { %589 = vrot.lane.b32.xlu1 %v584_v30, %s2421_s0  ;;  %641 = vrot.lane.b32.xlu0 %v637_v31, %s2420_s20  ;;  %v955_v30 = vstv %s2237_s1  ;;  %v929_v31 = vmul.f32 %v927_v24, %v2943_v23  ;;  %s3137_s1 = sld [smem:[#allocation6 + $0x72]] }
 0x119   :  { %v2907_v60 = vld [vmem:[#allocation2 + $0x41] sm:$0xf]  ;;  %v956_v33 = vmul.f32 %v955_v30, %v2933_v15 }
 0x11a   :  { %v762_v62 = vmul.f32 %v760_v53, %v2907_v60  ;;  %v776_v1 = vmul.f32 %v774_v57, %v2907_v60  ;;  %v790_v4 = vmul.f32 %v788_v61, %v2907_v60  ;;  %v804_v7 = vmul.f32 %v802_v0, %v2907_v60 }
 0x11b   :  { %v818_v10 = vmul.f32 %v816_v3, %v2907_v60  ;;  %v832_v13 = vmul.f32 %v830_v6, %v2907_v60  ;;  %v846_v17 = vmul.f32 %v844_v9, %v2907_v60  ;;  %v860_v20 = vmul.f32 %v858_v12, %v2907_v60  ;;  %v3022_v3 = vld [vmem:[#allocation2 + $0x68] sm:$0xf] }
 0x11c   :  { %629 = vrot.lane.b32.xlu1 %v624_v34, %s2420_s20  ;;  %655 = vrot.lane.b32.xlu0 %v651_v35, %s2420_s20  ;;  %v969_v34 = vstv %s2949_s5  ;;  %v598_v61 = vstv %s2984_s24  ;;  %v1040_v16 = vmul.f32 %v1038_v49, %v3022_v3  ;;  %s3144_s5 = sld [smem:[#allocation6 + $0x35]] }
 0x11d   :  { %v971_v45 = vmul.f32 %v969_v34, %v2943_v23  ;;  %v1066_v6 = vstv %s2991_s25  ;;  %v604_v9 = vstv %s2998_s27  ;;  %v478_v12 = vstv %s3002_s28  ;;  %s3217_s24 = sld [smem:[#allocation6 + $0x2d]]  ;;  %s3222_s25 = sld [smem:[#allocation6 + $0x7f]] }
 0x11e   :  { %v605_v24 = vmul.f32 %v604_v9, %v2849_v21  ;;  %s3232_s27 = sld [smem:[#allocation6 + $0x14]]  ;;  %s3241_s28 = sld [smem:[#allocation6 + $0x75]] }
 0x120   :  { %643 = vrot.lane.b32.xlu1 %v638_v37, %s2420_s20  ;;  %669 = vrot.lane.b32.xlu0 %v665_v38, %s2420_s20  ;;  %v970_v37 = vmul.f32 %v969_v34, %v2933_v15  ;;  %v983_v38 = vstv %s2955_s18  ;;  %s3158_s18 = sld [smem:[#allocation6 + $0x59]] }
 0x124   :  { %657 = vrot.lane.b32.xlu1 %v652_v40, %s2420_s20  ;;  %683 = vrot.lane.b32.xlu0 %v679_v41, %s2421_s0  ;;  %v957_v40 = vmul.f32 %v955_v30, %v2943_v23  ;;  %v984_v41 = vmul.f32 %v983_v38, %v2933_v15 }
 0x128   :  { %671 = vrot.lane.b32.xlu1 %v666_v43, %s2420_s20  ;;  %697 = vrot.lane.b32.xlu0 %v693_v44, %s2421_s0 }
 0x12c   :  { %685 = vrot.lane.b32.xlu1 %v680_v47, %s2421_s0  ;;  %711 = vrot.lane.b32.xlu0 %v707_v48, %s2421_s0  ;;  %v998_v47 = vmul.f32 %v997_v42, %v2933_v15  ;;  %v2988_v48 = vld [vmem:[#allocation2 + $0x28] sm:$0xf] }
 0x130   :  { %699 = vrot.lane.b32.xlu1 %v694_v50, %s2421_s0  ;;  %725 = vrot.lane.b32.xlu0 %v721_v51, %s2421_s0  ;;  %v460_v50 = vstv %s2971_s22  ;;  %s3199_s22 = sld [smem:[#allocation6 + $0x37]] }
 0x131   :  { %v461_v57 = vmul.f32 %v460_v50, %v2782_v46  ;;  %v462_v19 = vmul.f32 %v460_v50, %v2798_v55  ;;  %v1068_v50 = vmul.f32 %v1066_v6, %v3022_v3 }
 0x134   :  { %713 = vrot.lane.b32.xlu1 %v708_v54, %s2421_s0  ;;  %765 = vrot.lane.b32.xlu0 %v761_v56, %s2420_s20  ;;  %v985_v54 = vmul.f32 %v983_v38, %v2943_v23  ;;  %v1039_v56 = vmul.f32 %v1038_v49, %v2988_v48 }
 0x138   :  { %727 = vrot.lane.b32.xlu1 %v722_v58, %s2421_s0  ;;  %779 = vrot.lane.b32.xlu0 %v775_v59, %s2420_s20  ;;  %v1052_v58 = vstv %s2978_s23  ;;  %v466_v59 = vstv %s2980_s2  ;;  %s3204_s23 = sld [smem:[#allocation6 + $0x9]]  ;;  %s3213_s2 = sld [smem:[#allocation6 + $0x5b]] }
 0x139   :  { %v468_v30 = vmul.f32 %v466_v59, %v2798_v55 }
 0x13c   :  { %767 = vrot.lane.b32.xlu1 %v762_v62, %s2420_s20  ;;  %793 = vrot.lane.b32.xlu0 %v789_v63, %s2420_s20 }
 0x140   :  { %781 = vrot.lane.b32.xlu1 %v776_v1, %s2420_s20  ;;  %807 = vrot.lane.b32.xlu0 %v803_v2, %s2420_s20  ;;  %v999_v1 = vmul.f32 %v997_v42, %v2943_v23  ;;  %v1053_v2 = vmul.f32 %v1052_v58, %v2988_v48 }
 0x144   :  { %795 = vrot.lane.b32.xlu1 %v790_v4, %s2420_s20  ;;  %821 = vrot.lane.b32.xlu0 %v817_v5, %s2421_s0  ;;  %v467_v4 = vmul.f32 %v466_v59, %v2782_v46 }
 0x148   :  { %809 = vrot.lane.b32.xlu1 %v804_v7, %s2420_s20  ;;  %835 = vrot.lane.b32.xlu0 %v831_v8, %s2421_s0  ;;  %v599_v7 = vmul.f32 %v598_v61, %v2849_v21  ;;  %v472_v8 = vstv %s2994_s26  ;;  %s3227_s26 = sld [smem:[#allocation6 + $0x51]] }
 0x14c   :  { %823 = vrot.lane.b32.xlu1 %v818_v10, %s2421_s0  ;;  %849 = vrot.lane.b32.xlu0 %v845_v11, %s2421_s0 }
 0x150   :  { %837 = vrot.lane.b32.xlu1 %v832_v13, %s2421_s0  ;;  %863 = vrot.lane.b32.xlu0 %v859_v14, %s2421_s0 }
 0x154   :  { %851 = vrot.lane.b32.xlu1 %v846_v17, %s2421_s0  ;;  %904 = vrot.lane.b32.xlu0 %v900_v18, %s2420_s20  ;;  %v1067_v17 = vmul.f32 %v1066_v6, %v2988_v48  ;;  %v1080_v18 = vstv %s3006_s29  ;;  %v1122_v6 = vstv %s3054_s8  ;;  %s3248_s29 = sld [smem:[#allocation6 + $0x38]]  ;;  %s3308_s8 = sld [smem:[#allocation6 + $0xc]] }
 0x158   :  { %865 = vrot.lane.b32.xlu1 %v860_v20, %s2421_s0  ;;  %918 = vrot.lane.b32.xlu0 %v914_v22, %s2420_s20  ;;  %v473_v20 = vmul.f32 %v472_v8, %v2782_v46 }
 0x15c   :  { %906 = vrot.lane.b32.xlu1 %v901_v25, %s2420_s20  ;;  %932 = vrot.lane.b32.xlu0 %v928_v26, %s2420_s20  ;;  %v610_v25 = vstv %s3014_s3  ;;  %s3262_s3 = sld [smem:[#allocation6 + $0x5c]] }
 0x160   :  { %920 = vrot.lane.b32.xlu1 %v915_v28, %s2420_s20  ;;  %946 = vrot.lane.b32.xlu0 %v942_v29, %s2420_s20  ;;  %v1094_v28 = vstv %s3016_s30  ;;  %s3278_s30 = sld [smem:[#allocation6 + $0x80]] }
 0x164   :  { %934 = vrot.lane.b32.xlu1 %v929_v31, %s2420_s20  ;;  %960 = vrot.lane.b32.xlu0 %v956_v33, %s2421_s0  ;;  %v479_v31 = vmul.f32 %v478_v12, %v2782_v46  ;;  %v616_v46 = vstv %s3031_s6  ;;  %s3292_s6 = sld [smem:[#allocation6 + $0x16]] }
 0x166   :  { %v490_v35 = vpop.permute.xlu0 %489 }
 0x167   :  { %v495_v62 = vadd.f32 %v490_v35, %v461_v57  ;;  %v1054_v35 = vmul.f32 %v1052_v58, %v3022_v3 }
 0x168   :  { %948 = vrot.lane.b32.xlu1 %v943_v36, %s2420_s20  ;;  %974 = vrot.lane.b32.xlu0 %v970_v37, %s2421_s0  ;;  %v1081_v36 = vmul.f32 %v1080_v18, %v2988_v48 }
 0x16a   :  { %v504_v39 = vpop.permute.xlu0 %503 }
 0x16b   :  { %v509_v10 = vadd.f32 %v504_v39, %v467_v4  ;;  %v600_v39 = vmul.f32 %v598_v61, %v2869_v32 }
 0x16c   :  { %962 = vrot.lane.b32.xlu1 %v957_v40, %s2421_s0  ;;  %988 = vrot.lane.b32.xlu0 %v984_v41, %s2421_s0  ;;  %v611_v40 = vmul.f32 %v610_v25, %v2849_v21 }
 0x16e   :  { %v492_v43 = vpop.permute.xlu1 %491  ;;  %v518_v44 = vpop.permute.xlu0 %517 }
 0x16f   :  { %v496_v26 = vadd.f32 %v492_v43, %v462_v19  ;;  %v523_v27 = vadd.f32 %v518_v44, %v473_v20 }
 0x170   :  { %976 = vrot.lane.b32.xlu1 %v971_v45, %s2421_s0  ;;  %1002 = vrot.lane.b32.xlu0 %v998_v47, %s2421_s0  ;;  %v474_v45 = vmul.f32 %v472_v8, %v2798_v55 }
 0x172   :  { %v3000_v51 = vpop.permute.xlu1 %505  ;;  %v532_v53 = vpop.permute.xlu0 %531 }
 0x173   :  { %v510_v41 = vadd.f32 %v3000_v51, %v468_v30  ;;  %v537_v42 = vadd.f32 %v532_v53, %v479_v31  ;;  %v606_v51 = vmul.f32 %v604_v9, %v2869_v32  ;;  %v617_v53 = vmul.f32 %v616_v46, %v2849_v21 }
 0x174   :  { %990 = vrot.lane.b32.xlu1 %v985_v54, %s2421_s0  ;;  %1043 = vrot.lane.b32.xlu0 %v1039_v56, %s2420_s20  ;;  %v1095_v54 = vmul.f32 %v1094_v28, %v2988_v48  ;;  %v1108_v56 = vstv %s3039_s7  ;;  %v1190_v30 = vstv %s3095_s11  ;;  %s3303_s7 = sld [smem:[#allocation6 + $0x3a]] }
 0x175   :  { %v1109_v4 = vmul.f32 %v1108_v56, %v2988_v48  ;;  %v1110_v20 = vmul.f32 %v1108_v56, %v3022_v3  ;;  %v736_v31 = vstv %s3100_s12  ;;  %v1218_v56 = vstv %s3118_s15  ;;  %s3326_s11 = sld [smem:[#allocation6 + $0x82]]  ;;  %s3331_s12 = sld [smem:[#allocation6 + $0x54]] }
 0x176   :  { %v3018_v63 = vpop.permute.xlu1 %519  ;;  %v546_v0 = vpop.permute.xlu0 %545  ;;  %s3352_s15 = sld [smem:[#allocation6 + $0x3b]] }
 0x177   :  { %v551_v5 = vadd.f32 %v546_v0, %v495_v62  ;;  %v524_v59 = vadd.f32 %v3018_v63, %v474_v45 }
 0x178   :  { %1004 = vrot.lane.b32.xlu1 %v999_v1, %s2421_s0  ;;  %1057 = vrot.lane.b32.xlu0 %v1053_v2, %s2420_s20  ;;  %v1082_v2 = vmul.f32 %v1080_v18, %v3022_v3 }
 0x179   :  { %v3033_v11 = vadd.f32 %v599_v7, %v551_v5  ;;  %v480_v5 = vmul.f32 %v478_v12, %v2798_v55  ;;  %v612_v7 = vmul.f32 %v610_v25, %v2869_v32  ;;  %v1123_v55 = vmul.f32 %v1122_v6, %v2988_v48 }
 0x17a   :  { %v534_v13 = vpop.permute.xlu1 %533  ;;  %v560_v14 = vpop.permute.xlu0 %559  ;;  %v1176_v25 = vstv %s3085_s10  ;;  %s3321_s10 = sld [smem:[#allocation6 + $0x30]] }
 0x17b   :  { %v565_v22 = vadd.f32 %v560_v14, %v509_v10  ;;  %v538_v63 = vadd.f32 %v534_v13, %v480_v5  ;;  %v1096_v14 = vmul.f32 %v1094_v28, %v3022_v3 }
 0x17c   :  { %1045 = vrot.lane.b32.xlu1 %v1040_v16, %s2420_s20  ;;  %1071 = vrot.lane.b32.xlu0 %v1067_v17, %s2420_s20  ;;  %v1136_v16 = vstv %s3070_s9  ;;  %v618_v17 = vmul.f32 %v616_v46, %v2869_v32  ;;  %v737_v46 = vmul.f32 %v736_v31, %v2897_v52  ;;  %s3317_s9 = sld [smem:[#allocation6 + $0x5e]] }
 0x17d   :  { %v3048_v29 = vadd.f32 %v605_v24, %v565_v22  ;;  %v1137_v22 = vmul.f32 %v1136_v16, %v2988_v48  ;;  %v3106_v24 = vld [vmem:[#allocation2 + $0x9] sm:$0xf] }
 0x17e   :  { %v548_v33 = vpop.permute.xlu1 %547  ;;  %v574_v34 = vpop.permute.xlu0 %573  ;;  %v1177_v28 = vmul.f32 %v1176_v25, %v3106_v24 }
 0x17f   :  { %v552_v37 = vadd.f32 %v548_v33, %v496_v26  ;;  %v579_v38 = vadd.f32 %v574_v34, %v523_v27  ;;  %v1124_v27 = vmul.f32 %v1122_v6, %v3022_v3  ;;  %v738_v6 = vmul.f32 %v736_v31, %v2907_v60 }
 0x180   :  { %1059 = vrot.lane.b32.xlu1 %v1054_v35, %s2420_s20  ;;  %1085 = vrot.lane.b32.xlu0 %v1081_v36, %s2420_s20  ;;  %v1138_v36 = vmul.f32 %v1136_v16, %v3022_v3  ;;  %v1260_v31 = vstv %s3158_s18  ;;  %s3412_s18 = sld [smem:[#allocation6 + $0xf]] }
 0x181   :  { %v3062_v43 = vadd.f32 %v600_v39, %v552_v37  ;;  %v3064_v44 = vadd.f32 %v611_v40, %v579_v38  ;;  %v1191_v37 = vmul.f32 %v1190_v30, %v3106_v24  ;;  %v3130_v38 = vld [vmem:[#allocation2 + $0x49] sm:$0xf]  ;;  %v1204_v40 = vstv %s3109_s13  ;;  %s3336_s13 = sld [smem:[#allocation6 + $0x17]] }
 0x182   :  { %v562_v47 = vpop.permute.xlu1 %561  ;;  %v588_v49 = vpop.permute.xlu0 %587 }
 0x183   :  { %v566_v57 = vadd.f32 %v562_v47, %v510_v41  ;;  %v593_v58 = vadd.f32 %v588_v49, %v537_v42  ;;  %v1178_v49 = vmul.f32 %v1176_v25, %v3130_v38 }
 0x184   :  { %1073 = vrot.lane.b32.xlu1 %v1068_v50, %s2420_s20  ;;  %1099 = vrot.lane.b32.xlu0 %v1095_v54, %s2421_s0  ;;  %v1205_v50 = vmul.f32 %v1204_v40, %v3106_v24 }
 0x185   :  { %v3077_v61 = vadd.f32 %v606_v51, %v566_v57  ;;  %v3079_v62 = vadd.f32 %v617_v53, %v593_v58 }
 0x186   :  { %v576_v0 = vpop.permute.xlu1 %575  ;;  %v628_v1 = vpop.permute.xlu0 %627 }
 0x187   :  { %v580_v21 = vadd.f32 %v576_v0, %v524_v59  ;;  %v633_v33 = vadd.f32 %v628_v1, %v3033_v11  ;;  %v742_v11 = vstv %s3113_s14  ;;  %v1192_v1 = vmul.f32 %v1190_v30, %v3130_v38  ;;  %s3345_s14 = sld [smem:[#allocation6 + $0x78]] }
 0x188   :  { %1087 = vrot.lane.b32.xlu1 %v1082_v2, %s2420_s20  ;;  %1113 = vrot.lane.b32.xlu0 %v1109_v4, %s2421_s0  ;;  %v743_v57 = vmul.f32 %v742_v11, %v2897_v52  ;;  %v1219_v2 = vmul.f32 %v1218_v56, %v3106_v24  ;;  %v1232_v4 = vstv %s3128_s17  ;;  %s3382_s17 = sld [smem:[#allocation6 + $0x83]] }
 0x189   :  { %v3090_v8 = vadd.f32 %v612_v7, %v580_v21  ;;  %v1233_v16 = vmul.f32 %v1232_v4, %v3106_v24 }
 0x18a   :  { %v590_v9 = vpop.permute.xlu1 %589  ;;  %v642_v10 = vpop.permute.xlu0 %641 }
 0x18b   :  { %v594_v12 = vadd.f32 %v590_v9, %v538_v63  ;;  %v647_v41 = vadd.f32 %v642_v10, %v3048_v29  ;;  %v748_v29 = vstv %s3123_s16  ;;  %s3366_s16 = sld [smem:[#allocation6 + $0x5f]] }
 0x18c   :  { %1101 = vrot.lane.b32.xlu1 %v1096_v14, %s2421_s0  ;;  %1127 = vrot.lane.b32.xlu0 %v1123_v55, %s2421_s0 }
 0x18d   :  { %v3102_v13 = vadd.f32 %v618_v17, %v594_v12  ;;  %v1206_v12 = vmul.f32 %v1204_v40, %v3130_v38  ;;  %v1246_v17 = vstv %s3144_s5  ;;  %v1274_v40 = vstv %s3174_s19  ;;  %s3407_s5 = sld [smem:[#allocation6 + $0x3d]]  ;;  %s3421_s19 = sld [smem:[#allocation6 + $0x61]] }
 0x18e   :  { %v630_v18 = vpop.permute.xlu1 %629  ;;  %v656_v19 = vpop.permute.xlu0 %655 }
 0x18f   :  { %v634_v58 = vadd.f32 %v630_v18, %v3062_v43  ;;  %v661_v51 = vadd.f32 %v656_v19, %v3064_v44  ;;  %v749_v43 = vmul.f32 %v748_v29, %v2897_v52  ;;  %v754_v44 = vstv %s3137_s1  ;;  %s3396_s1 = sld [smem:[#allocation6 + $0x19]] }
 0x190   :  { %1115 = vrot.lane.b32.xlu1 %v1110_v20, %s2421_s0  ;;  %1141 = vrot.lane.b32.xlu0 %v1137_v22, %s2421_s0 }
 0x192   :  { %v644_v32 = vpop.permute.xlu1 %643  ;;  %v670_v26 = vpop.permute.xlu0 %669 }
 0x193   :  { %v648_v7 = vadd.f32 %v644_v32, %v3077_v61  ;;  %v675_v63 = vadd.f32 %v670_v26, %v3079_v62  ;;  %v744_v61 = vmul.f32 %v742_v11, %v2907_v60  ;;  %v755_v62 = vmul.f32 %v754_v44, %v2897_v52 }
 0x194   :  { %1129 = vrot.lane.b32.xlu1 %v1124_v27, %s2421_s0  ;;  %1181 = vrot.lane.b32.xlu0 %v1177_v28, %s2420_s20  ;;  %v1220_v27 = vmul.f32 %v1218_v56, %v3130_v38  ;;  %v1247_v28 = vmul.f32 %v1246_v17, %v3106_v24  ;;  %v750_v52 = vmul.f32 %v748_v29, %v2907_v60  ;;  %v1329_v29 = vstv %s3199_s22  ;;  %s3430_s22 = sld [smem:[#allocation6 + $0x85]] }
 0x195   :  { %v1262_v56 = vmul.f32 %v1260_v31, %v3130_v38 }
 0x196   :  { %v658_v34 = vpop.permute.xlu1 %657  ;;  %v684_v35 = vpop.permute.xlu0 %683 }
 0x197   :  { %v689_v39 = vadd.f32 %v684_v35, %v633_v33  ;;  %v662_v20 = vadd.f32 %v658_v34, %v3090_v8 }
 0x198   :  { %1143 = vrot.lane.b32.xlu1 %v1138_v36, %s2421_s0  ;;  %1195 = vrot.lane.b32.xlu0 %v1191_v37, %s2420_s20  ;;  %v1234_v36 = vmul.f32 %v1232_v4, %v3130_v38  ;;  %v1261_v37 = vmul.f32 %v1260_v31, %v3106_v24  ;;  %v3234_v4 = vld [vmem:[#allocation2 + $0x50] sm:$0xf] }
 0x199   :  { %v3140_v42 = vadd.f32 %v737_v46, %v689_v39  ;;  %v756_v46 = vmul.f32 %v754_v44, %v2907_v60 }
 0x19a   :  { %v672_v45 = vpop.permute.xlu1 %671  ;;  %v698_v47 = vpop.permute.xlu0 %697 }
 0x19b   :  { %v703_v54 = vadd.f32 %v698_v47, %v647_v41  ;;  %v676_v8 = vadd.f32 %v672_v45, %v3102_v13  ;;  %v1248_v45 = vmul.f32 %v1246_v17, %v3130_v38  ;;  %v1275_v47 = vmul.f32 %v1274_v40, %v3106_v24 }
 0x19c   :  { %1183 = vrot.lane.b32.xlu1 %v1178_v49, %s2420_s20  ;;  %1209 = vrot.lane.b32.xlu0 %v1205_v50, %s2420_s20  ;;  %v3210_v49 = vld [vmem:[#allocation2 + $0x10] sm:$0xf]  ;;  %v1315_v50 = vstv %s3188_s21  ;;  %s3425_s21 = sld [smem:[#allocation6 + $0x33]] }
 0x19d   :  { %v3153_v53 = vadd.f32 %v743_v57, %v703_v54  ;;  %v1316_v57 = vmul.f32 %v1315_v50, %v3210_v49 }
 0x19e   :  { %v686_v59 = vpop.permute.xlu1 %685  ;;  %v712_v0 = vpop.permute.xlu0 %711 }
 0x19f   :  { %v690_v5 = vadd.f32 %v686_v59, %v634_v58  ;;  %v717_v21 = vadd.f32 %v712_v0, %v661_v51  ;;  %v875_v58 = vstv %s3204_s23  ;;  %s3435_s23 = sld [smem:[#allocation6 + $0x57]] }
 0x1a0   :  { %1197 = vrot.lane.b32.xlu1 %v1192_v1, %s2420_s20  ;;  %1223 = vrot.lane.b32.xlu0 %v1219_v2, %s2420_s20  ;;  %v1276_v1 = vmul.f32 %v1274_v40, %v3130_v38  ;;  %v1330_v2 = vmul.f32 %v1329_v29, %v3210_v49  ;;  %v877_v31 = vmul.f32 %v875_v58, %v2943_v23 }
 0x1a1   :  { %v3167_v9 = vadd.f32 %v738_v6, %v690_v5  ;;  %v3169_v10 = vadd.f32 %v749_v43, %v717_v21  ;;  %v1343_v21 = vstv %s3213_s2  ;;  %v876_v6 = vmul.f32 %v875_v58, %v2933_v15  ;;  %s3440_s2 = sld [smem:[#allocation6 + $0x1a]] }
 0x1a2   :  { %v700_v14 = vpop.permute.xlu1 %699  ;;  %v726_v55 = vpop.permute.xlu0 %725  ;;  %v1399_v58 = vstv %s3262_s3  ;;  %s3516_s3 = sld [smem:[#allocation6 + $0x12]] }
 0x1a3   :  { %v704_v18 = vadd.f32 %v700_v14, %v648_v7  ;;  %v731_v19 = vadd.f32 %v726_v55, %v675_v63  ;;  %v1317_v14 = vmul.f32 %v1315_v50, %v3234_v4  ;;  %v1344_v55 = vmul.f32 %v1343_v21, %v3210_v49 }
 0x1a4   :  { %1211 = vrot.lane.b32.xlu1 %v1206_v12, %s2420_s20  ;;  %1237 = vrot.lane.b32.xlu0 %v1233_v16, %s2421_s0  ;;  %v1357_v16 = vstv %s3222_s25  ;;  %s3456_s25 = sld [smem:[#allocation6 + $0x3e]] }
 0x1a5   :  { %v3181_v22 = vadd.f32 %v744_v61, %v704_v18  ;;  %v3183_v25 = vadd.f32 %v755_v62, %v731_v19 }
 0x1a6   :  { %v714_v32 = vpop.permute.xlu1 %713  ;;  %v766_v26 = vpop.permute.xlu0 %765 }
 0x1a7   :  { %v718_v30 = vadd.f32 %v714_v32, %v662_v20  ;;  %v771_v51 = vadd.f32 %v766_v26, %v3140_v42  ;;  %v881_v42 = vstv %s3217_s24  ;;  %v1331_v32 = vmul.f32 %v1329_v29, %v3234_v4  ;;  %s3449_s24 = sld [smem:[#allocation6 + $0x7b]] }
 0x1a8   :  { %1225 = vrot.lane.b32.xlu1 %v1220_v27, %s2420_s20  ;;  %1251 = vrot.lane.b32.xlu0 %v1247_v28, %s2421_s0  ;;  %v882_v17 = vmul.f32 %v881_v42, %v2933_v15  ;;  %v1358_v26 = vmul.f32 %v1357_v16, %v3210_v49  ;;  %v1371_v27 = vstv %s3232_s27  ;;  %s3486_s27 = sld [smem:[#allocation6 + $0x86]] }
 0x1a9   :  { %v3194_v33 = vadd.f32 %v750_v52, %v718_v30  ;;  %v1372_v40 = vmul.f32 %v1371_v27, %v3210_v49 }
 0x1aa   :  { %v728_v34 = vpop.permute.xlu1 %727  ;;  %v780_v35 = vpop.permute.xlu0 %779 }
 0x1ab   :  { %v732_v39 = vadd.f32 %v728_v34, %v676_v8  ;;  %v785_v43 = vadd.f32 %v780_v35, %v3153_v53  ;;  %v887_v53 = vstv %s3227_s26  ;;  %s3470_s26 = sld [smem:[#allocation6 + $0x62]] }
 0x1ac   :  { %1239 = vrot.lane.b32.xlu1 %v1234_v36, %s2421_s0  ;;  %1265 = vrot.lane.b32.xlu0 %v1261_v37, %s2421_s0 }
 0x1ad   :  { %v3206_v13 = vadd.f32 %v756_v46, %v732_v39  ;;  %v1345_v39 = vmul.f32 %v1343_v21, %v3234_v4  ;;  %v1385_v46 = vstv %s3248_s29  ;;  %v1413_v21 = vstv %s3278_s30  ;;  %s3511_s29 = sld [smem:[#allocation6 + $0x40]]  ;;  %s3525_s30 = sld [smem:[#allocation6 + $0x64]] }
 0x1ae   :  { %v768_v11 = vpop.permute.xlu1 %767  ;;  %v794_v41 = vpop.permute.xlu0 %793 }
 0x1af   :  { %v772_v18 = vadd.f32 %v768_v11, %v3167_v9  ;;  %v799_v19 = vadd.f32 %v794_v41, %v3169_v10  ;;  %v888_v9 = vmul.f32 %v887_v53, %v2933_v15  ;;  %v893_v10 = vstv %s3241_s28  ;;  %s3500_s28 = sld [smem:[#allocation6 + $0x1c]] }
 0x1b0   :  { %1253 = vrot.lane.b32.xlu1 %v1248_v45, %s2421_s0  ;;  %1279 = vrot.lane.b32.xlu0 %v1275_v47, %s2421_s0 }
 0x1b2   :  { %v782_v60 = vpop.permute.xlu1 %781  ;;  %v808_v54 = vpop.permute.xlu0 %807 }
 0x1b3   :  { %v786_v52 = vadd.f32 %v782_v60, %v3181_v22  ;;  %v813_v8 = vadd.f32 %v808_v54, %v3183_v25  ;;  %v883_v22 = vmul.f32 %v881_v42, %v2943_v23  ;;  %v894_v25 = vmul.f32 %v893_v10, %v2933_v15 }
 0x1b4   :  { %1267 = vrot.lane.b32.xlu1 %v1262_v56, %s2421_s0  ;;  %1320 = vrot.lane.b32.xlu0 %v1316_v57, %s2420_s20  ;;  %v1359_v56 = vmul.f32 %v1357_v16, %v3234_v4  ;;  %v1386_v57 = vmul.f32 %v1385_v46, %v3210_v49  ;;  %v889_v15 = vmul.f32 %v887_v53, %v2943_v23  ;;  %v1468_v53 = vstv %s3303_s7  ;;  %s3534_s7 = sld [smem:[#allocation6 + $0x88]] }
 0x1b5   :  { %v1401_v16 = vmul.f32 %v1399_v58, %v3234_v4 }
 0x1b6   :  { %v796_v59 = vpop.permute.xlu1 %795  ;;  %v822_v0 = vpop.permute.xlu0 %821 }
 0x1b7   :  { %v827_v5 = vadd.f32 %v822_v0, %v771_v51  ;;  %v800_v45 = vadd.f32 %v796_v59, %v3194_v33 }
 0x1b8   :  { %1281 = vrot.lane.b32.xlu1 %v1276_v1, %s2421_s0  ;;  %1334 = vrot.lane.b32.xlu0 %v1330_v2, %s2420_s20  ;;  %v1373_v1 = vmul.f32 %v1371_v27, %v3234_v4  ;;  %v1400_v2 = vmul.f32 %v1399_v58, %v3210_v49  ;;  %v3338_v27 = vld [vmem:[#allocation2 + $0x70] sm:$0xf] }
 0x1b9   :  { %v3244_v44 = vadd.f32 %v876_v6, %v827_v5  ;;  %v895_v6 = vmul.f32 %v893_v10, %v2943_v23 }
 0x1ba   :  { %v810_v7 = vpop.permute.xlu1 %809  ;;  %v836_v63 = vpop.permute.xlu0 %835 }
 0x1bb   :  { %v841_v12 = vadd.f32 %v836_v63, %v785_v43  ;;  %v814_v33 = vadd.f32 %v810_v7, %v3206_v13  ;;  %v1387_v7 = vmul.f32 %v1385_v46, %v3234_v4  ;;  %v1414_v63 = vmul.f32 %v1413_v21, %v3210_v49 }
 0x1bc   :  { %1322 = vrot.lane.b32.xlu1 %v1317_v14, %s2420_s20  ;;  %1348 = vrot.lane.b32.xlu0 %v1344_v55, %s2420_s20  ;;  %v3314_v14 = vld [vmem:[#allocation2 + $0x30] sm:$0xf]  ;;  %v1454_v55 = vstv %s3292_s6  ;;  %s3529_s6 = sld [smem:[#allocation6 + $0x36]] }
 0x1bd   :  { %v3257_v61 = vadd.f32 %v882_v17, %v841_v12  ;;  %v1455_v17 = vmul.f32 %v1454_v55, %v3314_v14 }
 0x1be   :  { %v824_v62 = vpop.permute.xlu1 %823  ;;  %v850_v20 = vpop.permute.xlu0 %849 }
 0x1bf   :  { %v828_v28 = vadd.f32 %v824_v62, %v772_v18  ;;  %v855_v30 = vadd.f32 %v850_v20, %v799_v19  ;;  %v1014_v18 = vstv %s3308_s8  ;;  %s3539_s8 = sld [smem:[#allocation6 + $0x5a]] }
 0x1c0   :  { %1336 = vrot.lane.b32.xlu1 %v1331_v32, %s2420_s20  ;;  %1362 = vrot.lane.b32.xlu0 %v1358_v26, %s2420_s20  ;;  %v1415_v32 = vmul.f32 %v1413_v21, %v3234_v4  ;;  %v1469_v26 = vmul.f32 %v1468_v53, %v3314_v14  ;;  %v1016_v58 = vmul.f32 %v1014_v18, %v3022_v3 }
 0x1c1   :  { %v3271_v34 = vadd.f32 %v877_v31, %v828_v28  ;;  %v3273_v35 = vadd.f32 %v888_v9, %v855_v30  ;;  %v1482_v30 = vstv %s3317_s9  ;;  %v1015_v31 = vmul.f32 %v1014_v18, %v2988_v48  ;;  %s3544_s9 = sld [smem:[#allocation6 + $0x1d]] }
 0x1c2   :  { %v838_v36 = vpop.permute.xlu1 %837  ;;  %v864_v37 = vpop.permute.xlu0 %863  ;;  %v1538_v18 = vstv %s3366_s16  ;;  %s3606_s16 = sld [smem:[#allocation6 + $0x15]] }
 0x1c3   :  { %v842_v11 = vadd.f32 %v838_v36, %v786_v52  ;;  %v869_v41 = vadd.f32 %v864_v37, %v813_v8  ;;  %v1456_v36 = vmul.f32 %v1454_v55, %v3338_v27  ;;  %v1483_v37 = vmul.f32 %v1482_v30, %v3314_v14 }
 0x1c4   :  { %1350 = vrot.lane.b32.xlu1 %v1345_v39, %s2420_s20  ;;  %1376 = vrot.lane.b32.xlu0 %v1372_v40, %s2421_s0  ;;  %v1496_v40 = vstv %s3326_s11  ;;  %s3558_s11 = sld [smem:[#allocation6 + $0x41]] }
 0x1c5   :  { %v3285_v47 = vadd.f32 %v883_v22, %v842_v11  ;;  %v3287_v50 = vadd.f32 %v894_v25, %v869_v41 }
 0x1c6   :  { %v852_v60 = vpop.permute.xlu1 %851  ;;  %v905_v54 = vpop.permute.xlu0 %904 }
 0x1c7   :  { %v856_v29 = vadd.f32 %v852_v60, %v800_v45  ;;  %v910_v19 = vadd.f32 %v905_v54, %v3244_v44  ;;  %v1020_v44 = vstv %s3321_s10  ;;  %v1470_v60 = vmul.f32 %v1468_v53, %v3338_v27  ;;  %s3553_s10 = sld [smem:[#allocation6 + $0x7e]] }
 0x1c8   :  { %1364 = vrot.lane.b32.xlu1 %v1359_v56, %s2420_s20  ;;  %1390 = vrot.lane.b32.xlu0 %v1386_v57, %s2421_s0  ;;  %v1021_v46 = vmul.f32 %v1020_v44, %v2988_v48  ;;  %v1497_v54 = vmul.f32 %v1496_v40, %v3314_v14  ;;  %v1510_v56 = vstv %s3336_s13  ;;  %s3582_s13 = sld [smem:[#allocation6 + $0x89]] }
 0x1c9   :  { %v3298_v51 = vadd.f32 %v889_v15, %v856_v29  ;;  %v1511_v21 = vmul.f32 %v1510_v56, %v3314_v14 }
 0x1ca   :  { %v866_v59 = vpop.permute.xlu1 %865  ;;  %v919_v0 = vpop.permute.xlu0 %918 }
 0x1cb   :  { %v870_v5 = vadd.f32 %v866_v59, %v814_v33  ;;  %v924_v9 = vadd.f32 %v919_v0, %v3257_v61  ;;  %v1026_v61 = vstv %s3331_s12  ;;  %s3570_s12 = sld [smem:[#allocation6 + $0x65]] }
 0x1cc   :  { %1378 = vrot.lane.b32.xlu1 %v1373_v1, %s2421_s0  ;;  %1404 = vrot.lane.b32.xlu0 %v1400_v2, %s2421_s0 }
 0x1cd   :  { %v3310_v13 = vadd.f32 %v895_v6, %v870_v5  ;;  %v1484_v5 = vmul.f32 %v1482_v30, %v3338_v27  ;;  %v1524_v6 = vstv %s3352_s15  ;;  %v1552_v30 = vstv %s3382_s17  ;;  %s3601_s15 = sld [smem:[#allocation6 + $0x43]]  ;;  %s3613_s17 = sld [smem:[#allocation6 + $0x67]] }
 0x1ce   :  { %v907_v42 = vpop.permute.xlu1 %906  ;;  %v933_v43 = vpop.permute.xlu0 %932 }
 0x1cf   :  { %v911_v11 = vadd.f32 %v907_v42, %v3271_v34  ;;  %v938_v41 = vadd.f32 %v933_v43, %v3273_v35  ;;  %v1027_v34 = vmul.f32 %v1026_v61, %v2988_v48  ;;  %v1032_v35 = vstv %s3345_s14  ;;  %s3592_s14 = sld [smem:[#allocation6 + $0x1f]] }
 0x1d0   :  { %1392 = vrot.lane.b32.xlu1 %v1387_v7, %s2421_s0  ;;  %1418 = vrot.lane.b32.xlu0 %v1414_v63, %s2421_s0 }
 0x1d2   :  { %v921_v23 = vpop.permute.xlu1 %920  ;;  %v947_v12 = vpop.permute.xlu0 %946 }
 0x1d3   :  { %v925_v15 = vadd.f32 %v921_v23, %v3285_v47  ;;  %v952_v33 = vadd.f32 %v947_v12, %v3287_v50  ;;  %v1022_v47 = vmul.f32 %v1020_v44, %v3022_v3  ;;  %v1033_v50 = vmul.f32 %v1032_v35, %v2988_v48 }
 0x1d4   :  { %1406 = vrot.lane.b32.xlu1 %v1401_v16, %s2421_s0  ;;  %1459 = vrot.lane.b32.xlu0 %v1455_v17, %s2420_s20  ;;  %v1498_v16 = vmul.f32 %v1496_v40, %v3338_v27  ;;  %v1525_v17 = vmul.f32 %v1524_v6, %v3314_v14  ;;  %v1028_v48 = vmul.f32 %v1026_v61, %v3022_v3  ;;  %v1606_v61 = vstv %s3407_s5  ;;  %s3622_s5 = sld [smem:[#allocation6 + $0x8b]] }
 0x1d5   :  { %v1540_v40 = vmul.f32 %v1538_v18, %v3338_v27 }
 0x1d6   :  { %v935_v62 = vpop.permute.xlu1 %934  ;;  %v961_v20 = vpop.permute.xlu0 %960 }
 0x1d7   :  { %v966_v28 = vadd.f32 %v961_v20, %v910_v19  ;;  %v939_v7 = vadd.f32 %v935_v62, %v3298_v51 }
 0x1d8   :  { %1420 = vrot.lane.b32.xlu1 %v1415_v32, %s2421_s0  ;;  %1473 = vrot.lane.b32.xlu0 %v1469_v26, %s2420_s20  ;;  %v1512_v32 = vmul.f32 %v1510_v56, %v3338_v27  ;;  %v1539_v26 = vmul.f32 %v1538_v18, %v3314_v14  ;;  %v3442_v56 = vld [vmem:[#allocation2 + $0x51] sm:$0xf] }
 0x1d9   :  { %v3348_v10 = vadd.f32 %v1015_v31, %v966_v28  ;;  %v1034_v31 = vmul.f32 %v1032_v35, %v3022_v3 }
 0x1da   :  { %v949_v52 = vpop.permute.xlu1 %948  ;;  %v975_v8 = vpop.permute.xlu0 %974 }
 0x1db   :  { %v980_v39 = vadd.f32 %v975_v8, %v924_v9  ;;  %v953_v51 = vadd.f32 %v949_v52, %v3310_v13  ;;  %v1526_v52 = vmul.f32 %v1524_v6, %v3338_v27  ;;  %v1553_v8 = vmul.f32 %v1552_v30, %v3314_v14 }
 0x1dc   :  { %1461 = vrot.lane.b32.xlu1 %v1456_v36, %s2420_s20  ;;  %1487 = vrot.lane.b32.xlu0 %v1483_v37, %s2420_s20  ;;  %v3418_v36 = vld [vmem:[#allocation2 + $0x11] sm:$0xf]  ;;  %v1592_v37 = vstv %s3396_s1  ;;  %s3617_s1 = sld [smem:[#allocation6 + $0x39]] }
 0x1dd   :  { %v3361_v22 = vadd.f32 %v1021_v46, %v980_v39  ;;  %v1593_v46 = vmul.f32 %v1592_v37, %v3418_v36 }
 0x1de   :  { %v963_v25 = vpop.permute.xlu1 %962  ;;  %v989_v45 = vpop.permute.xlu0 %988 }
 0x1df   :  { %v967_v57 = vadd.f32 %v963_v25, %v911_v11  ;;  %v994_v29 = vadd.f32 %v989_v45, %v938_v41  ;;  %v1152_v11 = vstv %s3412_s18  ;;  %s3627_s18 = sld [smem:[#allocation6 + $0x5d]] }
 0x1e0   :  { %1475 = vrot.lane.b32.xlu1 %v1470_v60, %s2420_s20  ;;  %1501 = vrot.lane.b32.xlu0 %v1497_v54, %s2420_s20  ;;  %v1554_v60 = vmul.f32 %v1552_v30, %v3338_v27  ;;  %v1607_v54 = vmul.f32 %v1606_v61, %v3418_v36  ;;  %v1154_v18 = vmul.f32 %v1152_v11, %v3130_v38 }
 0x1e1   :  { %v3375_v59 = vadd.f32 %v1016_v58, %v967_v57  ;;  %v3377_v0 = vadd.f32 %v1027_v34, %v994_v29  ;;  %v1620_v29 = vstv %s3421_s19  ;;  %v1153_v58 = vmul.f32 %v1152_v11, %v3106_v24  ;;  %s3631_s19 = sld [smem:[#allocation6 + $0x20]] }
 0x1e2   :  { %v977_v1 = vpop.permute.xlu1 %976  ;;  %v1003_v2 = vpop.permute.xlu0 %1002  ;;  %v1676_v11 = vstv %s3470_s26  ;;  %s3686_s26 = sld [smem:[#allocation6 + $0x18]] }
 0x1e3   :  { %v981_v42 = vadd.f32 %v977_v1, %v925_v15  ;;  %v1008_v43 = vadd.f32 %v1003_v2, %v952_v33  ;;  %v1594_v1 = vmul.f32 %v1592_v37, %v3442_v56  ;;  %v1621_v2 = vmul.f32 %v1620_v29, %v3418_v36 }
 0x1e4   :  { %1489 = vrot.lane.b32.xlu1 %v1484_v5, %s2420_s20  ;;  %1515 = vrot.lane.b32.xlu0 %v1511_v21, %s2421_s0  ;;  %v1634_v21 = vstv %s3430_s22  ;;  %s3644_s22 = sld [smem:[#allocation6 + $0x44]] }
 0x1e5   :  { %v3389_v63 = vadd.f32 %v1022_v47, %v981_v42  ;;  %v3391_v55 = vadd.f32 %v1033_v50, %v1008_v43 }
 0x1e6   :  { %v991_v23 = vpop.permute.xlu1 %990  ;;  %v1044_v12 = vpop.permute.xlu0 %1043 }
 0x1e7   :  { %v995_v53 = vadd.f32 %v991_v23, %v939_v7  ;;  %v1049_v41 = vadd.f32 %v1044_v12, %v3348_v10  ;;  %v1158_v10 = vstv %s3425_s21  ;;  %v1608_v23 = vmul.f32 %v1606_v61, %v3442_v56  ;;  %s3640_s21 = sld [smem:[#allocation6 + $0x81]] }
 0x1e8   :  { %1503 = vrot.lane.b32.xlu1 %v1498_v16, %s2420_s20  ;;  %1529 = vrot.lane.b32.xlu0 %v1525_v17, %s2421_s0  ;;  %v1159_v6 = vmul.f32 %v1158_v10, %v3106_v24  ;;  %v1635_v12 = vmul.f32 %v1634_v21, %v3418_v36  ;;  %v1648_v16 = vstv %s3440_s2  ;;  %s3664_s2 = sld [smem:[#allocation6 + $0x8c]] }
 0x1e9   :  { %v3402_v19 = vadd.f32 %v1028_v48, %v995_v53  ;;  %v1649_v30 = vmul.f32 %v1648_v16, %v3418_v36 }
 0x1ea   :  { %v1005_v62 = vpop.permute.xlu1 %1004  ;;  %v1058_v20 = vpop.permute.xlu0 %1057 }
 0x1eb   :  { %v1009_v28 = vadd.f32 %v1005_v62, %v953_v51  ;;  %v1063_v34 = vadd.f32 %v1058_v20, %v3361_v22  ;;  %v1164_v22 = vstv %s3435_s23  ;;  %s3654_s23 = sld [smem:[#allocation6 + $0x68]] }
 0x1ec   :  { %1517 = vrot.lane.b32.xlu1 %v1512_v32, %s2421_s0  ;;  %1543 = vrot.lane.b32.xlu0 %v1539_v26, %s2421_s0 }
 0x1ed   :  { %v3414_v13 = vadd.f32 %v1034_v31, %v1009_v28  ;;  %v1622_v28 = vmul.f32 %v1620_v29, %v3442_v56  ;;  %v1662_v31 = vstv %s3456_s25  ;;  %v1690_v29 = vstv %s3486_s27  ;;  %s3681_s25 = sld [smem:[#allocation6 + $0x46]]  ;;  %s3693_s27 = sld [smem:[#allocation6 + $0x6a]] }
 0x1ee   :  { %v1046_v44 = vpop.permute.xlu1 %1045  ;;  %v1072_v9 = vpop.permute.xlu0 %1071 }
 0x1ef   :  { %v1050_v42 = vadd.f32 %v1046_v44, %v3375_v59  ;;  %v1077_v43 = vadd.f32 %v1072_v9, %v3377_v0  ;;  %v1165_v59 = vmul.f32 %v1164_v22, %v3106_v24  ;;  %v1170_v0 = vstv %s3449_s24  ;;  %s3673_s24 = sld [smem:[#allocation6 + $0x22]] }
 0x1f0   :  { %1531 = vrot.lane.b32.xlu1 %v1526_v52, %s2421_s0  ;;  %1557 = vrot.lane.b32.xlu0 %v1553_v8, %s2421_s0 }
 0x1f2   :  { %v1060_v3 = vpop.permute.xlu1 %1059  ;;  %v1086_v39 = vpop.permute.xlu0 %1085 }
 0x1f3   :  { %v1064_v48 = vadd.f32 %v1060_v3, %v3389_v63  ;;  %v1091_v51 = vadd.f32 %v1086_v39, %v3391_v55  ;;  %v1160_v63 = vmul.f32 %v1158_v10, %v3130_v38  ;;  %v1171_v55 = vmul.f32 %v1170_v0, %v3106_v24 }
 0x1f4   :  { %1545 = vrot.lane.b32.xlu1 %v1540_v40, %s2421_s0  ;;  %1597 = vrot.lane.b32.xlu0 %v1593_v46, %s2420_s20  ;;  %v1636_v40 = vmul.f32 %v1634_v21, %v3442_v56  ;;  %v1663_v46 = vmul.f32 %v1662_v31, %v3418_v36  ;;  %v1166_v24 = vmul.f32 %v1164_v22, %v3130_v38  ;;  %v1745_v22 = vstv %s3511_s29  ;;  %s3702_s29 = sld [smem:[#allocation6 + $0x8e]] }
 0x1f5   :  { %v1678_v21 = vmul.f32 %v1676_v11, %v3442_v56 }
 0x1f6   :  { %v1074_v25 = vpop.permute.xlu1 %1073  ;;  %v1100_v45 = vpop.permute.xlu0 %1099 }
 0x1f7   :  { %v1105_v57 = vadd.f32 %v1100_v45, %v1049_v41  ;;  %v1078_v52 = vadd.f32 %v1074_v25, %v3402_v19 }
 0x1f8   :  { %1559 = vrot.lane.b32.xlu1 %v1554_v60, %s2421_s0  ;;  %1611 = vrot.lane.b32.xlu0 %v1607_v54, %s2420_s20  ;;  %v1650_v60 = vmul.f32 %v1648_v16, %v3442_v56  ;;  %v1677_v54 = vmul.f32 %v1676_v11, %v3418_v36  ;;  %v3546_v16 = vld [vmem:[#allocation2 + $0x58] sm:$0xf] }
 0x1f9   :  { %v3452_v35 = vadd.f32 %v1153_v58, %v1105_v57  ;;  %v1172_v58 = vmul.f32 %v1170_v0, %v3130_v38 }
 0x1fa   :  { %v1088_v15 = vpop.permute.xlu1 %1087  ;;  %v1114_v33 = vpop.permute.xlu0 %1113 }
 0x1fb   :  { %v1119_v5 = vadd.f32 %v1114_v33, %v1063_v34  ;;  %v1092_v19 = vadd.f32 %v1088_v15, %v3414_v13  ;;  %v1664_v15 = vmul.f32 %v1662_v31, %v3442_v56  ;;  %v1691_v33 = vmul.f32 %v1690_v29, %v3418_v36 }
 0x1fc   :  { %1599 = vrot.lane.b32.xlu1 %v1594_v1, %s2420_s20  ;;  %1625 = vrot.lane.b32.xlu0 %v1621_v2, %s2420_s20  ;;  %v3522_v1 = vld [vmem:[#allocation2 + $0x18] sm:$0xf]  ;;  %v1731_v2 = vstv %s3500_s28  ;;  %s3697_s28 = sld [smem:[#allocation6 + $0x3c]] }
 0x1fd   :  { %v3465_v47 = vadd.f32 %v1159_v6, %v1119_v5  ;;  %v1732_v6 = vmul.f32 %v1731_v2, %v3522_v1 }
 0x1fe   :  { %v1102_v50 = vpop.permute.xlu1 %1101  ;;  %v1128_v7 = vpop.permute.xlu0 %1127 }
 0x1ff   :  { %v1106_v17 = vadd.f32 %v1102_v50, %v1050_v42  ;;  %v1133_v53 = vadd.f32 %v1128_v7, %v1077_v43  ;;  %v1291_v42 = vstv %s3516_s3  ;;  %s3707_s3 = sld [smem:[#allocation6 + $0x60]] }
 0x200   :  { %1613 = vrot.lane.b32.xlu1 %v1608_v23, %s2420_s20  ;;  %1639 = vrot.lane.b32.xlu0 %v1635_v12, %s2420_s20  ;;  %v1692_v23 = vmul.f32 %v1690_v29, %v3442_v56  ;;  %v1746_v12 = vmul.f32 %v1745_v22, %v3522_v1  ;;  %v1293_v11 = vmul.f32 %v1291_v42, %v3234_v4 }
 0x201   :  { %v3479_v62 = vadd.f32 %v1154_v18, %v1106_v17  ;;  %v3481_v20 = vadd.f32 %v1165_v59, %v1133_v53  ;;  %v1759_v53 = vstv %s3525_s30  ;;  %v1292_v18 = vmul.f32 %v1291_v42, %v3210_v49  ;;  %s3711_s30 = sld [smem:[#allocation6 + $0x23]] }
 0x202   :  { %v1116_v32 = vpop.permute.xlu1 %1115  ;;  %v1142_v26 = vpop.permute.xlu0 %1141 }
 0x203   :  { %v1120_v44 = vadd.f32 %v1116_v32, %v1064_v48  ;;  %v1147_v9 = vadd.f32 %v1142_v26, %v1091_v51  ;;  %v1733_v32 = vmul.f32 %v1731_v2, %v3546_v16  ;;  %v1760_v26 = vmul.f32 %v1759_v53, %v3522_v1 }
 0x204   :  { %1627 = vrot.lane.b32.xlu1 %v1622_v28, %s2420_s20  ;;  %1653 = vrot.lane.b32.xlu0 %v1649_v30, %s2421_s0  ;;  %v1773_v30 = vstv %s3534_s7  ;;  %s3724_s7 = sld [smem:[#allocation6 + $0x47]] }
 0x205   :  { %v3493_v8 = vadd.f32 %v1160_v63, %v1120_v44  ;;  %v3495_v37 = vadd.f32 %v1171_v55, %v1147_v9  ;;  %v1303_v44 = vstv %s3539_s8  ;;  %s3734_s8 = sld [smem:[#allocation6 + $0x6b]] }
 0x206   :  { %v1130_v3 = vpop.permute.xlu1 %1129  ;;  %v1182_v39 = vpop.permute.xlu0 %1181 }
 0x207   :  { %v1134_v61 = vadd.f32 %v1130_v3, %v1078_v52  ;;  %v1187_v43 = vadd.f32 %v1182_v39, %v3452_v35  ;;  %v1297_v35 = vstv %s3529_s6  ;;  %v1747_v3 = vmul.f32 %v1745_v22, %v3546_v16  ;;  %s3720_s6 = sld [smem:[#allocation6 + $0x84]] }
 0x208   :  { %1641 = vrot.lane.b32.xlu1 %v1636_v40, %s2420_s20  ;;  %1667 = vrot.lane.b32.xlu0 %v1663_v46, %s2421_s0  ;;  %v1298_v31 = vmul.f32 %v1297_v35, %v3210_v49  ;;  %v1774_v39 = vmul.f32 %v1773_v30, %v3522_v1  ;;  %v1787_v40 = vstv %s3544_s9  ;;  %s3744_s9 = sld [smem:[#allocation6 + $0x8f]] }
 0x209   :  { %v3506_v41 = vadd.f32 %v1166_v24, %v1134_v61  ;;  %v1304_v24 = vmul.f32 %v1303_v44, %v3210_v49  ;;  %v1788_v29 = vmul.f32 %v1787_v40, %v3522_v1 }
 0x20a   :  { %v1144_v25 = vpop.permute.xlu1 %1143  ;;  %v1196_v45 = vpop.permute.xlu0 %1195 }
 0x20b   :  { %v1148_v57 = vadd.f32 %v1144_v25, %v1092_v19  ;;  %v1201_v59 = vadd.f32 %v1196_v45, %v3465_v47 }
 0x20c   :  { %1655 = vrot.lane.b32.xlu1 %v1650_v60, %s2421_s0  ;;  %1681 = vrot.lane.b32.xlu0 %v1677_v54, %s2421_s0 }
 0x20d   :  { %v3518_v13 = vadd.f32 %v1172_v58, %v1148_v57  ;;  %v1761_v57 = vmul.f32 %v1759_v53, %v3546_v16  ;;  %v1801_v58 = vstv %s3558_s11  ;;  %s3773_s11 = sld [smem:[#allocation6 + $0x63]] }
 0x20e   :  { %v1184_v10 = vpop.permute.xlu1 %1183  ;;  %v1210_v34 = vpop.permute.xlu0 %1209 }
 0x20f   :  { %v1188_v47 = vadd.f32 %v1184_v10, %v3479_v62  ;;  %v1215_v9 = vadd.f32 %v1210_v34, %v3481_v20  ;;  %v1309_v62 = vstv %s3553_s10  ;;  %s3762_s10 = sld [smem:[#allocation6 + $0x1b]] }
 0x210   :  { %1669 = vrot.lane.b32.xlu1 %v1664_v15, %s2421_s0  ;;  %1695 = vrot.lane.b32.xlu0 %v1691_v33, %s2421_s0  ;;  %v1299_v15 = vmul.f32 %v1297_v35, %v3234_v4  ;;  %v1829_v35 = vstv %s3582_s13  ;;  %s3792_s13 = sld [smem:[#allocation6 + $0x42]] }
 0x212   :  { %v1198_v38 = vpop.permute.xlu1 %1197  ;;  %v1224_v5 = vpop.permute.xlu0 %1223 }
 0x213   :  { %v1202_v20 = vadd.f32 %v1198_v38, %v3493_v8  ;;  %v1229_v19 = vadd.f32 %v1224_v5, %v3495_v37  ;;  %v1310_v8 = vmul.f32 %v1309_v62, %v3210_v49  ;;  %v1305_v49 = vmul.f32 %v1303_v44, %v3234_v4 }
 0x214   :  { %1683 = vrot.lane.b32.xlu1 %v1678_v21, %s2421_s0  ;;  %1736 = vrot.lane.b32.xlu0 %v1732_v6, %s2420_s20  ;;  %v1775_v21 = vmul.f32 %v1773_v30, %v3546_v16  ;;  %v1802_v6 = vmul.f32 %v1801_v58, %v3522_v1 }
 0x216   :  { %v1212_v50 = vpop.permute.xlu1 %1211  ;;  %v1238_v7 = vpop.permute.xlu0 %1237 }
 0x217   :  { %v1243_v17 = vadd.f32 %v1238_v7, %v1187_v43  ;;  %v1216_v37 = vadd.f32 %v1212_v50, %v3506_v41  ;;  %v1815_v43 = vstv %s3570_s12  ;;  %s3779_s12 = sld [smem:[#allocation6 + $0x87]] }
 0x218   :  { %1697 = vrot.lane.b32.xlu1 %v1692_v23, %s2421_s0  ;;  %1750 = vrot.lane.b32.xlu0 %v1746_v12, %s2420_s20  ;;  %v1789_v12 = vmul.f32 %v1787_v40, %v3546_v16 }
 0x219   :  { %v1294_v0 = vadd.f32 %v1292_v18, %v1243_v17  ;;  %v1816_v17 = vmul.f32 %v1815_v43, %v3522_v1 }
 0x21a   :  { %v1226_v48 = vpop.permute.xlu1 %1225  ;;  %v1252_v51 = vpop.permute.xlu0 %1251 }
 0x21b   :  { %v1257_v28 = vadd.f32 %v1252_v51, %v1201_v59  ;;  %v1230_v41 = vadd.f32 %v1226_v48, %v3518_v13  ;;  %v1311_v59 = vmul.f32 %v1309_v62, %v3234_v4  ;;  %v1803_v51 = vmul.f32 %v1801_v58, %v3546_v16 }
 0x21c   :  { %1738 = vrot.lane.b32.xlu1 %v1733_v32, %s2420_s20  ;;  %1764 = vrot.lane.b32.xlu0 %v1760_v26, %s2420_s20  ;;  %v1830_v32 = vmul.f32 %v1829_v35, %v3522_v1  ;;  %v3610_v26 = vld [vmem:[#allocation2 + $0x38] sm:$0xf]  ;;  %v1870_v4 = vstv %s3592_s14  ;;  %s3795_s14 = sld [smem:[#allocation6 + $0x66]] }
 0x21d   :  { %v1300_v63 = vadd.f32 %v1298_v31, %v1257_v28 }
 0x21e   :  { %v1240_v55 = vpop.permute.xlu1 %1239  ;;  %v1266_v52 = vpop.permute.xlu0 %1265 }
 0x21f   :  { %v1244_v46 = vadd.f32 %v1240_v55, %v1188_v47  ;;  %v1271_v61 = vadd.f32 %v1266_v52, %v1215_v9  ;;  %v1817_v47 = vmul.f32 %v1815_v43, %v3546_v16  ;;  %v1871_v9 = vmul.f32 %v1870_v4, %v3610_v26 }
 0x220   :  { %1752 = vrot.lane.b32.xlu1 %v1747_v3, %s2420_s20  ;;  %1778 = vrot.lane.b32.xlu0 %v1774_v39, %s2420_s20  ;;  %v1884_v52 = vstv %s3601_s15  ;;  %v1430_v3 = vstv %s3606_s16  ;;  %s3799_s15 = sld [smem:[#allocation6 + $0x8a]]  ;;  %s2325_s16 = sld [smem:[#allocation6 + $0x21]] }
 0x221   :  { %v1295_v25 = vadd.f32 %v1293_v11, %v1244_v46  ;;  %v1306_v45 = vadd.f32 %v1304_v24, %v1271_v61  ;;  %v1831_v46 = vmul.f32 %v1829_v35, %v3546_v16  ;;  %v1885_v61 = vmul.f32 %v1884_v52, %v3610_v26  ;;  %v3633_v11 = vld [vmem:[#allocation2 + $0x78] sm:$0xf] }
 0x222   :  { %v1254_v60 = vpop.permute.xlu1 %1253  ;;  %v1280_v54 = vpop.permute.xlu0 %1279 }
 0x223   :  { %v1258_v10 = vadd.f32 %v1254_v60, %v1202_v20  ;;  %v1285_v34 = vadd.f32 %v1280_v54, %v1229_v19  ;;  %v1898_v20 = vstv %s3613_s17  ;;  %v1431_v19 = vmul.f32 %v1430_v3, %v3314_v14  ;;  %s3810_s17 = sld [smem:[#allocation6 + $0x45]] }
 0x224   :  { %1766 = vrot.lane.b32.xlu1 %v1761_v57, %s2420_s20  ;;  %1792 = vrot.lane.b32.xlu0 %v1788_v29, %s2421_s0  ;;  %v1872_v57 = vmul.f32 %v1870_v4, %v3633_v11  ;;  %v1899_v29 = vmul.f32 %v1898_v20, %v3610_v26 }
 0x225   :  { %v1301_v33 = vadd.f32 %v1299_v15, %v1258_v10  ;;  %v1312_v2 = vadd.f32 %v1310_v8, %v1285_v34  ;;  %v1912_v34 = vstv %s3622_s5  ;;  %v1442_v8 = vstv %s3627_s18  ;;  %s3816_s5 = sld [smem:[#allocation6 + $0x8d]]  ;;  %s3829_s18 = sld [smem:[#allocation8]] }
 0x226   :  { %v1268_v38 = vpop.permute.xlu1 %1267  ;;  %v1321_v5 = vpop.permute.xlu0 %1320  ;;  %v1443_v43 = vmul.f32 %v1442_v8, %v3314_v14 }
 0x227   :  { %v1272_v22 = vadd.f32 %v1268_v38, %v1216_v37  ;;  %v1326_v42 = vadd.f32 %v1321_v5, %v1294_v0  ;;  %v1886_v38 = vmul.f32 %v1884_v52, %v3633_v11  ;;  %v1913_v5 = vmul.f32 %v1912_v34, %v3610_v26 }
 0x228   :  { %1780 = vrot.lane.b32.xlu1 %v1775_v21, %s2420_s20  ;;  %1806 = vrot.lane.b32.xlu0 %v1802_v6, %s2421_s0  ;;  %v1926_v21 = vstv %s3631_s19  ;;  %s2153_s19 = sld [smem:[#allocation3]] }
 0x229   :  { %v1307_v50 = vadd.f32 %v1305_v49, %v1272_v22  ;;  %v1448_v49 = vstv %s3640_s21  ;;  %s3831_s21 = sld [smem:[#allocation8 + $0x1]] }
 0x22a   :  { %v1282_v7 = vpop.permute.xlu1 %1281  ;;  %v1335_v23 = vpop.permute.xlu0 %1334 }
 0x22b   :  { %v1286_v53 = vadd.f32 %v1282_v7, %v1230_v41  ;;  %v1340_v18 = vadd.f32 %v1335_v23, %v1300_v63 }
 0x22c   :  { %1794 = vrot.lane.b32.xlu1 %v1789_v12, %s2421_s0  ;;  %1820 = vrot.lane.b32.xlu0 %v1816_v17, %s2421_s0  ;;  %v1900_v12 = vmul.f32 %v1898_v20, %v3633_v11  ;;  %v1927_v17 = vmul.f32 %v1926_v21, %v3610_v26 }
 0x22d   :  { %v1313_v13 = vadd.f32 %v1311_v59, %v1286_v53  ;;  %v1940_v53 = vstv %s3644_s22  ;;  %s3834_s22 = sld [smem:[#allocation8 + $0x2]] }
 0x22e   :  { %v1323_v0 = vpop.permute.xlu1 %1322  ;;  %v1349_v48 = vpop.permute.xlu0 %1348  ;;  %v1942_v20 = vmul.f32 %v1940_v53, %v3633_v11 }
 0x22f   :  { %v1327_v28 = vadd.f32 %v1323_v0, %v1295_v25  ;;  %v1354_v30 = vadd.f32 %v1349_v48, %v1306_v45  ;;  %v1436_v25 = vstv %s3617_s1  ;;  %s3812_s1 = sld [smem:[#allocation6 + $0x69]] }
 0x230   :  { %1808 = vrot.lane.b32.xlu1 %v1803_v51, %s2421_s0  ;;  %1834 = vrot.lane.b32.xlu0 %v1830_v32, %s2421_s0  ;;  %v1437_v15 = vmul.f32 %v1436_v25, %v3314_v14  ;;  %v1438_v59 = vmul.f32 %v1436_v25, %v3338_v27  ;;  %v3690_v25 = vld [vmem:[#allocation2 + $0x19] sm:$0xf] }
 0x232   :  { %v1337_v31 = vpop.permute.xlu1 %1336  ;;  %v1363_v44 = vpop.permute.xlu0 %1362 }
 0x233   :  { %v1341_v63 = vadd.f32 %v1337_v31, %v1301_v33  ;;  %v1368_v55 = vadd.f32 %v1363_v44, %v1312_v2  ;;  %v1954_v44 = vstv %s3654_s23  ;;  %s3836_s23 = sld [smem:[#allocation3 + $0x1]] }
 0x234   :  { %1822 = vrot.lane.b32.xlu1 %v1817_v47, %s2421_s0  ;;  %1875 = vrot.lane.b32.xlu0 %v1871_v9, %s2420_s20  ;;  %v1955_v52 = vmul.f32 %v1954_v44, %v3610_v26 }
 0x236   :  { %v1351_v39 = vpop.permute.xlu1 %1350  ;;  %v1377_v40 = vpop.permute.xlu0 %1376 }
 0x237   :  { %v1355_v24 = vadd.f32 %v1351_v39, %v1307_v50  ;;  %v1382_v62 = vadd.f32 %v1377_v40, %v1326_v42  ;;  %v1432_v42 = vmul.f32 %v1430_v3, %v3338_v27  ;;  %v1968_v40 = vstv %s3664_s2  ;;  %s3839_s2 = sld [smem:[#allocation8 + $0x3]] }
 0x238   :  { %1836 = vrot.lane.b32.xlu1 %v1831_v46, %s2421_s0  ;;  %1889 = vrot.lane.b32.xlu0 %v1885_v61, %s2420_s20  ;;  %v1450_v46 = vmul.f32 %v1448_v49, %v3338_v27 }
 0x239   :  { %v1433_v45 = vadd.f32 %v1431_v19, %v1382_v62  ;;  %v1969_v19 = vmul.f32 %v1968_v40, %v3610_v26 }
 0x23a   :  { %v1365_v60 = vpop.permute.xlu1 %1364  ;;  %v1391_v54 = vpop.permute.xlu0 %1390 }
 0x23b   :  { %v1369_v58 = vadd.f32 %v1365_v60, %v1313_v13  ;;  %v1396_v10 = vadd.f32 %v1391_v54, %v1340_v18  ;;  %v1449_v13 = vmul.f32 %v1448_v49, %v3314_v14  ;;  %v1444_v14 = vmul.f32 %v1442_v8, %v3338_v27 }
 0x23c   :  { %1877 = vrot.lane.b32.xlu1 %v1872_v57, %s2420_s20  ;;  %1903 = vrot.lane.b32.xlu0 %v1899_v29, %s2420_s20  ;;  %v2008_v27 = vstv %s3673_s24  ;;  %v1956_v29 = vmul.f32 %v1954_v44, %v3633_v11  ;;  %v1568_v8 = vstv %s3686_s26  ;;  %s2422_s24 = smov [#allocation9]  }
 0x23d   :  { %v1439_v37 = vadd.f32 %v1437_v15, %v1396_v10  ;;  %v2022_v15 = vstv %s3681_s25  ;;  %v1586_v44 = vstv %s3720_s6  ;;  %s2181_s25 = sshll.u32 %s2422_s24, 4  ;;  %s2182_s25 = int_to_ptr.vmem [resolvable:$true] %s2181_s25 }
 0x23e   :  { %v1379_v33 = vpop.permute.xlu1 %1378  ;;  %v1405_v2 = vpop.permute.xlu0 %1404  ;;  %s2387_s26 = scalar_lea.vmem %s2182_s25, 512  ;;  %p2392_p2 = scmp.lt.s32.totalorder %s2182_s25, %s2182_s25 }
 0x23f   :  { %v1383_v6 = vadd.f32 %v1379_v33, %v1327_v28  ;;  %v1410_v22 = vadd.f32 %v1405_v2, %v1354_v30  ;;  %v1914_v28 = vmul.f32 %v1912_v34, %v3633_v11  ;;  %v1941_v30 = vmul.f32 %v1940_v53, %v3610_v26  ;;  %p2388_p1 = scmp.ne.s32.totalorder %s2182_s25, %s2387_s26  ;;  %p2393_p3 = scmp.lt.s32.totalorder %s2387_s26, %s2387_s26 }
 0x240   :  { %1891 = vrot.lane.b32.xlu1 %v1886_v38, %s2420_s20  ;;  %1917 = vrot.lane.b32.xlu0 %v1913_v5, %s2420_s20  ;;  %v1970_v2 = vmul.f32 %v1968_v40, %v3633_v11  ;;  %v2023_v38 = vmul.f32 %v2022_v15, %v3690_v25  ;;  %v3713_v5 = vld [vmem:[#allocation2 + $0x59] sm:$0xf]  ;;  %v2050_v53 = vstv %s3702_s29 }
 0x241   :  { %v1434_v41 = vadd.f32 %v1432_v42, %v1383_v6  ;;  %v1445_v50 = vadd.f32 %v1443_v43, %v1410_v22  ;;  %v2036_v22 = vstv %s3693_s27  ;;  %v1569_v42 = vmul.f32 %v1568_v8, %v3418_v36  ;;  %p2394_p4 = por %p2393_p3, %p2392_p2 }
 0x242   :  { %v1393_v7 = vpop.permute.xlu1 %1392  ;;  %v1419_v23 = vpop.permute.xlu0 %1418  ;;  %v1574_v43 = vstv %s3697_s28 }
 0x243   :  { %v1397_v18 = vadd.f32 %v1393_v7, %v1341_v63  ;;  %v1424_v35 = vadd.f32 %v1419_v23, %v1368_v55  ;;  %v1928_v55 = vmul.f32 %v1926_v21, %v3633_v11  ;;  %v2010_v7 = vmul.f32 %v2008_v27, %v3713_v5  ;;  %p2395_p5 = pnand %p2394_p4, %p2388_p1 }
 0x244   :  { %1905 = vrot.lane.b32.xlu1 %v1900_v12, %s2420_s20  ;;  %1931 = vrot.lane.b32.xlu0 %v1927_v17, %s2421_s0  ;;  %v2037_v23 = vmul.f32 %v2036_v22, %v3690_v25 }
 0x245   :  { %v1440_v0 = vadd.f32 %v1438_v59, %v1397_v18  ;;  %v1451_v48 = vadd.f32 %v1449_v13, %v1424_v35  ;;  %v1575_v18 = vmul.f32 %v1574_v43, %v3418_v36  ;;  %v1580_v35 = vstv %s3707_s3 }
 0x246   :  { %v1407_v51 = vpop.permute.xlu1 %1406  ;;  %v1460_v32 = vpop.permute.xlu0 %1459 }
 0x247   :  { %v1411_v4 = vadd.f32 %v1407_v51, %v1355_v24  ;;  %v1465_v31 = vadd.f32 %v1460_v32, %v1433_v45  ;;  %v2051_v51 = vmul.f32 %v2050_v53, %v3690_v25  ;;  %v2064_v32 = vstv %s3711_s30 }
 0x248   :  { %1919 = vrot.lane.b32.xlu1 %v1914_v28, %s2420_s20  ;;  %1945 = vrot.lane.b32.xlu0 %v1941_v30, %s2421_s0 }
 0x249   :  { %v1446_v47 = vadd.f32 %v1444_v14, %v1411_v4  ;;  %v1570_v4 = vmul.f32 %v1568_v8, %v3442_v56 }
 0x24a   :  { %v1421_v9 = vpop.permute.xlu1 %1420  ;;  %v1474_v63 = vpop.permute.xlu0 %1473 }
 0x24b   :  { %v1425_v3 = vadd.f32 %v1421_v9, %v1369_v58  ;;  %v1479_v39 = vadd.f32 %v1474_v63, %v1439_v37  ;;  %v2009_v58 = vmul.f32 %v2008_v27, %v3690_v25 }
 0x24c   :  { %1933 = vrot.lane.b32.xlu1 %v1928_v55, %s2421_s0  ;;  %1959 = vrot.lane.b32.xlu0 %v1955_v52, %s2421_s0  ;;  %v2038_v55 = vmul.f32 %v2036_v22, %v3713_v5  ;;  %v2065_v52 = vmul.f32 %v2064_v32, %v3690_v25 }
 0x24d   :  { %v1452_v61 = vadd.f32 %v1450_v46, %v1425_v3  ;;  %v2078_v3 = vstv %s3724_s7  ;;  %v1576_v46 = vmul.f32 %v1574_v43, %v3442_v56 }
 0x24e   :  { %v1462_v24 = vpop.permute.xlu1 %1461  ;;  %v1488_v62 = vpop.permute.xlu0 %1487  ;;  %v2080_v22 = vmul.f32 %v2078_v3, %v3713_v5 }
 0x24f   :  { %v1466_v45 = vadd.f32 %v1462_v24, %v1434_v41  ;;  %v1493_v60 = vadd.f32 %v1488_v62, %v1445_v50 }
 0x250   :  { %1947 = vrot.lane.b32.xlu1 %v1942_v20, %s2421_s0  ;;  %1973 = vrot.lane.b32.xlu0 %v1969_v19, %s2421_s0 }
 0x252   :  { %v1476_v54 = vpop.permute.xlu1 %1475  ;;  %v1502_v57 = vpop.permute.xlu0 %1501 }
 0x253   :  { %v1480_v10 = vadd.f32 %v1476_v54, %v1440_v0  ;;  %v1507_v34 = vadd.f32 %v1502_v57, %v1451_v48  ;;  %v2024_v48 = vmul.f32 %v2022_v15, %v3713_v5  ;;  %v2092_v57 = vstv %s3734_s8 }
 0x254   :  { %1961 = vrot.lane.b32.xlu1 %v1956_v29, %s2421_s0  ;;  %2013 = vrot.lane.b32.xlu0 %v2009_v58, %s2420_s20  ;;  %v1582_v29 = vmul.f32 %v1580_v35, %v3442_v56  ;;  %v2093_v15 = vmul.f32 %v2092_v57, %v3690_v25 }
 0x256   :  { %v1490_v37 = vpop.permute.xlu1 %1489  ;;  %v1516_v33 = vpop.permute.xlu0 %1515 }
 0x257   :  { %v1494_v21 = vadd.f32 %v1490_v37, %v1446_v47  ;;  %v1521_v6 = vadd.f32 %v1516_v33, %v1465_v31  ;;  %v1581_v31 = vmul.f32 %v1580_v35, %v3418_v36  ;;  %v2106_v33 = vstv %s3744_s9 }
 0x258   :  { %1975 = vrot.lane.b32.xlu1 %v1970_v2, %s2421_s0  ;;  %2027 = vrot.lane.b32.xlu0 %v2023_v38, %s2420_s20  ;;  %v1588_v2 = vmul.f32 %v1586_v44, %v3442_v56 }
 0x259   :  { %v1571_v49 = vadd.f32 %v1569_v42, %v1521_v6  ;;  %v2107_v42 = vmul.f32 %v2106_v33, %v3690_v25 }
 0x25a   :  { %v1504_v41 = vpop.permute.xlu1 %1503  ;;  %v1530_v50 = vpop.permute.xlu0 %1529 }
 0x25b   :  { %v1508_v12 = vadd.f32 %v1504_v41, %v1452_v61  ;;  %v1535_v17 = vadd.f32 %v1530_v50, %v1479_v39  ;;  %v1587_v61 = vmul.f32 %v1586_v44, %v3418_v36  ;;  %v2094_v50 = vmul.f32 %v2092_v57, %v3713_v5 }
 0x25c   :  { %2015 = vrot.lane.b32.xlu1 %v2010_v7, %s2420_s20  ;;  %2041 = vrot.lane.b32.xlu0 %v2037_v23, %s2420_s20 }
 0x25d   :  { %v1577_v59 = vadd.f32 %v1575_v18, %v1535_v17  ;;  %v2108_v18 = vmul.f32 %v2106_v33, %v3713_v5 }
 0x25e   :  { %v1518_v13 = vpop.permute.xlu1 %1517  ;;  %v1544_v0 = vpop.permute.xlu0 %1543 }
 0x25f   :  { %v1522_v28 = vadd.f32 %v1518_v13, %v1466_v45  ;;  %v1549_v30 = vadd.f32 %v1544_v0, %v1493_v60  ;;  %v2052_v45 = vmul.f32 %v2050_v53, %v3713_v5  ;;  %v2079_v60 = vmul.f32 %v2078_v3, %v3690_v25 }
 0x260   :  { %2029 = vrot.lane.b32.xlu1 %v2024_v48, %s2420_s20  ;;  %2055 = vrot.lane.b32.xlu0 %v2051_v51, %s2420_s20  ;;  %v1725_v3 = vstv %s3779_s12 }
 0x261   :  { %v1572_v14 = vadd.f32 %v1570_v4, %v1522_v28  ;;  %v1583_v47 = vadd.f32 %v1581_v31, %v1549_v30  ;;  %v1719_v31 = vstv %s3773_s11 }
 0x262   :  { %v1532_v9 = vpop.permute.xlu1 %1531  ;;  %v1558_v63 = vpop.permute.xlu0 %1557 }
 0x263   :  { %v1536_v39 = vadd.f32 %v1532_v9, %v1480_v10  ;;  %v1563_v40 = vadd.f32 %v1558_v63, %v1507_v34  ;;  %v2066_v34 = vmul.f32 %v2064_v32, %v3713_v5 }
 0x264   :  { %2043 = vrot.lane.b32.xlu1 %v2038_v55, %s2420_s20  ;;  %2069 = vrot.lane.b32.xlu0 %v2065_v52, %s2421_s0  ;;  %v1720_v52 = vmul.f32 %v1719_v31, %v3522_v1 }
 0x265   :  { %v1578_v24 = vadd.f32 %v1576_v46, %v1536_v39  ;;  %v1589_v62 = vadd.f32 %v1587_v61, %v1563_v40 }
 0x266   :  { %v1546_v20 = vpop.permute.xlu1 %1545  ;;  %v1598_v19 = vpop.permute.xlu0 %1597 }
 0x267   :  { %v1550_v27 = vadd.f32 %v1546_v20, %v1494_v21  ;;  %v1603_v54 = vadd.f32 %v1598_v19, %v1571_v49  ;;  %v1726_v19 = vmul.f32 %v1725_v3, %v3522_v1 }
 0x268   :  { %2057 = vrot.lane.b32.xlu1 %v2052_v45, %s2420_s20  ;;  %2083 = vrot.lane.b32.xlu0 %v2079_v60, %s2421_s0  ;;  %s3768_s20 = sld [smem:[#allocation6 + $0x3f]] }
 0x269   :  { %v1584_v36 = vadd.f32 %v1582_v29, %v1550_v27 }
 0x26a   :  { %v1560_v58 = vpop.permute.xlu1 %1559  ;;  %v1612_v10 = vpop.permute.xlu0 %1611 }
 0x26b   :  { %v1564_v8 = vadd.f32 %v1560_v58, %v1508_v12  ;;  %v1617_v37 = vadd.f32 %v1612_v10, %v1577_v59  ;;  %v1707_v12 = vstv %s3762_s10 }
 0x26c   :  { %2071 = vrot.lane.b32.xlu1 %v2066_v34, %s2421_s0  ;;  %2097 = vrot.lane.b32.xlu0 %v2093_v15, %s2421_s0  ;;  %v1708_v13 = vmul.f32 %v1707_v12, %v3522_v1  ;;  %v1709_v55 = vmul.f32 %v1707_v12, %v3546_v16 }
 0x26d   :  { %v1590_v38 = vadd.f32 %v1588_v2, %v1564_v8 }
 0x26e   :  { %v1600_v21 = vpop.permute.xlu1 %1599  ;;  %v1626_v6 = vpop.permute.xlu0 %1625  ;;  %v1713_v0 = vstv %s3768_s20 }
 0x26f   :  { %v1604_v43 = vadd.f32 %v1600_v21, %v1572_v14  ;;  %v1631_v49 = vadd.f32 %v1626_v6, %v1583_v47  ;;  %v1714_v4 = vmul.f32 %v1713_v0, %v3522_v1  ;;  %v1715_v20 = vmul.f32 %v1713_v0, %v3546_v16 }
 0x270   :  { %2085 = vrot.lane.b32.xlu1 %v2080_v22, %s2421_s0  ;;  %2111 = vrot.lane.b32.xlu0 %v2107_v42, %s2421_s0 }
 0x272   :  { %v1614_v56 = vpop.permute.xlu1 %1613  ;;  %v1640_v41 = vpop.permute.xlu0 %1639 }
 0x273   :  { %v1618_v7 = vadd.f32 %v1614_v56, %v1578_v24  ;;  %v1645_v23 = vadd.f32 %v1640_v41, %v1589_v62 }
 0x274   :  { %2099 = vrot.lane.b32.xlu1 %v2094_v50, %s2421_s0 }
 0x276   :  { %v1628_v17 = vpop.permute.xlu1 %1627  ;;  %v1654_v53 = vpop.permute.xlu0 %1653 }
 0x277   :  { %v1632_v35 = vadd.f32 %v1628_v17, %v1584_v36  ;;  %v1659_v59 = vadd.f32 %v1654_v53, %v1603_v54  ;;  %v1721_v36 = vmul.f32 %v1719_v31, %v3546_v16  ;;  %v1864_v31 = vstv %s3799_s15 }
 0x278   :  { %2113 = vrot.lane.b32.xlu1 %v2108_v18, %s2421_s0  ;;  %s3790_s0 = sld [smem:[#allocation6 + $0x1e]] }
 0x279   :  { %v1710_v48 = vadd.f32 %v1708_v13, %v1659_v59  ;;  %v1858_v13 = vstv %s3795_s14 }
 0x27a   :  { %v1642_v51 = vpop.permute.xlu1 %1641  ;;  %v1668_v32 = vpop.permute.xlu0 %1667 }
 0x27b   :  { %v1646_v28 = vadd.f32 %v1642_v51, %v1590_v38  ;;  %v1673_v30 = vadd.f32 %v1668_v32, %v1617_v37  ;;  %v1727_v37 = vmul.f32 %v1725_v3, %v3546_v16  ;;  %v1865_v3 = vmul.f32 %v1864_v31, %v3610_v26 }
 0x27d   :  { %v1716_v44 = vadd.f32 %v1714_v4, %v1673_v30  ;;  %v1859_v4 = vmul.f32 %v1858_v13, %v3610_v26 }
 0x27e   :  { %v1656_v14 = vpop.permute.xlu1 %1655  ;;  %v1682_v47 = vpop.permute.xlu0 %1681 }
 0x27f   :  { %v1660_v9 = vadd.f32 %v1656_v14, %v1604_v43  ;;  %v1687_v63 = vadd.f32 %v1682_v47, %v1631_v49  ;;  %v1846_v49 = vstv %s3790_s0 }
 0x280   :  { %v1848_v30 = vmul.f32 %v1846_v49, %v3633_v11 }
 0x281   :  { %v1711_v39 = vadd.f32 %v1709_v55, %v1660_v9  ;;  %v1722_v40 = vadd.f32 %v1720_v52, %v1687_v63 }
 0x282   :  { %v1670_v46 = vpop.permute.xlu1 %1669  ;;  %v1696_v61 = vpop.permute.xlu0 %1695 }
 0x283   :  { %v1674_v24 = vadd.f32 %v1670_v46, %v1618_v7  ;;  %v1701_v62 = vadd.f32 %v1696_v61, %v1645_v23  ;;  %v1847_v7 = vmul.f32 %v1846_v49, %v3610_v26  ;;  %v1852_v23 = vstv %s3792_s13 }
 0x284   :  { %v1853_v59 = vmul.f32 %v1852_v23, %v3610_v26  ;;  %v1854_v52 = vmul.f32 %v1852_v23, %v3633_v11 }
 0x285   :  { %v1717_v45 = vadd.f32 %v1715_v20, %v1674_v24  ;;  %v1728_v60 = vadd.f32 %v1726_v19, %v1701_v62  ;;  %v1860_v62 = vmul.f32 %v1858_v13, %v3633_v11 }
 0x286   :  { %v1684_v27 = vpop.permute.xlu1 %1683  ;;  %v1737_v54 = vpop.permute.xlu0 %1736 }
 0x287   :  { %v1688_v57 = vadd.f32 %v1684_v27, %v1632_v35  ;;  %v1742_v29 = vadd.f32 %v1737_v54, %v1710_v48  ;;  %v1866_v27 = vmul.f32 %v1864_v31, %v3633_v11  ;;  %v1990_v11 = vstv %s3810_s17 }
 0x289   :  { %v1723_v58 = vadd.f32 %v1721_v36, %v1688_v57 }
 0x28a   :  { %v1698_v10 = vpop.permute.xlu1 %1697  ;;  %v1751_v34 = vpop.permute.xlu0 %1750 }
 0x28b   :  { %v1702_v15 = vadd.f32 %v1698_v10, %v1646_v28  ;;  %v1756_v8 = vadd.f32 %v1751_v34, %v1716_v44 }
 0x28d   :  { %v1729_v33 = vadd.f32 %v1727_v37, %v1702_v15 }
 0x28e   :  { %v1739_v1 = vpop.permute.xlu1 %1738  ;;  %v1765_v2 = vpop.permute.xlu0 %1764 }
 0x28f   :  { %v1743_v38 = vadd.f32 %v1739_v1, %v1711_v39  ;;  %v1770_v21 = vadd.f32 %v1765_v2, %v1722_v40 }
 0x292   :  { %v1753_v6 = vpop.permute.xlu1 %1752  ;;  %v1779_v22 = vpop.permute.xlu0 %1778 }
 0x293   :  { %v1757_v42 = vadd.f32 %v1753_v6, %v1717_v45  ;;  %v1784_v43 = vadd.f32 %v1779_v22, %v1728_v60  ;;  %v1991_v6 = vmul.f32 %v1990_v11, %v3690_v25  ;;  %v1996_v22 = vstv %s3812_s1 }
 0x294   :  { %v1997_v23 = vmul.f32 %v1996_v22, %v3690_v25 }
 0x296   :  { %v1767_v16 = vpop.permute.xlu1 %1766  ;;  %v1793_v56 = vpop.permute.xlu0 %1792 }
 0x297   :  { %v1771_v41 = vadd.f32 %v1767_v16, %v1723_v58  ;;  %v1798_v50 = vadd.f32 %v1793_v56, %v1742_v29  ;;  %v1984_v58 = vstv %s2325_s16 }
 0x298   :  { %v1985_v37 = vmul.f32 %v1984_v58, %v3690_v25 }
 0x299   :  { %v1849_v12 = vadd.f32 %v1847_v7, %v1798_v50  ;;  %v1986_v7 = vmul.f32 %v1984_v58, %v3713_v5 }
 0x29a   :  { %v1781_v17 = vpop.permute.xlu1 %1780  ;;  %v1807_v53 = vpop.permute.xlu0 %1806 }
 0x29b   :  { %v1785_v18 = vadd.f32 %v1781_v17, %v1729_v33  ;;  %v1812_v35 = vadd.f32 %v1807_v53, %v1756_v8 }
 0x29d   :  { %v1855_v0 = vadd.f32 %v1853_v59, %v1812_v35 }
 0x29e   :  { %v1795_v48 = vpop.permute.xlu1 %1794  ;;  %v1821_v51 = vpop.permute.xlu0 %1820 }
 0x29f   :  { %v1799_v32 = vadd.f32 %v1795_v48, %v1743_v38  ;;  %v1826_v28 = vadd.f32 %v1821_v51, %v1770_v21  ;;  %v1992_v51 = vmul.f32 %v1990_v11, %v3713_v5 }
 0x2a1   :  { %v1850_v44 = vadd.f32 %v1848_v30, %v1799_v32  ;;  %v1861_v14 = vadd.f32 %v1859_v4, %v1826_v28 }
 0x2a2   :  { %v1809_v47 = vpop.permute.xlu1 %1808  ;;  %v1835_v9 = vpop.permute.xlu0 %1834 }
 0x2a3   :  { %v1813_v63 = vadd.f32 %v1809_v47, %v1757_v42  ;;  %v1840_v55 = vadd.f32 %v1835_v9, %v1784_v43  ;;  %v1998_v47 = vmul.f32 %v1996_v22, %v3713_v5 }
 0x2a5   :  { %v1856_v39 = vadd.f32 %v1854_v52, %v1813_v63  ;;  %v1867_v40 = vadd.f32 %v1865_v3, %v1840_v55 }
 0x2a6   :  { %v1823_v46 = vpop.permute.xlu1 %1822  ;;  %v1876_v61 = vpop.permute.xlu0 %1875 }
 0x2a7   :  { %v1827_v24 = vadd.f32 %v1823_v46, %v1771_v41  ;;  %v1881_v10 = vadd.f32 %v1876_v61, %v1849_v12  ;;  %v2002_v12 = vstv %s3816_s5 }
 0x2a8   :  { %v2003_v32 = vmul.f32 %v2002_v12, %v3690_v25 }
 0x2a9   :  { %v1862_v20 = vadd.f32 %v1860_v62, %v1827_v24  ;;  %v2151_v62 = vlaneseq }
 0x2aa   :  { %v1837_v19 = vpop.permute.xlu1 %1836  ;;  %v1890_v45 = vpop.permute.xlu0 %1889 }
 0x2ab   :  { %v1841_v60 = vadd.f32 %v1837_v19, %v1785_v18  ;;  %v1895_v33 = vadd.f32 %v1890_v45, %v1855_v0  ;;  %v2120_v45 = vstv %s3829_s18 }
 0x2ad   :  { %v1868_v54 = vadd.f32 %v1866_v27, %v1841_v60  ;;  %v2152_v27 = vand.u32 127, %v2151_v62 }
 0x2ae   :  { %v1878_v57 = vpop.permute.xlu1 %1877  ;;  %v1904_v29 = vpop.permute.xlu0 %1903 }
 0x2af   :  { %v1882_v42 = vadd.f32 %v1878_v57, %v1850_v44  ;;  %v1909_v43 = vadd.f32 %v1904_v29, %v1861_v14  ;;  %v2154_v57 = vstv %s2153_s19 }
 0x2b0   :  { %vm3841_vm2 = vcmp.ge.s32.totalorder %v2152_v27, %v2154_v57 }
 0x2b2   :  { %v1892_v26 = vpop.permute.xlu1 %1891  ;;  %v1918_v36 = vpop.permute.xlu0 %1917 }
 0x2b3   :  { %v1896_v17 = vadd.f32 %v1892_v26, %v1856_v39  ;;  %v1923_v53 = vadd.f32 %v1918_v36, %v1867_v40  ;;  %v2004_v39 = vmul.f32 %v2002_v12, %v3713_v5  ;;  %v2128_v36 = vstv %s3831_s21 }
 0x2b6   :  { %v1906_v34 = vpop.permute.xlu1 %1905  ;;  %v1932_v15 = vpop.permute.xlu0 %1931 }
 0x2b7   :  { %v1937_v8 = vadd.f32 %v1932_v15, %v1881_v10  ;;  %v1910_v28 = vadd.f32 %v1906_v34, %v1862_v20 }
 0x2b9   :  { %v1987_v1 = vadd.f32 %v1985_v37, %v1937_v8 }
 0x2ba   :  { %v1920_v2 = vpop.permute.xlu1 %1919  ;;  %v1946_v38 = vpop.permute.xlu0 %1945 }
 0x2bb   :  { %v1951_v21 = vadd.f32 %v1946_v38, %v1895_v33  ;;  %v1924_v9 = vadd.f32 %v1920_v2, %v1868_v54  ;;  %v2136_v2 = vstv %s3834_s22 }
 0x2bd   :  { %v1993_v49 = vadd.f32 %v1991_v6, %v1951_v21 }
 0x2be   :  { %v1934_v16 = vpop.permute.xlu1 %1933  ;;  %v1960_v56 = vpop.permute.xlu0 %1959 }
 0x2bf   :  { %v1938_v41 = vadd.f32 %v1934_v16, %v1882_v42  ;;  %v1965_v50 = vadd.f32 %v1960_v56, %v1909_v43  ;;  %v2161_v43 = vstv %s3836_s23 }
 0x2c0   :  { %vm3854_vm4 = vcmp.ge.s32.totalorder %v2152_v27, %v2161_v43 }
 0x2c1   :  { %v1988_v18 = vadd.f32 %v1986_v7, %v1938_v41  ;;  %v1999_v35 = vadd.f32 %v1997_v23, %v1965_v50  ;;  %v2144_v23 = vstv %s3839_s2 }
 0x2c2   :  { %v1948_v59 = vpop.permute.xlu1 %1947  ;;  %v1974_v13 = vpop.permute.xlu0 %1973 }
 0x2c3   :  { %v1952_v0 = vadd.f32 %v1948_v59, %v1896_v17  ;;  %v1979_v48 = vadd.f32 %v1974_v13, %v1923_v53 }
 0x2c5   :  { %v1994_v30 = vadd.f32 %v1992_v51, %v1952_v0  ;;  %v2005_v4 = vadd.f32 %v2003_v32, %v1979_v48 }
 0x2c6   :  { %v1962_v31 = vpop.permute.xlu1 %1961  ;;  %v2014_v44 = vpop.permute.xlu0 %2013 }
 0x2c7   :  { %v1966_v14 = vadd.f32 %v1962_v31, %v1910_v28  ;;  %v2019_v20 = vadd.f32 %v2014_v44, %v1987_v1 }
 0x2c9   :  { %v2000_v63 = vadd.f32 %v1998_v47, %v1966_v14 }
 0x2ca   :  { %v1976_v55 = vpop.permute.xlu1 %1975  ;;  %v2028_v52 = vpop.permute.xlu0 %2027 }
 0x2cb   :  { %v1980_v3 = vadd.f32 %v1976_v55, %v1924_v9  ;;  %v2033_v54 = vadd.f32 %v2028_v52, %v1993_v49 }
 0x2cd   :  { %v3827_v40 = vadd.f32 %v2004_v39, %v1980_v3 }
 0x2ce   :  { %v2016_v46 = vpop.permute.xlu1 %2015  ;;  %v2042_v61 = vpop.permute.xlu0 %2041 }
 0x2cf   :  { %v2020_v8 = vadd.f32 %v2016_v46, %v1988_v18  ;;  %v2047_v37 = vadd.f32 %v2042_v61, %v1999_v35 }
 0x2d2   :  { %v2030_v25 = vpop.permute.xlu1 %2029  ;;  %v2056_v24 = vpop.permute.xlu0 %2055 }
 0x2d3   :  { %v2034_v49 = vadd.f32 %v2030_v25, %v1994_v30  ;;  %v2061_v50 = vadd.f32 %v2056_v24, %v2005_v4 }
 0x2d6   :  { %v2044_v19 = vpop.permute.xlu1 %2043  ;;  %v2070_v60 = vpop.permute.xlu0 %2069 }
 0x2d7   :  { %v2075_v5 = vadd.f32 %v2070_v60, %v2019_v20  ;;  %v2048_v0 = vadd.f32 %v2044_v19, %v2000_v63 }
 0x2d9   :  { %v2121_v29 = vadd.f32 %v2120_v45, %v2075_v5 }
 0x2da   :  { %v2058_v26 = vpop.permute.xlu1 %2057  ;;  %v2084_v58 = vpop.permute.xlu0 %2083 }
 0x2db   :  { %v2123_v10 = vmax.f32 %v2121_v29, 0.0  ;;  %v2089_v34 = vadd.f32 %v2084_v58, %v2033_v54  ;;  %v2062_v9 = vadd.f32 %v2058_v26, %v3827_v40 }
 0x2dd   :  { %v2125_v11 = vmin.f32 %v2123_v10, 20.0  ;;  %v2129_v33 = vadd.f32 %v2128_v36, %v2089_v34 }
 0x2de   :  { %v2072_v1 = vpop.permute.xlu1 %2071  ;;  %v2098_v38 = vpop.permute.xlu0 %2097 }
 0x2df   :  { %v2156_v21 = vsel %vm3841_vm2, 0.0, %v2125_v11  ;;  %v2131_v6 = vmax.f32 %v2129_v33, 0.0  ;;  %v2076_v22 = vadd.f32 %v2072_v1, %v2020_v8  ;;  %v2103_v42 = vadd.f32 %v2098_v38, %v2047_v37 }
 0x2e0   :  { %2168 = vst.msk [vmem:[#allocation9] sm:$0xf] %vm2167_vm3, %v2156_v21 }
 0x2e1   :  { %v2133_v16 = vmin.f32 %v2131_v6, 20.0  ;;  %v2122_v56 = vadd.f32 %v2120_v45, %v2076_v22  ;;  %v2137_v41 = vadd.f32 %v2136_v2, %v2103_v42 }
 0x2e2   :  { %v2086_v7 = vpop.permute.xlu1 %2085  ;;  %v2112_v12 = vpop.permute.xlu0 %2111 }
 0x2e3   :  { %v2157_v17 = vsel %vm3841_vm2, 0.0, %v2133_v16  ;;  %v2124_v53 = vmax.f32 %v2122_v56, 0.0  ;;  %v2139_v18 = vmax.f32 %v2137_v41, 0.0  ;;  %v2090_v35 = vadd.f32 %v2086_v7, %v2034_v49 }
 0x2e4   :  { %2169 = vst.msk [vmem:[#allocation9 + $0x4] sm:$0xf] %vm2167_vm3, %v2157_v17  ;;  %v2117_v13 = vadd.f32 %v2112_v12, %v2061_v50 }
 0x2e5   :  { %v2126_v48 = vmin.f32 %v2124_v53, 20.0  ;;  %v2141_v51 = vmin.f32 %v2139_v18, 20.0  ;;  %v2130_v32 = vadd.f32 %v2128_v36, %v2090_v35 }
 0x2e6   :  { %v2145_v28 = vadd.f32 %v2144_v23, %v2117_v13  ;;  %v2100_v30 = vpop.permute.xlu1 %2099 }
 0x2e7   :  { %v2163_v4 = vsel %vm3854_vm4, 0.0, %v2126_v48  ;;  %v2158_v31 = vsel %vm3841_vm2, 0.0, %v2141_v51  ;;  %v2132_v44 = vmax.f32 %v2130_v32, 0.0  ;;  %v2104_v14 = vadd.f32 %v2100_v30, %v2048_v0 }
 0x2e8   :  { %2172 = vst.msk [vmem:[#allocation9 + $0x10] sm:$0xf] %vm2167_vm3, %v2163_v4  ;;  %2170 = vst.msk [vmem:[#allocation9 + $0x8] sm:$0xf] %vm2167_vm3, %v2158_v31  ;;  %v2147_v47 = vmax.f32 %v2145_v28, 0.0 }
 0x2e9   :  { %v2134_v63 = vmin.f32 %v2132_v44, 20.0  ;;  %v2138_v55 = vadd.f32 %v2136_v2, %v2104_v14 }
 0x2ea   :  { %v2149_v52 = vmin.f32 %v2147_v47, 20.0  ;;  %v2114_v3 = vpop.permute.xlu1 %2113 }
 0x2eb   :  { %v2164_v39 = vsel %vm3854_vm4, 0.0, %v2134_v63  ;;  %v2140_v46 = vmax.f32 %v2138_v55, 0.0  ;;  %v2118_v61 = vadd.f32 %v2114_v3, %v2062_v9 }
 0x2ec   :  { %2173 = vst.msk [vmem:[#allocation9 + $0x14] sm:$0xf] %vm2167_vm3, %v2164_v39  ;;  %v2159_v25 = vsel %vm3841_vm2, 0.0, %v2149_v52 }
 0x2ed   :  { %2171 = vst.msk [vmem:[#allocation9 + $0xc] sm:$0xf] %vm2167_vm3, %v2159_v25  ;;  %v2142_v24 = vmin.f32 %v2140_v46, 20.0  ;;  %v2146_v62 = vadd.f32 %v2144_v23, %v2118_v61 }
 0x2ef   :  { %v2165_v40 = vsel %vm3854_vm4, 0.0, %v2142_v24  ;;  %v2148_v20 = vmax.f32 %v2146_v62, 0.0 }
 0x2f0   :  { %2174 = vst.msk [vmem:[#allocation9 + $0x18] sm:$0xf] %vm2167_vm3, %v2165_v40 }
 0x2f1   :  { %v2150_v19 = vmin.f32 %v2148_v20, 20.0 }
 0x2f3   :  { %v2166_v45 = vsel %vm3854_vm4, 0.0, %v2150_v19 }
 0x2f4   :  { %2175 = vst.msk [vmem:[#allocation9 + $0x1c] sm:$0xf] %vm2167_vm3, %v2166_v45 }
 0x2f5   :  { %2398 = shalt.err (!%p2395_p5)
}
 0x2f6   :  { %s2399_s29 = scalar_lea.hbm %s3893_s4, 512 }
 0x2f7   :  { %p2400_p6 = scmp.ne.s32.totalorder %s3893_s4, %s2399_s29  ;;  %p2403_p7 = scmp.lt.u32.totalorder %s2399_s29, %s3893_s4 }
 0x2f9   :  { %p2405_p8 = pnand %p2403_p7, %p2400_p6 }
 0x2fb   :  { %2408 = shalt.err (!%p2405_p8)
}
 0x2fc   :  { %s2423_s8 = smov 64   ;;  %s2424_s9 = smov 4  }
 0x2fd   :  { %2187 = dma.vmem_to_hbm [thread:$0]  %s2182_s25, 512, %s3893_s4, [#allocation4], %s2423_s8, %s2423_s8, %s2424_s9  }
 0x2fe   :  { %2413 = dma.done.wait [#allocation4], 512  }
 0x2ff   :  { %2414 = vsyncadd [#allocation4], 4294966784 }
 0x300   :  { %2191 = vsyncpa [#allocation4], 1 }
 0x301   :  { %2192 = vsyncpa [#allocation5], 1 }
 0x302   :  { %2193 = vsyncpa [#allocation7], 1 }

</bundles_post_ra>
